<compile_context>
chip_gen: v7x
topology: tpu7x:2x2x1
jax: 0.10.0
libtpu: 0.0.40
codegen_flags: <defaults>
</compile_context>

<pallas_src>
import math
from functools import partial

import jax
import jax.numpy as jnp
import numpy as np
from jax.experimental import pallas as pl
from jax.experimental.pallas import tpu as pltpu


def _global_attention_kernel(mask_ref, m_ref, wq_ref, wk_ref, wv_ref,
                             wg_ref, bg_ref, wo_ref, bo_ref, out_ref,
                             *, no_heads, c_hidden, seq, block_res, inf, eps):
    TB, S = block_res, seq
    TBS = TB * S
    C = m_ref.shape[-1]

    m = m_ref[...]                                   # (TBS, C) bf16
    mask_enc = mask_ref[...]                         # (TB, TBS) f32: own -> mask value, cross -> -1

    # ---- masked per-residue pooled mean of m over the sequence axis -> (TB, C) ----
    pool_w = jnp.maximum(mask_enc, 0.0)                                  # zero out cross slots
    mask_sum = jnp.sum(pool_w, axis=-1, keepdims=True)                   # (TB, 1)
    q_sum = jnp.dot(pool_w.astype(m.dtype), m,
                    preferred_element_type=jnp.float32)                  # (TB, C) f32
    q_avg = q_sum * pl.reciprocal(mask_sum + eps, approx=True)           # (TB, C) f32
    q_avg_lp = q_avg.astype(m.dtype)                                     # bf16 matmul input

    # additive bias: 0 / -inf for own (unmasked / masked) positions, -2*inf for other residues
    bias = inf * (mask_enc - 1.0)                                        # (TB, TBS) f32

    # ---- shared K / V projections over all TB*S rows ----
    k = jnp.dot(m, wk_ref[...], preferred_element_type=jnp.float32)      # (TBS, D) f32
    v = jnp.dot(m, wv_ref[...], preferred_element_type=jnp.float32)      # (TBS, D) f32

    # selection matrix repeating each residue's pooled result over its S rows
    rr = jax.lax.broadcasted_iota(jnp.int32, (TBS, TB), 0)
    cc = jax.lax.broadcasted_iota(jnp.int32, (TBS, TB), 1)
    rep = jnp.logical_and(rr >= cc * S, rr < cc * S + S).astype(jnp.float32)  # (TBS, TB)

    scale = c_hidden ** (-0.5)
    acc = jnp.zeros((TBS, C), dtype=jnp.float32)

    # Static (trace-time unrolled) head loop; all slicing is on leading (head) dims.
    for h in range(no_heads):
        q_h = jnp.dot(q_avg_lp, wq_ref[h],
                      preferred_element_type=jnp.float32) * scale        # (TB, D)

        # logits over the packed sequence axis (contract on D, no transpose)
        logits = jax.lax.dot_general(q_h, k, (((1,), (1,)), ((), ())),
                                     preferred_element_type=jnp.float32)  # (TB, TBS)
        logits = logits + bias
        logits = logits - jnp.max(logits, axis=-1, keepdims=True)
        p = jnp.exp(logits)
        p = p * pl.reciprocal(jnp.sum(p, axis=-1, keepdims=True), approx=True)

        o_h = jnp.dot(p, v, preferred_element_type=jnp.float32)           # (TB, D)
        o_rows = jnp.dot(rep, o_h, preferred_element_type=jnp.float32)    # (TBS, D)

        g_h = jnp.dot(m, wg_ref[h], preferred_element_type=jnp.float32)   # (TBS, D)
        g_h = jax.nn.sigmoid(g_h + bg_ref[h])                             # + (1, D), f32

        og = (g_h * o_rows).astype(m.dtype)                               # (TBS, D) bf16
        acc = acc + jnp.dot(og, wo_ref[h],
                            preferred_element_type=jnp.float32)           # (TBS, C) f32

    out_ref[...] = (acc + bo_ref[...]).astype(out_ref.dtype)


def global_attention(m, mask, params, *, no_heads, c_hidden, inf=1e9, eps=1e-10,
                     block_residues=8):
    """m: [..., N_seq, c_in], mask: [..., N_seq] (leading dims = batch * N_res)."""
    wq, wk, wv = params["wq"], params["wk"], params["wv"]
    wg, bg = params["wg"], params["bg"]
    wo, bo = params["wo"], params["bo"]

    batch_shape = m.shape[:-2]
    S, C = m.shape[-2], m.shape[-1]
    H, D = no_heads, c_hidden
    BR = int(np.prod(batch_shape)) if batch_shape else 1

    # residues packed per grid step (multiple of 8 for sublane alignment)
    TB = max(8, int(block_residues))
    TB = int(-(-TB // 8) * 8)
    BRp = int(-(-BR // TB) * TB)
    TBS = TB * S

    m2 = m.reshape(BR, S, C)
    mask2 = mask.reshape(BR, S).astype(jnp.float32)
    if BRp != BR:
        m2 = jnp.pad(m2, ((0, BRp - BR), (0, 0), (0, 0)))
        mask2 = jnp.pad(mask2, ((0, BRp - BR), (0, 0)))
    m_flat = m2.reshape(BRp * S, C).astype(jnp.bfloat16)

    # Lane-friendly mask encoding per residue row: its own S slots inside the TB-block
    # hold the mask values, every other slot holds -1 (-> -2*inf bias in the kernel).
    slot = jnp.arange(BRp, dtype=jnp.int32) % TB                           # (BRp,)
    own = (jnp.arange(TBS, dtype=jnp.int32)[None, :] // S) == slot[:, None]  # (BRp, TBS)
    mask_rep = jnp.tile(mask2, (1, TB))                                    # (BRp, TBS)
    mask_enc = jnp.where(own, mask_rep, -1.0).astype(jnp.float32)

    # Head-major weight layouts (done once, outside the kernel), bf16 matmul inputs.
    wq_h = wq.reshape(C, H, D).transpose(1, 0, 2).astype(jnp.bfloat16)     # (H, C, D)
    wg_h = wg.reshape(C, H, D).transpose(1, 0, 2).astype(jnp.bfloat16)     # (H, C, D)
    wo_h = wo.reshape(H, D, C).astype(jnp.bfloat16)                        # (H, D, C)
    wk_b = wk.astype(jnp.bfloat16)                                         # (C, D)
    wv_b = wv.astype(jnp.bfloat16)                                         # (C, D)
    bg_h = jnp.reshape(bg, (H, 1, D)).astype(jnp.float32)                  # (H, 1, D)
    bo_b = jnp.reshape(bo, (1, C)).astype(jnp.float32)                     # (1, C)

    kernel = partial(_global_attention_kernel, no_heads=H, c_hidden=D,
                     seq=S, block_res=TB, inf=float(inf), eps=float(eps))

    out = pl.pallas_call(
        kernel,
        out_shape=jax.ShapeDtypeStruct((BRp * S, C), jnp.float32),
        grid=(BRp // TB,),
        in_specs=[
            pl.BlockSpec((TB, TBS), lambda i: (i, 0)),       # encoded mask
            pl.BlockSpec((TBS, C), lambda i: (i, 0)),        # m slab (TB residues)
            pl.BlockSpec((H, C, D), lambda i: (0, 0, 0)),    # Wq (head-major)
            pl.BlockSpec((C, D), lambda i: (0, 0)),          # Wk
            pl.BlockSpec((C, D), lambda i: (0, 0)),          # Wv
            pl.BlockSpec((H, C, D), lambda i: (0, 0, 0)),    # Wg (head-major)
            pl.BlockSpec((H, 1, D), lambda i: (0, 0, 0)),    # b_g (head-major)
            pl.BlockSpec((H, D, C), lambda i: (0, 0, 0)),    # Wo (head-major)
            pl.BlockSpec((1, C), lambda i: (0, 0)),          # b_o
        ],
        out_specs=pl.BlockSpec((TBS, C), lambda i: (i, 0)),
        compiler_params=pltpu.CompilerParams(
            dimension_semantics=("parallel",),
            vmem_limit_bytes=32 * 1024 * 1024,
        ),
    )(mask_enc, m_flat, wq_h, wk_b, wv_b, wg_h, bg_h, wo_h, bo_b)

    out = out.reshape(BRp, S, C)[:BR].reshape(*batch_shape, S, C)
    return out.astype(m.dtype)


def ref_global_attention(m, mask, params, *, no_heads, c_hidden, inf=1e9, eps=1e-10):
    """Pure-JAX reference mirroring the PyTorch forward exactly (f32)."""
    wq, wk, wv = params["wq"], params["wk"], params["wv"]
    wg, bg = params["wg"], params["bg"]
    wo, bo = params["wo"], params["bo"]

    q = jnp.sum(m * mask[..., None], axis=-2) / (jnp.sum(mask, axis=-1)[..., None] + eps)
    q = q @ wq
    q = q * (c_hidden ** (-0.5))
    q = q.reshape(q.shape[:-1] + (no_heads, c_hidden))
    k = m @ wk
    v = m @ wv
    bias = (inf * (mask - 1.0))[..., :, None, :]
    a = jnp.einsum("...hd,...sd->...hs", q, k) + bias
    a = jax.nn.softmax(a, axis=-1)
    o = jnp.einsum("...hs,...sd->...hd", a, v)
    g = jax.nn.sigmoid(m @ wg + bg.reshape(-1))
    g = g.reshape(g.shape[:-1] + (no_heads, c_hidden))
    o = o[..., None, :, :] * g
    o = o.reshape(o.shape[:-2] + (no_heads * c_hidden,))
    return o @ wo + bo.reshape(-1)


if __name__ == "__main__":
    key = jax.random.PRNGKey(0)
    B, R, S, C = 2, 16, 16, 64          # batch, N_res, N_seq, c_in
    c_hidden, no_heads = 32, 4
    inf, eps = 1e9, 1e-10
    HD = c_hidden * no_heads

    keys = jax.random.split(key, 8)
    m = jax.random.normal(keys[0], (B, R, S, C), dtype=jnp.float32)
    mask = (jax.random.uniform(keys[1], (B, R, S)) > 0.25).astype(jnp.float32)

    def glorot(k, shape):
        fan_in, fan_out = shape
        lim = math.sqrt(6.0 / (fan_in + fan_out))
        return jax.random.uniform(k, shape, jnp.float32, -lim, lim)

    # PyTorch Linear weights are [out, in]; we store the transposed [in, out] form so
    # the kernel computes m @ W directly.  The module inits linear_g as (W=0, b=1) and
    # linear_o as (W=0, b=0); deterministic random values are used instead so the
    # kernel output is nontrivial.
    params = dict(
        wq=glorot(keys[2], (C, HD)),
        wk=glorot(keys[3], (C, c_hidden)),
        wv=glorot(keys[4], (C, c_hidden)),
        wg=glorot(keys[5], (C, HD)),
        bg=0.1 * jax.random.normal(keys[6], (1, HD), dtype=jnp.float32),
        wo=glorot(keys[7], (HD, C)),
        bo=jnp.zeros((1, C), dtype=jnp.float32),
    )

    out = global_attention(m, mask, params, no_heads=no_heads, c_hidden=c_hidden,
                           inf=inf, eps=eps, block_residues=8)
    out = jax.block_until_ready(out)

    ref = ref_global_attention(m, mask, params, no_heads=no_heads, c_hidden=c_hidden,
                               inf=inf, eps=eps)
    # bf16 matmul inputs + approximate reciprocals -> loosened tolerance vs f32 reference
    np.testing.assert_allclose(np.asarray(out), np.asarray(ref), rtol=2e-2, atol=2e-2)
    print("KERNEL_OK")
</pallas_src>

<mosaic_0001>
module attributes {stable_mosaic.version = 11 : i64} {
  func.func @_global_attention_kernel(%arg0: i32, %arg1: memref<8x128xf32, #tpu.memory_space<vmem>>, %arg2: memref<128x64xbf16, #tpu.memory_space<vmem>>, %arg3: memref<4x64x32xbf16, #tpu.memory_space<vmem>>, %arg4: memref<64x32xbf16, #tpu.memory_space<vmem>>, %arg5: memref<64x32xbf16, #tpu.memory_space<vmem>>, %arg6: memref<4x64x32xbf16, #tpu.memory_space<vmem>>, %arg7: memref<4x1x32xf32, #tpu.memory_space<vmem>>, %arg8: memref<4x32x64xbf16, #tpu.memory_space<vmem>>, %arg9: memref<1x64xf32, #tpu.memory_space<vmem>>, %arg10: memref<128x64xf32, #tpu.memory_space<vmem>>) attributes {dimension_semantics = [#tpu.dimension_semantics<parallel>], iteration_bounds = array<i64: 4>, scalar_prefetch = 0 : i64, scratch_operands = 0 : i64, tpu.core_type = #tpu.core_type<tc>, window_params = [{transform_indices = @transform_0, window_bounds = array<i64: 8, 128>}, {transform_indices = @transform_1, window_bounds = array<i64: 128, 64>}, {pipeline_mode = #tpu.pipeline_mode<synchronous>, transform_indices = @transform_2, window_bounds = array<i64: 4, 64, 32>}, {pipeline_mode = #tpu.pipeline_mode<synchronous>, transform_indices = @transform_3, window_bounds = array<i64: 64, 32>}, {pipeline_mode = #tpu.pipeline_mode<synchronous>, transform_indices = @transform_4, window_bounds = array<i64: 64, 32>}, {pipeline_mode = #tpu.pipeline_mode<synchronous>, transform_indices = @transform_5, window_bounds = array<i64: 4, 64, 32>}, {pipeline_mode = #tpu.pipeline_mode<synchronous>, transform_indices = @transform_6, window_bounds = array<i64: 4, 1, 32>}, {pipeline_mode = #tpu.pipeline_mode<synchronous>, transform_indices = @transform_7, window_bounds = array<i64: 4, 32, 64>}, {pipeline_mode = #tpu.pipeline_mode<synchronous>, transform_indices = @transform_8, window_bounds = array<i64: 1, 64>}, {transform_indices = @transform_9, window_bounds = array<i64: 128, 64>}]} {
    %c0 = arith.constant 0 : index
    %c0_0 = arith.constant 0 : index
    %0 = vector.load %arg2[%c0, %c0_0] : memref<128x64xbf16, #tpu.memory_space<vmem>>, vector<128x64xbf16>
    %c0_1 = arith.constant 0 : index
    %c0_2 = arith.constant 0 : index
    %1 = vector.load %arg1[%c0_1, %c0_2] : memref<8x128xf32, #tpu.memory_space<vmem>>, vector<8x128xf32>
    %cst = arith.constant 0.000000e+00 : f32
    %2 = vector.broadcast %cst : f32 to vector<8x128xf32>
    %3 = arith.maximumf %1, %2 : vector<8x128xf32>
    %cst_3 = arith.constant dense<0.000000e+00> : vector<8xf32>
    %4 = vector.multi_reduction <add>, %3, %cst_3 [1] : vector<8x128xf32> to vector<8xf32>
    %5 = vector.shape_cast %4 : vector<8xf32> to vector<8x1xf32>
    %6 = arith.truncf %3 : vector<8x128xf32> to vector<8x128xbf16>
    %cst_4 = arith.constant dense<0.000000e+00> : vector<8x64xf32>
    %7 = tpu.matmul %6, %0, %cst_4 {dimension_numbers = #tpu.dot_dimension_numbers<[1], [0], [0], [1], [0, 0, 1, 1], [], []>} : vector<8x128xbf16>, vector<128x64xbf16>, vector<8x64xf32> -> vector<8x64xf32>
    %cst_5 = arith.constant 1.000000e-10 : f32
    %8 = vector.broadcast %cst_5 : f32 to vector<8x1xf32>
    %9 = arith.addf %5, %8 : vector<8x1xf32>
    %10 = tpu.reciprocal %9 {approx = true} : vector<8x1xf32> -> vector<8x1xf32>
    %11 = vector.broadcast %10 : vector<8x1xf32> to vector<8x64xf32>
    %12 = arith.mulf %7, %11 : vector<8x64xf32>
    %13 = arith.truncf %12 : vector<8x64xf32> to vector<8x64xbf16>
    %cst_6 = arith.constant 1.000000e+00 : f32
    %14 = vector.broadcast %cst_6 : f32 to vector<8x128xf32>
    %15 = arith.subf %1, %14 : vector<8x128xf32>
    %cst_7 = arith.constant 1.000000e+09 : f32
    %16 = vector.broadcast %cst_7 : f32 to vector<8x128xf32>
    %17 = arith.mulf %16, %15 : vector<8x128xf32>
    %c0_8 = arith.constant 0 : index
    %c0_9 = arith.constant 0 : index
    %18 = vector.load %arg4[%c0_8, %c0_9] : memref<64x32xbf16, #tpu.memory_space<vmem>>, vector<64x32xbf16>
    %cst_10 = arith.constant dense<0.000000e+00> : vector<128x32xf32>
    %19 = tpu.matmul %0, %18, %cst_10 {dimension_numbers = #tpu.dot_dimension_numbers<[1], [0], [0], [1], [0, 0, 1, 1], [], []>} : vector<128x64xbf16>, vector<64x32xbf16>, vector<128x32xf32> -> vector<128x32xf32>
    %c0_11 = arith.constant 0 : index
    %c0_12 = arith.constant 0 : index
    %20 = vector.load %arg5[%c0_11, %c0_12] : memref<64x32xbf16, #tpu.memory_space<vmem>>, vector<64x32xbf16>
    %cst_13 = arith.constant dense<0.000000e+00> : vector<128x32xf32>
    %21 = tpu.matmul %0, %20, %cst_13 {dimension_numbers = #tpu.dot_dimension_numbers<[1], [0], [0], [1], [0, 0, 1, 1], [], []>} : vector<128x64xbf16>, vector<64x32xbf16>, vector<128x32xf32> -> vector<128x32xf32>
    %22 = tpu.iota {dimensions = array<i32: 0>} : vector<128x8xi32>
    %23 = tpu.iota {dimensions = array<i32: 1>} : vector<128x8xi32>
    %c16_i32 = arith.constant 16 : i32
    %24 = vector.broadcast %c16_i32 : i32 to vector<128x8xi32>
    %25 = arith.muli %23, %24 : vector<128x8xi32>
    %26 = arith.cmpi sge, %22, %25 : vector<128x8xi32>
    %c16_i32_14 = arith.constant 16 : i32
    %27 = vector.broadcast %c16_i32_14 : i32 to vector<128x8xi32>
    %28 = arith.muli %23, %27 : vector<128x8xi32>
    %c16_i32_15 = arith.constant 16 : i32
    %29 = vector.broadcast %c16_i32_15 : i32 to vector<128x8xi32>
    %30 = arith.addi %28, %29 : vector<128x8xi32>
    %31 = arith.cmpi slt, %22, %30 : vector<128x8xi32>
    %32 = arith.andi %26, %31 : vector<128x8xi1>
    %33 = arith.extui %32 : vector<128x8xi1> to vector<128x8xi32>
    %34 = arith.sitofp %33 : vector<128x8xi32> to vector<128x8xf32>
    %cst_16 = arith.constant 0.000000e+00 : f32
    %35 = vector.broadcast %cst_16 : f32 to vector<128x64xf32>
    %c0_17 = arith.constant 0 : index
    %c0_18 = arith.constant 0 : index
    %c0_19 = arith.constant 0 : index
    %36 = vector.load %arg3[%c0_17, %c0_18, %c0_19] : memref<4x64x32xbf16, #tpu.memory_space<vmem>>, vector<1x64x32xbf16>
    %37 = vector.shape_cast %36 : vector<1x64x32xbf16> to vector<64x32xbf16>
    %cst_20 = arith.constant dense<0.000000e+00> : vector<8x32xf32>
    %38 = tpu.matmul %13, %37, %cst_20 {dimension_numbers = #tpu.dot_dimension_numbers<[1], [0], [0], [1], [0, 0, 1, 1], [], []>} : vector<8x64xbf16>, vector<64x32xbf16>, vector<8x32xf32> -> vector<8x32xf32>
    %cst_21 = arith.constant 0.176776692 : f32
    %39 = vector.broadcast %cst_21 : f32 to vector<8x32xf32>
    %40 = arith.mulf %38, %39 : vector<8x32xf32>
    %cst_22 = arith.constant dense<0.000000e+00> : vector<8x128xf32>
    %41 = tpu.matmul %40, %19, %cst_22 {dimension_numbers = #tpu.dot_dimension_numbers<[1], [1], [0], [0], [0, 0, 1, 0], [], []>} : vector<8x32xf32>, vector<128x32xf32>, vector<8x128xf32> -> vector<8x128xf32>
    %42 = arith.addf %41, %17 : vector<8x128xf32>
    %cst_23 = arith.constant dense<0xFF800000> : vector<8xf32>
    %43 = vector.multi_reduction <maximumf>, %42, %cst_23 [1] : vector<8x128xf32> to vector<8xf32>
    %44 = vector.shape_cast %43 : vector<8xf32> to vector<8x1xf32>
    %45 = vector.broadcast %44 : vector<8x1xf32> to vector<8x128xf32>
    %46 = arith.subf %42, %45 : vector<8x128xf32>
    %47 = math.exp %46 : vector<8x128xf32>
    %cst_24 = arith.constant dense<0.000000e+00> : vector<8xf32>
    %48 = vector.multi_reduction <add>, %47, %cst_24 [1] : vector<8x128xf32> to vector<8xf32>
    %49 = vector.shape_cast %48 : vector<8xf32> to vector<8x1xf32>
    %50 = tpu.reciprocal %49 {approx = true} : vector<8x1xf32> -> vector<8x1xf32>
    %51 = vector.broadcast %50 : vector<8x1xf32> to vector<8x128xf32>
    %52 = arith.mulf %47, %51 : vector<8x128xf32>
    %cst_25 = arith.constant dense<0.000000e+00> : vector<8x32xf32>
    %53 = tpu.matmul %52, %21, %cst_25 {dimension_numbers = #tpu.dot_dimension_numbers<[1], [0], [0], [1], [0, 0, 1, 1], [], []>} : vector<8x128xf32>, vector<128x32xf32>, vector<8x32xf32> -> vector<8x32xf32>
    %cst_26 = arith.constant dense<0.000000e+00> : vector<128x32xf32>
    %54 = tpu.matmul %34, %53, %cst_26 {dimension_numbers = #tpu.dot_dimension_numbers<[1], [0], [0], [1], [0, 0, 1, 1], [], []>} : vector<128x8xf32>, vector<8x32xf32>, vector<128x32xf32> -> vector<128x32xf32>
    %c0_27 = arith.constant 0 : index
    %c0_28 = arith.constant 0 : index
    %c0_29 = arith.constant 0 : index
    %55 = vector.load %arg6[%c0_27, %c0_28, %c0_29] : memref<4x64x32xbf16, #tpu.memory_space<vmem>>, vector<1x64x32xbf16>
    %56 = vector.shape_cast %55 : vector<1x64x32xbf16> to vector<64x32xbf16>
    %cst_30 = arith.constant dense<0.000000e+00> : vector<128x32xf32>
    %57 = tpu.matmul %0, %56, %cst_30 {dimension_numbers = #tpu.dot_dimension_numbers<[1], [0], [0], [1], [0, 0, 1, 1], [], []>} : vector<128x64xbf16>, vector<64x32xbf16>, vector<128x32xf32> -> vector<128x32xf32>
    %c0_31 = arith.constant 0 : index
    %c0_32 = arith.constant 0 : index
    %c0_33 = arith.constant 0 : index
    %58 = vector.load %arg7[%c0_31, %c0_32, %c0_33] : memref<4x1x32xf32, #tpu.memory_space<vmem>>, vector<1x1x32xf32>
    %59 = vector.shape_cast %58 : vector<1x1x32xf32> to vector<1x32xf32>
    %60 = vector.broadcast %59 : vector<1x32xf32> to vector<128x32xf32>
    %61 = arith.addf %57, %60 : vector<128x32xf32>
    %62 = arith.negf %61 : vector<128x32xf32>
    %63 = math.exp %62 : vector<128x32xf32>
    %cst_34 = arith.constant 1.000000e+00 : f32
    %64 = vector.broadcast %cst_34 : f32 to vector<128x32xf32>
    %65 = arith.addf %64, %63 : vector<128x32xf32>
    %66 = arith.divf %64, %65 : vector<128x32xf32>
    %67 = arith.mulf %66, %54 : vector<128x32xf32>
    %68 = arith.truncf %67 : vector<128x32xf32> to vector<128x32xbf16>
    %c0_35 = arith.constant 0 : index
    %c0_36 = arith.constant 0 : index
    %c0_37 = arith.constant 0 : index
    %69 = vector.load %arg8[%c0_35, %c0_36, %c0_37] : memref<4x32x64xbf16, #tpu.memory_space<vmem>>, vector<1x32x64xbf16>
    %70 = vector.shape_cast %69 : vector<1x32x64xbf16> to vector<32x64xbf16>
    %cst_38 = arith.constant dense<0.000000e+00> : vector<128x64xf32>
    %71 = tpu.matmul %68, %70, %cst_38 {dimension_numbers = #tpu.dot_dimension_numbers<[1], [0], [0], [1], [0, 0, 1, 1], [], []>} : vector<128x32xbf16>, vector<32x64xbf16>, vector<128x64xf32> -> vector<128x64xf32>
    %72 = arith.addf %35, %71 : vector<128x64xf32>
    %c1 = arith.constant 1 : index
    %c0_39 = arith.constant 0 : index
    %c0_40 = arith.constant 0 : index
    %73 = vector.load %arg3[%c1, %c0_39, %c0_40] : memref<4x64x32xbf16, #tpu.memory_space<vmem>>, vector<1x64x32xbf16>
    %74 = vector.shape_cast %73 : vector<1x64x32xbf16> to vector<64x32xbf16>
    %cst_41 = arith.constant dense<0.000000e+00> : vector<8x32xf32>
    %75 = tpu.matmul %13, %74, %cst_41 {dimension_numbers = #tpu.dot_dimension_numbers<[1], [0], [0], [1], [0, 0, 1, 1], [], []>} : vector<8x64xbf16>, vector<64x32xbf16>, vector<8x32xf32> -> vector<8x32xf32>
    %cst_42 = arith.constant 0.176776692 : f32
    %76 = vector.broadcast %cst_42 : f32 to vector<8x32xf32>
    %77 = arith.mulf %75, %76 : vector<8x32xf32>
    %cst_43 = arith.constant dense<0.000000e+00> : vector<8x128xf32>
    %78 = tpu.matmul %77, %19, %cst_43 {dimension_numbers = #tpu.dot_dimension_numbers<[1], [1], [0], [0], [0, 0, 1, 0], [], []>} : vector<8x32xf32>, vector<128x32xf32>, vector<8x128xf32> -> vector<8x128xf32>
    %79 = arith.addf %78, %17 : vector<8x128xf32>
    %cst_44 = arith.constant dense<0xFF800000> : vector<8xf32>
    %80 = vector.multi_reduction <maximumf>, %79, %cst_44 [1] : vector<8x128xf32> to vector<8xf32>
    %81 = vector.shape_cast %80 : vector<8xf32> to vector<8x1xf32>
    %82 = vector.broadcast %81 : vector<8x1xf32> to vector<8x128xf32>
    %83 = arith.subf %79, %82 : vector<8x128xf32>
    %84 = math.exp %83 : vector<8x128xf32>
    %cst_45 = arith.constant dense<0.000000e+00> : vector<8xf32>
    %85 = vector.multi_reduction <add>, %84, %cst_45 [1] : vector<8x128xf32> to vector<8xf32>
    %86 = vector.shape_cast %85 : vector<8xf32> to vector<8x1xf32>
    %87 = tpu.reciprocal %86 {approx = true} : vector<8x1xf32> -> vector<8x1xf32>
    %88 = vector.broadcast %87 : vector<8x1xf32> to vector<8x128xf32>
    %89 = arith.mulf %84, %88 : vector<8x128xf32>
    %cst_46 = arith.constant dense<0.000000e+00> : vector<8x32xf32>
    %90 = tpu.matmul %89, %21, %cst_46 {dimension_numbers = #tpu.dot_dimension_numbers<[1], [0], [0], [1], [0, 0, 1, 1], [], []>} : vector<8x128xf32>, vector<128x32xf32>, vector<8x32xf32> -> vector<8x32xf32>
    %cst_47 = arith.constant dense<0.000000e+00> : vector<128x32xf32>
    %91 = tpu.matmul %34, %90, %cst_47 {dimension_numbers = #tpu.dot_dimension_numbers<[1], [0], [0], [1], [0, 0, 1, 1], [], []>} : vector<128x8xf32>, vector<8x32xf32>, vector<128x32xf32> -> vector<128x32xf32>
    %c1_48 = arith.constant 1 : index
    %c0_49 = arith.constant 0 : index
    %c0_50 = arith.constant 0 : index
    %92 = vector.load %arg6[%c1_48, %c0_49, %c0_50] : memref<4x64x32xbf16, #tpu.memory_space<vmem>>, vector<1x64x32xbf16>
    %93 = vector.shape_cast %92 : vector<1x64x32xbf16> to vector<64x32xbf16>
    %cst_51 = arith.constant dense<0.000000e+00> : vector<128x32xf32>
    %94 = tpu.matmul %0, %93, %cst_51 {dimension_numbers = #tpu.dot_dimension_numbers<[1], [0], [0], [1], [0, 0, 1, 1], [], []>} : vector<128x64xbf16>, vector<64x32xbf16>, vector<128x32xf32> -> vector<128x32xf32>
    %c1_52 = arith.constant 1 : index
    %c0_53 = arith.constant 0 : index
    %c0_54 = arith.constant 0 : index
    %95 = vector.load %arg7[%c1_52, %c0_53, %c0_54] : memref<4x1x32xf32, #tpu.memory_space<vmem>>, vector<1x1x32xf32>
    %96 = vector.shape_cast %95 : vector<1x1x32xf32> to vector<1x32xf32>
    %97 = vector.broadcast %96 : vector<1x32xf32> to vector<128x32xf32>
    %98 = arith.addf %94, %97 : vector<128x32xf32>
    %99 = arith.negf %98 : vector<128x32xf32>
    %100 = math.exp %99 : vector<128x32xf32>
    %cst_55 = arith.constant 1.000000e+00 : f32
    %101 = vector.broadcast %cst_55 : f32 to vector<128x32xf32>
    %102 = arith.addf %101, %100 : vector<128x32xf32>
    %103 = arith.divf %101, %102 : vector<128x32xf32>
    %104 = arith.mulf %103, %91 : vector<128x32xf32>
    %105 = arith.truncf %104 : vector<128x32xf32> to vector<128x32xbf16>
    %c1_56 = arith.constant 1 : index
    %c0_57 = arith.constant 0 : index
    %c0_58 = arith.constant 0 : index
    %106 = vector.load %arg8[%c1_56, %c0_57, %c0_58] : memref<4x32x64xbf16, #tpu.memory_space<vmem>>, vector<1x32x64xbf16>
    %107 = vector.shape_cast %106 : vector<1x32x64xbf16> to vector<32x64xbf16>
    %cst_59 = arith.constant dense<0.000000e+00> : vector<128x64xf32>
    %108 = tpu.matmul %105, %107, %cst_59 {dimension_numbers = #tpu.dot_dimension_numbers<[1], [0], [0], [1], [0, 0, 1, 1], [], []>} : vector<128x32xbf16>, vector<32x64xbf16>, vector<128x64xf32> -> vector<128x64xf32>
    %109 = arith.addf %72, %108 : vector<128x64xf32>
    %c2 = arith.constant 2 : index
    %c0_60 = arith.constant 0 : index
    %c0_61 = arith.constant 0 : index
    %110 = vector.load %arg3[%c2, %c0_60, %c0_61] : memref<4x64x32xbf16, #tpu.memory_space<vmem>>, vector<1x64x32xbf16>
    %111 = vector.shape_cast %110 : vector<1x64x32xbf16> to vector<64x32xbf16>
    %cst_62 = arith.constant dense<0.000000e+00> : vector<8x32xf32>
    %112 = tpu.matmul %13, %111, %cst_62 {dimension_numbers = #tpu.dot_dimension_numbers<[1], [0], [0], [1], [0, 0, 1, 1], [], []>} : vector<8x64xbf16>, vector<64x32xbf16>, vector<8x32xf32> -> vector<8x32xf32>
    %cst_63 = arith.constant 0.176776692 : f32
    %113 = vector.broadcast %cst_63 : f32 to vector<8x32xf32>
    %114 = arith.mulf %112, %113 : vector<8x32xf32>
    %cst_64 = arith.constant dense<0.000000e+00> : vector<8x128xf32>
    %115 = tpu.matmul %114, %19, %cst_64 {dimension_numbers = #tpu.dot_dimension_numbers<[1], [1], [0], [0], [0, 0, 1, 0], [], []>} : vector<8x32xf32>, vector<128x32xf32>, vector<8x128xf32> -> vector<8x128xf32>
    %116 = arith.addf %115, %17 : vector<8x128xf32>
    %cst_65 = arith.constant dense<0xFF800000> : vector<8xf32>
    %117 = vector.multi_reduction <maximumf>, %116, %cst_65 [1] : vector<8x128xf32> to vector<8xf32>
    %118 = vector.shape_cast %117 : vector<8xf32> to vector<8x1xf32>
    %119 = vector.broadcast %118 : vector<8x1xf32> to vector<8x128xf32>
    %120 = arith.subf %116, %119 : vector<8x128xf32>
    %121 = math.exp %120 : vector<8x128xf32>
    %cst_66 = arith.constant dense<0.000000e+00> : vector<8xf32>
    %122 = vector.multi_reduction <add>, %121, %cst_66 [1] : vector<8x128xf32> to vector<8xf32>
    %123 = vector.shape_cast %122 : vector<8xf32> to vector<8x1xf32>
    %124 = tpu.reciprocal %123 {approx = true} : vector<8x1xf32> -> vector<8x1xf32>
    %125 = vector.broadcast %124 : vector<8x1xf32> to vector<8x128xf32>
    %126 = arith.mulf %121, %125 : vector<8x128xf32>
    %cst_67 = arith.constant dense<0.000000e+00> : vector<8x32xf32>
    %127 = tpu.matmul %126, %21, %cst_67 {dimension_numbers = #tpu.dot_dimension_numbers<[1], [0], [0], [1], [0, 0, 1, 1], [], []>} : vector<8x128xf32>, vector<128x32xf32>, vector<8x32xf32> -> vector<8x32xf32>
    %cst_68 = arith.constant dense<0.000000e+00> : vector<128x32xf32>
    %128 = tpu.matmul %34, %127, %cst_68 {dimension_numbers = #tpu.dot_dimension_numbers<[1], [0], [0], [1], [0, 0, 1, 1], [], []>} : vector<128x8xf32>, vector<8x32xf32>, vector<128x32xf32> -> vector<128x32xf32>
    %c2_69 = arith.constant 2 : index
    %c0_70 = arith.constant 0 : index
    %c0_71 = arith.constant 0 : index
    %129 = vector.load %arg6[%c2_69, %c0_70, %c0_71] : memref<4x64x32xbf16, #tpu.memory_space<vmem>>, vector<1x64x32xbf16>
    %130 = vector.shape_cast %129 : vector<1x64x32xbf16> to vector<64x32xbf16>
    %cst_72 = arith.constant dense<0.000000e+00> : vector<128x32xf32>
    %131 = tpu.matmul %0, %130, %cst_72 {dimension_numbers = #tpu.dot_dimension_numbers<[1], [0], [0], [1], [0, 0, 1, 1], [], []>} : vector<128x64xbf16>, vector<64x32xbf16>, vector<128x32xf32> -> vector<128x32xf32>
    %c2_73 = arith.constant 2 : index
    %c0_74 = arith.constant 0 : index
    %c0_75 = arith.constant 0 : index
    %132 = vector.load %arg7[%c2_73, %c0_74, %c0_75] : memref<4x1x32xf32, #tpu.memory_space<vmem>>, vector<1x1x32xf32>
    %133 = vector.shape_cast %132 : vector<1x1x32xf32> to vector<1x32xf32>
    %134 = vector.broadcast %133 : vector<1x32xf32> to vector<128x32xf32>
    %135 = arith.addf %131, %134 : vector<128x32xf32>
    %136 = arith.negf %135 : vector<128x32xf32>
    %137 = math.exp %136 : vector<128x32xf32>
    %cst_76 = arith.constant 1.000000e+00 : f32
    %138 = vector.broadcast %cst_76 : f32 to vector<128x32xf32>
    %139 = arith.addf %138, %137 : vector<128x32xf32>
    %140 = arith.divf %138, %139 : vector<128x32xf32>
    %141 = arith.mulf %140, %128 : vector<128x32xf32>
    %142 = arith.truncf %141 : vector<128x32xf32> to vector<128x32xbf16>
    %c2_77 = arith.constant 2 : index
    %c0_78 = arith.constant 0 : index
    %c0_79 = arith.constant 0 : index
    %143 = vector.load %arg8[%c2_77, %c0_78, %c0_79] : memref<4x32x64xbf16, #tpu.memory_space<vmem>>, vector<1x32x64xbf16>
    %144 = vector.shape_cast %143 : vector<1x32x64xbf16> to vector<32x64xbf16>
    %cst_80 = arith.constant dense<0.000000e+00> : vector<128x64xf32>
    %145 = tpu.matmul %142, %144, %cst_80 {dimension_numbers = #tpu.dot_dimension_numbers<[1], [0], [0], [1], [0, 0, 1, 1], [], []>} : vector<128x32xbf16>, vector<32x64xbf16>, vector<128x64xf32> -> vector<128x64xf32>
    %146 = arith.addf %109, %145 : vector<128x64xf32>
    %c3 = arith.constant 3 : index
    %c0_81 = arith.constant 0 : index
    %c0_82 = arith.constant 0 : index
    %147 = vector.load %arg3[%c3, %c0_81, %c0_82] : memref<4x64x32xbf16, #tpu.memory_space<vmem>>, vector<1x64x32xbf16>
    %148 = vector.shape_cast %147 : vector<1x64x32xbf16> to vector<64x32xbf16>
    %cst_83 = arith.constant dense<0.000000e+00> : vector<8x32xf32>
    %149 = tpu.matmul %13, %148, %cst_83 {dimension_numbers = #tpu.dot_dimension_numbers<[1], [0], [0], [1], [0, 0, 1, 1], [], []>} : vector<8x64xbf16>, vector<64x32xbf16>, vector<8x32xf32> -> vector<8x32xf32>
    %cst_84 = arith.constant 0.176776692 : f32
    %150 = vector.broadcast %cst_84 : f32 to vector<8x32xf32>
    %151 = arith.mulf %149, %150 : vector<8x32xf32>
    %cst_85 = arith.constant dense<0.000000e+00> : vector<8x128xf32>
    %152 = tpu.matmul %151, %19, %cst_85 {dimension_numbers = #tpu.dot_dimension_numbers<[1], [1], [0], [0], [0, 0, 1, 0], [], []>} : vector<8x32xf32>, vector<128x32xf32>, vector<8x128xf32> -> vector<8x128xf32>
    %153 = arith.addf %152, %17 : vector<8x128xf32>
    %cst_86 = arith.constant dense<0xFF800000> : vector<8xf32>
    %154 = vector.multi_reduction <maximumf>, %153, %cst_86 [1] : vector<8x128xf32> to vector<8xf32>
    %155 = vector.shape_cast %154 : vector<8xf32> to vector<8x1xf32>
    %156 = vector.broadcast %155 : vector<8x1xf32> to vector<8x128xf32>
    %157 = arith.subf %153, %156 : vector<8x128xf32>
    %158 = math.exp %157 : vector<8x128xf32>
    %cst_87 = arith.constant dense<0.000000e+00> : vector<8xf32>
    %159 = vector.multi_reduction <add>, %158, %cst_87 [1] : vector<8x128xf32> to vector<8xf32>
    %160 = vector.shape_cast %159 : vector<8xf32> to vector<8x1xf32>
    %161 = tpu.reciprocal %160 {approx = true} : vector<8x1xf32> -> vector<8x1xf32>
    %162 = vector.broadcast %161 : vector<8x1xf32> to vector<8x128xf32>
    %163 = arith.mulf %158, %162 : vector<8x128xf32>
    %cst_88 = arith.constant dense<0.000000e+00> : vector<8x32xf32>
    %164 = tpu.matmul %163, %21, %cst_88 {dimension_numbers = #tpu.dot_dimension_numbers<[1], [0], [0], [1], [0, 0, 1, 1], [], []>} : vector<8x128xf32>, vector<128x32xf32>, vector<8x32xf32> -> vector<8x32xf32>
    %cst_89 = arith.constant dense<0.000000e+00> : vector<128x32xf32>
    %165 = tpu.matmul %34, %164, %cst_89 {dimension_numbers = #tpu.dot_dimension_numbers<[1], [0], [0], [1], [0, 0, 1, 1], [], []>} : vector<128x8xf32>, vector<8x32xf32>, vector<128x32xf32> -> vector<128x32xf32>
    %c3_90 = arith.constant 3 : index
    %c0_91 = arith.constant 0 : index
    %c0_92 = arith.constant 0 : index
    %166 = vector.load %arg6[%c3_90, %c0_91, %c0_92] : memref<4x64x32xbf16, #tpu.memory_space<vmem>>, vector<1x64x32xbf16>
    %167 = vector.shape_cast %166 : vector<1x64x32xbf16> to vector<64x32xbf16>
    %cst_93 = arith.constant dense<0.000000e+00> : vector<128x32xf32>
    %168 = tpu.matmul %0, %167, %cst_93 {dimension_numbers = #tpu.dot_dimension_numbers<[1], [0], [0], [1], [0, 0, 1, 1], [], []>} : vector<128x64xbf16>, vector<64x32xbf16>, vector<128x32xf32> -> vector<128x32xf32>
    %c3_94 = arith.constant 3 : index
    %c0_95 = arith.constant 0 : index
    %c0_96 = arith.constant 0 : index
    %169 = vector.load %arg7[%c3_94, %c0_95, %c0_96] : memref<4x1x32xf32, #tpu.memory_space<vmem>>, vector<1x1x32xf32>
    %170 = vector.shape_cast %169 : vector<1x1x32xf32> to vector<1x32xf32>
    %171 = vector.broadcast %170 : vector<1x32xf32> to vector<128x32xf32>
    %172 = arith.addf %168, %171 : vector<128x32xf32>
    %173 = arith.negf %172 : vector<128x32xf32>
    %174 = math.exp %173 : vector<128x32xf32>
    %cst_97 = arith.constant 1.000000e+00 : f32
    %175 = vector.broadcast %cst_97 : f32 to vector<128x32xf32>
    %176 = arith.addf %175, %174 : vector<128x32xf32>
    %177 = arith.divf %175, %176 : vector<128x32xf32>
    %178 = arith.mulf %177, %165 : vector<128x32xf32>
    %179 = arith.truncf %178 : vector<128x32xf32> to vector<128x32xbf16>
    %c3_98 = arith.constant 3 : index
    %c0_99 = arith.constant 0 : index
    %c0_100 = arith.constant 0 : index
    %180 = vector.load %arg8[%c3_98, %c0_99, %c0_100] : memref<4x32x64xbf16, #tpu.memory_space<vmem>>, vector<1x32x64xbf16>
    %181 = vector.shape_cast %180 : vector<1x32x64xbf16> to vector<32x64xbf16>
    %cst_101 = arith.constant dense<0.000000e+00> : vector<128x64xf32>
    %182 = tpu.matmul %179, %181, %cst_101 {dimension_numbers = #tpu.dot_dimension_numbers<[1], [0], [0], [1], [0, 0, 1, 1], [], []>} : vector<128x32xbf16>, vector<32x64xbf16>, vector<128x64xf32> -> vector<128x64xf32>
    %183 = arith.addf %146, %182 : vector<128x64xf32>
    %c0_102 = arith.constant 0 : index
    %c0_103 = arith.constant 0 : index
    %184 = vector.load %arg9[%c0_102, %c0_103] : memref<1x64xf32, #tpu.memory_space<vmem>>, vector<1x64xf32>
    %185 = vector.broadcast %184 : vector<1x64xf32> to vector<128x64xf32>
    %186 = arith.addf %183, %185 : vector<128x64xf32>
    %c0_104 = arith.constant 0 : index
    %c0_105 = arith.constant 0 : index
    %187 = vector.load %arg10[%c0_104, %c0_105] : memref<128x64xf32, #tpu.memory_space<vmem>>, vector<128x64xf32>
    tpu.vector_store %arg10[%c0_104, %c0_105], %186 {strides = array<i32>} : memref<128x64xf32, #tpu.memory_space<vmem>>, vector<128x64xf32>,
    return
  }
  func.func @transform_0(%arg0: i32) -> (i32, i32) {
    %c0_i32 = arith.constant 0 : i32
    %c0_i32_0 = arith.constant 0 : i32
    return %arg0, %c0_i32 : i32, i32
  }
  func.func @transform_1(%arg0: i32) -> (i32, i32) {
    %c0_i32 = arith.constant 0 : i32
    %c0_i32_0 = arith.constant 0 : i32
    return %arg0, %c0_i32 : i32, i32
  }
  func.func @transform_2(%arg0: i32) -> (i32, i32, i32) {
    %c0_i32 = arith.constant 0 : i32
    %c0_i32_0 = arith.constant 0 : i32
    %c0_i32_1 = arith.constant 0 : i32
    %c0_i32_2 = arith.constant 0 : i32
    return %c0_i32, %c0_i32_0, %c0_i32_1 : i32, i32, i32
  }
  func.func @transform_3(%arg0: i32) -> (i32, i32) {
    %c0_i32 = arith.constant 0 : i32
    %c0_i32_0 = arith.constant 0 : i32
    %c0_i32_1 = arith.constant 0 : i32
    return %c0_i32, %c0_i32_0 : i32, i32
  }
  func.func @transform_4(%arg0: i32) -> (i32, i32) {
    %c0_i32 = arith.constant 0 : i32
    %c0_i32_0 = arith.constant 0 : i32
    %c0_i32_1 = arith.constant 0 : i32
    return %c0_i32, %c0_i32_0 : i32, i32
  }
  func.func @transform_5(%arg0: i32) -> (i32, i32, i32) {
    %c0_i32 = arith.constant 0 : i32
    %c0_i32_0 = arith.constant 0 : i32
    %c0_i32_1 = arith.constant 0 : i32
    %c0_i32_2 = arith.constant 0 : i32
    return %c0_i32, %c0_i32_0, %c0_i32_1 : i32, i32, i32
  }
  func.func @transform_6(%arg0: i32) -> (i32, i32, i32) {
    %c0_i32 = arith.constant 0 : i32
    %c0_i32_0 = arith.constant 0 : i32
    %c0_i32_1 = arith.constant 0 : i32
    %c0_i32_2 = arith.constant 0 : i32
    return %c0_i32, %c0_i32_0, %c0_i32_1 : i32, i32, i32
  }
  func.func @transform_7(%arg0: i32) -> (i32, i32, i32) {
    %c0_i32 = arith.constant 0 : i32
    %c0_i32_0 = arith.constant 0 : i32
    %c0_i32_1 = arith.constant 0 : i32
    %c0_i32_2 = arith.constant 0 : i32
    return %c0_i32, %c0_i32_0, %c0_i32_1 : i32, i32, i32
  }
  func.func @transform_8(%arg0: i32) -> (i32, i32) {
    %c0_i32 = arith.constant 0 : i32
    %c0_i32_0 = arith.constant 0 : i32
    %c0_i32_1 = arith.constant 0 : i32
    return %c0_i32, %c0_i32_0 : i32, i32
  }
  func.func @transform_9(%arg0: i32) -> (i32, i32) {
    %c0_i32 = arith.constant 0 : i32
    %c0_i32_0 = arith.constant 0 : i32
    return %arg0, %c0_i32 : i32, i32
  }
}

</mosaic_0001>

<bundles_post_ra>
// kernel: tpu_custom_call.1
= control target key start
LH: loop header
LB: loop body
LE: loop exit
PB: predicated region body
PF: predicated region fallthrough
CT: control target
= control target key end

     0   :  { %s6303_s30 = smov 0   ;;  %s7596_s0 = inlined_call_operand.vmem [shape: f32[32,128], index: 0, kind: input, shape index: {}]   ;;  %s7597_s1 = inlined_call_operand.vmem [shape: bf16[512,64], index: 1, kind: input, shape index: {}]   ;;  %s7598_s2 = inlined_call_operand.vmem [shape: bf16[4,64,32], index: 2, kind: input, shape index: {}]   ;;  %s7599_s3 = inlined_call_operand.vmem [shape: bf16[64,32], index: 3, kind: input, shape index: {}]   ;;  %s7600_s4 = inlined_call_operand.vmem [shape: bf16[64,32], index: 4, kind: input, shape index: {}]   ;;  %s7601_s5 = inlined_call_operand.vmem [shape: bf16[4,64,32], index: 5, kind: input, shape index: {}]   ;;  %s7602_s6 = inlined_call_operand.vmem [shape: f32[4,1,32], index: 6, kind: input, shape index: {}]   ;;  %s7603_s7 = inlined_call_operand.vmem [shape: bf16[4,32,64], index: 7, kind: input, shape index: {}]   ;;  %s7604_s8 = inlined_call_operand.vmem [shape: f32[1,64], index: 8, kind: input, shape index: {}]   ;;  %s7605_s9 = inlined_call_operand.vmem [shape: f32[512,64], index: 9, kind: output, shape index: {}]  }
   0x1 LB: > { %s4157_s10 = sadd.s32 4294967295, %s6248_s30   ;;  %p4161_p0 = scmp.ge.s32.totalorder %s6248_s30, 1  ;;  %s6248_s30 = sphi %s6303_s30, %s19_s30  }
   0x2   : > { %p297_p1 = scmp.lt.s32.totalorder %s6248_s30, 5 }
   0x4   : > { %p298_p2 = pnand %p4161_p0, %p297_p1 }
   0x6   : > { %301 = sbr.rel (%p298_p2) target bundleno = 5040 (0x13b0), region = 56 }
   0xd   : > { %s4163_s11 = sshll.u32 %s4157_s10, 4  ;;  %p337_p3 = scmp.lt.s32.totalorder %s4157_s10, 3  ;;  %v7615_v0 = vmov 0.0   ;;  %vm7607_vm0 = vmmov 0   ;;  %v5904_v1 = vld [vmem:[%s7599_s3] sm:$0xff]   ;;  %v5905_v2 = vld [vmem:[%s7599_s3 + $0x8] sm:$0xff]  }
   0xe   : > { %4935 = vmatprep.subr.bf16.mxu0 %v7615_v0  ;;  %p342_p4 = scmp.lt.s32.totalorder %s4163_s11, 63  ;;  %4951 = vmatprep.mubr.msk.bf16.mxu0 %vm7607_vm0, %v7615_v0  ;;  %v5906_v3 = vld [vmem:[%s7599_s3 + $0x10] sm:$0xff]   ;;  %v5907_v7 = vld [vmem:[%s7599_s3 + $0x18] sm:$0xff]   ;;  %vm7609_vm1 = vcmask 523264   ;;  %v5908_v10 = vld [vmem:[%s7598_s2] sm:$0xff]   ;;  %v7613_v22 = vmov 0.0|0.0  }
   0xf   : > { %s7925_s10 = smov (!%p337_p3, %s4157_s10), 3  ;;  %4955 = vmatprep.subr.bf16.mxu1 %v5904_v1  ;;  %v5909_v12 = vld [vmem:[%s7598_s2 + $0x8] sm:$0xff]   ;;  %v5910_v15 = vld [vmem:[%s7598_s2 + $0x10] sm:$0xff]   ;;  %v5911_v19 = vld [vmem:[%s7598_s2 + $0x18] sm:$0xff]   ;;  %vm7606_vm2 = vcmask 261120   ;;  %v7666_v31 = vmov 0 }
  0x10   : > { %s7927_s11 = smov (!%p342_p4, %s4163_s11), 63  ;;  %s4162_s16 = sshll.u32 %s7925_s10, 3  ;;  %4956 = vmatpush3.bf16.msra.mxu1 %v5904_v1  ;;  %v5912_v20 = vld [vmem:[%s7600_s4] sm:$0xff]   ;;  %v5913_v21 = vld [vmem:[%s7600_s4 + $0x8] sm:$0xff]   ;;  %v5914_v23 = vld [vmem:[%s7600_s4 + $0x10] sm:$0xff]   ;;  %vm7610_vm13 = vcmask 64512  }
  0x11   : > { %s4164_s17 = sshll.u32 %s7927_s11, 2  ;;  %s340_s20 = scalar_lea.vmem %s7596_s0, %s4162_s16  ;;  %4957 = vmatprep.subr.bf16.mxu1 %v5905_v2  ;;  %v5915_v24 = vld [vmem:[%s7600_s4 + $0x18] sm:$0xff]   ;;  %vm6449_vm3 = vmpackc.low %vm7606_vm2, %vm7606_vm2 }
  0x12   : > { %s6332_s25 = scalar_lea.vmem %s7597_s1, %s4164_s17  ;;  %v6334_v4 = vld [vmem:[%s340_s20] sm:$0xff]  ;;  %v7667_v31 = vsel %vm6449_vm3, 4294967295, %v7666_v31  ;;  %s4166_s14 = sshll.u32 %s7927_s11, 3 }
  0x13   : > { %v6337_v5 = vld [vmem:[%s6332_s25] sm:$0xff]   ;;  %v371_v6 = vmax.f32 %v6334_v4, 0.0  ;;  %v6345_v8 = vld [vmem:[%s6332_s25 + $0x8] sm:$0xff]   ;;  %v6352_v9 = vld [vmem:[%s6332_s25 + $0x10] sm:$0xff]   ;;  %s7559_s19 = scalar_lea.vmem %s7605_s9, %s4166_s14 }
  0x14   : > { %4958 = vmatpush3.bf16.msra.mxu1 %v5905_v2  ;;  %4936 = vmatpush3.bf16.msra.mxu0 %v6337_v5  ;;  %v6359_v11 = vld [vmem:[%s6332_s25 + $0x18] sm:$0xff]   ;;  %v6368_v13 = vld [vmem:[%s6332_s25 + $0x20] sm:$0xff]   ;;  %v6378_v14 = vld [vmem:[%s6332_s25 + $0x28] sm:$0xff]  }
  0x15   : > { %372 = vadd.xlane.f32.xlu0 %v371_v6  ;;  %4937 = vmatprep.subr.bf16.mxu0 %v7615_v0  ;;  %v6387_v16 = vld [vmem:[%s6332_s25 + $0x30] sm:$0xff]   ;;  %v6397_v17 = vld [vmem:[%s6332_s25 + $0x38] sm:$0xff]   ;;  %v374_v18 = vpack.c.bf16 %v371_v6, %v371_v6 }
  0x16   : > { %4959 = vmatprep.subr.bf16.mxu1 %v5906_v3  ;;  %4963 = vmatprep.mubr.msk.bf16.mxu1 %vm7609_vm1, %v6337_v5 }
  0x18   : > { %4960 = vmatpush3.bf16.msra.mxu1 %v5906_v3  ;;  %4938 = vmatpush3.bf16.msra.mxu0 %v6345_v8 }
  0x19   : > { %4961 = vmatprep.subr.bf16.mxu1 %v5907_v7  ;;  %4939 = vmatprep.subr.bf16.mxu0 %v7615_v0 }
  0x1c   : > { %4962 = vmatpush3.bf16.msra.mxu1 %v5907_v7  ;;  %4940 = vmatpush3.bf16.msra.mxu0 %v6352_v9 }
  0x1d   : > { %5003 = vmatprep.subr.bf16.mxu1 %v7615_v0  ;;  %4941 = vmatprep.subr.bf16.mxu0 %v7615_v0 }
  0x1f   : > { %4964 = vmatmul.mubr.msk.bf16.vlgmr.msra.gmra.mrb[0].mxu1 %vm7609_vm1, %v6345_v8 }
  0x20   : > { %4967 = vmatprep.mubr.msk.bf16.mxu1 %vm7609_vm1, %v6352_v9  ;;  %5004 = vmatpush3.bf16.msra.mxu1 %v5908_v10 }
  0x21   : > { %4942 = vmatpush3.bf16.msra.mxu0 %v6359_v11  ;;  %5005 = vmatprep.subr.bf16.mxu1 %v7615_v0 }
  0x22   : > { %4943 = vmatprep.subr.bf16.mxu0 %v7615_v0 }
  0x24   : > { %5006 = vmatpush3.bf16.msra.mxu1 %v5909_v12 }
  0x25   : > { %4944 = vmatpush3.bf16.msra.mxu0 %v6368_v13  ;;  %5007 = vmatprep.subr.bf16.mxu1 %v7615_v0 }
  0x26   : > { %4945 = vmatprep.subr.bf16.mxu0 %v7615_v0 }
  0x27   : > { %4968 = vmatmul.mubr.msk.bf16.gmra.mrb[4].mxu1 %vm7609_vm1, %v6359_v11 }
  0x28   : > { %4971 = vmatprep.mubr.msk.bf16.mxu1 %vm7609_vm1, %v6368_v13  ;;  %5008 = vmatpush3.bf16.msra.mxu1 %v5910_v15 }
  0x29   : > { %4946 = vmatpush3.bf16.msra.mxu0 %v6378_v14  ;;  %5009 = vmatprep.subr.bf16.mxu1 %v7615_v0 }
  0x2a   : > { %4947 = vmatprep.subr.bf16.mxu0 %v7615_v0 }
  0x2c   : > { %5010 = vmatpush3.bf16.msra.mxu1 %v5911_v19 }
  0x2d   : > { %4948 = vmatpush3.bf16.msra.mxu0 %v6387_v16  ;;  %5643 = vmatprep.subr.bf16.mxu1 %v7613_v22 }
  0x2e   : > { %4949 = vmatprep.subr.bf16.mxu0 %v7615_v0 }
  0x2f   : > { %4972 = vmatmul.mubr.msk.bf16.gmra.mrb[8].mxu1 %vm7609_vm1, %v6378_v14 }
  0x30   : > { %4975 = vmatprep.mubr.msk.bf16.mxu1 %vm7609_vm1, %v6387_v16 }
  0x31   : > { %4950 = vmatpush3.bf16.msra.mxu0 %v6397_v17 }
  0x32   : > { %4979 = vmatprep.subr.bf16.mxu0 %v5912_v20 }
  0x34   : > { %4952 = vmatmul.mubr.bf16.vlgmr.msra.gmra.mrb[0].mxu0 %v374_v18 }
  0x35   : > { %4987 = vmatprep.mubr.msk.bf16.mxu0 %vm7609_vm1, %v6337_v5  ;;  %4980 = vmatpush3.bf16.msra.mxu0 %v5912_v20 }
  0x36   : > { %4981 = vmatprep.subr.bf16.mxu0 %v5913_v21 }
  0x37   : > { %4976 = vmatmul.mubr.msk.bf16.gmra.mrb[12].mxu1 %vm7609_vm1, %v6397_v17 }
  0x38   : > { %5011 = vmatprep.mubr.msk.bf16.mxu1 %vm7607_vm0, %v7615_v0 }
  0x39   : > { %4982 = vmatpush3.bf16.msra.mxu0 %v5913_v21 }
  0x3a   : > { %4983 = vmatprep.subr.bf16.mxu0 %v5914_v23 }
  0x3d   : > { %4984 = vmatpush3.bf16.msra.mxu0 %v5914_v23 }
  0x3e   : > { %4985 = vmatprep.subr.bf16.mxu0 %v5915_v24 }
  0x41   : > { %4986 = vmatpush3.bf16.msra.mxu0 %v5915_v24 }
  0x42   : > { %5611 = vmatprep.subr.bf16.mxu0 %v7613_v22 }
  0x44   : > { %4988 = vmatmul.mubr.msk.bf16.vlgmr.msra.gmra.mrb[4].mxu0 %vm7609_vm1, %v6345_v8 }
  0x45   : > { %4991 = vmatprep.mubr.msk.bf16.mxu0 %vm7609_vm1, %v6352_v9 }
  0x4c   : > { %4992 = vmatmul.mubr.msk.bf16.gmra.mrb[8].mxu0 %vm7609_vm1, %v6359_v11 }
  0x4d   : > { %4995 = vmatprep.mubr.msk.bf16.mxu0 %vm7609_vm1, %v6368_v13 }
  0x54   : > { %4996 = vmatmul.mubr.msk.bf16.gmra.mrb[12].mxu0 %vm7609_vm1, %v6378_v14 }
  0x55   : > { %4999 = vmatprep.mubr.msk.bf16.mxu0 %vm7609_vm1, %v6387_v16 }
  0x5c   : > { %5000 = vmatmul.mubr.msk.bf16.gmra.mrb[16].mxu0 %vm7609_vm1, %v6397_v17 }
  0x5d   : > { %5047 = vmatprep.mubr.msk.f32.mxu0 %vm7607_vm0, %v7615_v0 }
  0xa2   : > { %v373_v27 = vpop.xlane.xlu0 %372 }
  0xa3   : > { %v463_v33 = vadd.f32 1e-10, %v373_v27 }
  0xa5   : > { %5952 = vrcp.f32 %v463_v33 }
  0xaf   : > { %v5953_v43 = vpop.eup %5952 }
  0xf2   : > { %v4965_v25 = vpop.f32.mrb[0].mxu1 }
  0xf3   : > { %v560_v26 = vpop.f32.mrb[1].mxu1 }
  0xf4   : > { %v4966_v28 = vpop.f32.mrb[2].mxu1 }
  0xf5   : > { %v6445_v29 = vpack.c.bf16 %v4966_v28, %v4965_v25  ;;  %v563_v30 = vpop.f32.mrb[3].mxu1 }
  0xf6   : > { %v6453_v32 = vpack.c.bf16 %v563_v30, %v560_v26 }
  0xf8   : > { %5614 = vmatpush3.bf16.xpose.msk.msra.mxu0 %vm6449_vm3, %v6453_v32 }
  0xf9   : > { %5615 = vmatprep.subr.bf16.mxu0 %v7613_v22 }
  0xfa   : > { %v4969_v34 = vpop.f32.mrb[4].mxu1 }
  0xfb   : > { %v576_v35 = vpop.f32.mrb[5].mxu1 }
  0xfc   : > { %v4970_v36 = vpop.f32.mrb[6].mxu1 }
  0xfd   : > { %v6459_v37 = vpack.c.bf16 %v4970_v36, %v4969_v34  ;;  %v579_v38 = vpop.f32.mrb[7].mxu1 }
  0xfe   : > { %v6461_v39 = vpack.c.bf16 %v579_v38, %v576_v35 }
  0xff   : > { %7668 = vst [vmem:[#allocation2_spill] sm:$0xff] %v6459_v37 }
 0x100   : > { %7669 = vst [vmem:[#allocation3_spill] sm:$0xff] %v6461_v39  ;;  %5618 = vmatpush3.bf16.xpose.msk.msra.mxu0 %vm6449_vm3, %v6445_v29 }
 0x101   : > { %5619 = vmatprep.subr.bf16.mxu0 %v7613_v22 }
 0x102   : > { %v4973_v40 = vpop.f32.mrb[8].mxu1 }
 0x103   : > { %v592_v41 = vpop.f32.mrb[9].mxu1 }
 0x104   : > { %v4974_v42 = vpop.f32.mrb[10].mxu1 }
 0x105   : > { %v6467_v44 = vpack.c.bf16 %v4974_v42, %v4973_v40  ;;  %v595_v45 = vpop.f32.mrb[11].mxu1  ;;  %v4175_v40 = vadd.f32 -1.0, %v6334_v4 }
 0x106   : > { %v6469_v46 = vpack.c.bf16 %v595_v45, %v592_v41 }
 0x107   : > { %7670 = vst [vmem:[#allocation4_spill] sm:$0xff] %v6467_v44  ;;  %v457_v47 = vpop.f32.mrb[0].mxu0  ;;  %v6537_v41 = vmul.f32 1e+09, %v4175_v40 }
 0x108   : > { %7671 = vst [vmem:[#allocation5_spill] sm:$0xff] %v6469_v46  ;;  %v465_v48 = vmul.f32 %v5953_v43, %v457_v47  ;;  %v4953_v49 = vpop.f32.mrb[1].mxu0  ;;  %5622 = vmatpush3.bf16.xpose.msk.msra.mxu0 %vm6449_vm3, %v6461_v39 }
 0x109   : > { %v460_v50 = vpop.f32.mrb[2].mxu0  ;;  %5623 = vmatprep.subr.bf16.mxu0 %v7613_v22 }
 0x10a   : > { %v6475_v51 = vpack.c.bf16 %v465_v48, %v465_v48  ;;  %v4954_v52 = vpop.f32.mrb[3].mxu0  ;;  %v4977_v53 = vpop.f32.mrb[12].mxu1 }
 0x10b   : > { %v608_v54 = vpop.f32.mrb[13].mxu1 }
 0x10c   : > { %7672 = vst [vmem:[#allocation6_spill] sm:$0xff] %v6475_v51  ;;  %5012 = vmatmul.mubr.msk.bf16.vlgmr.msra.gmra.mrb[16].mxu1 %vm7609_vm1, %v6475_v51  ;;  %v4978_v55 = vpop.f32.mrb[14].mxu1 }
 0x10d   : > { %v6479_v56 = vpack.c.bf16 %v4978_v55, %v4977_v53  ;;  %v611_v57 = vpop.f32.mrb[15].mxu1  ;;  %5082 = vmatprep.mubr.msk.f32.mxu1 %vm7607_vm0, %v7615_v0  ;;  %v752_v55 = vlaneseq }
 0x10e   : > { %v6483_v58 = vpack.c.bf16 %v611_v57, %v608_v54 }
 0x10f   : > { %7673 = vst [vmem:[#allocation7_spill] sm:$0xff] %v6479_v56  ;;  %v770_v4 = vand.u32 127, %v752_v55  ;;  %v753_v57 = vshrl.u32 %v752_v55, 7  ;;  %v6876_v55 = vld [vmem:[%s7602_s6] ss:$0 sm:$0xff] }
 0x110   : > { %7674 = vst [vmem:[#allocation8_spill] sm:$0xff] %v6483_v58  ;;  %5626 = vmatpush3.bf16.xpose.msk.msra.mxu0 %vm6449_vm3, %v6459_v37 }
 0x111   : > { %5627 = vmatprep.subr.bf16.mxu0 %v7613_v22 }
 0x117   : > { %v4989_v59 = vpop.f32.mrb[4].mxu0 }
 0x118   : > { %5630 = vmatpush3.bf16.xpose.msk.msra.mxu0 %vm6449_vm3, %v6469_v46  ;;  %v689_v60 = vpop.f32.mrb[5].mxu0 }
 0x119   : > { %5631 = vmatprep.subr.bf16.mxu0 %v7613_v22  ;;  %v4990_v61 = vpop.f32.mrb[6].mxu0 }
 0x11a   : > { %v6504_v62 = vpack.c.bf16 %v4990_v61, %v4989_v59  ;;  %v692_v63 = vpop.f32.mrb[7].mxu0  ;;  %v6540_v59 = vmul.u32 16, %v770_v4  ;;  %v761_v61 = vadd.s32 64, %v753_v57 }
 0x11b   : > { %v6506_v1 = vpack.c.bf16 %v692_v63, %v689_v60  ;;  %v754_v63 = vadd.s32 8, %v753_v57 }
 0x11c   : > { %7675 = vst [vmem:[#allocation9_spill] sm:$0xff] %v6504_v62  ;;  %v6543_v60 = vadd.s32 16, %v6540_v59  ;;  %vm772_vm4 = vcmp.ge.s32.totalorder %v753_v57, %v6540_v59  ;;  %vm780_vm6 = vcmp.ge.s32.totalorder %v761_v61, %v6540_v59 }
 0x11d   : > { %7676 = vst [vmem:[#allocation10_spill] sm:$0xff] %v6506_v1  ;;  %5645 = vmatpush3.bf16.msra.mxu1 %v6506_v1  ;;  %vm773_vm9 = vcmp.ge.s32.totalorder %v754_v63, %v6540_v59 }
 0x11e   : > { %5646 = vmatprep.subr.bf16.mxu1 %v7613_v22  ;;  %vm789_vm5 = vcmp.lt.s32.totalorder %v753_v57, %v6543_v60  ;;  %vm797_vm7 = vcmp.lt.s32.totalorder %v761_v61, %v6543_v60  ;;  %vm790_vm10 = vcmp.lt.s32.totalorder %v754_v63, %v6543_v60  ;;  %v5917_v63 = vld [vmem:[%s7598_s2 + $0x20] sm:$0xff]  }
 0x11f   : > { %v4993_v2 = vpop.f32.mrb[8].mxu0  ;;  %vm805_vm8 = vmand %vm772_vm4, %vm789_vm5 }
 0x120   : > { %5634 = vmatpush3.bf16.xpose.msk.msra.mxu0 %vm6449_vm3, %v6467_v44  ;;  %v705_v3 = vpop.f32.mrb[9].mxu0  ;;  %vm813_vm14 = vmand %vm780_vm6, %vm797_vm7 }
 0x121   : > { %5635 = vmatprep.subr.bf16.mxu0 %v7613_v22  ;;  %5648 = vmatpush3.bf16.msra.mxu1 %v6504_v62  ;;  %v4994_v6 = vpop.f32.mrb[10].mxu0  ;;  %vm6561_vm15 = vmand %vm773_vm9, %vm790_vm10 }
 0x122   : > { %v6511_v7 = vpack.c.bf16 %v4994_v6, %v4993_v2  ;;  %v708_v10 = vpop.f32.mrb[11].mxu0  ;;  %5649 = vmatprep.subr.bf16.mxu1 %v7613_v22  ;;  %v762_v2 = vadd.s32 72, %v753_v57  ;;  %v6559_v6 = vsel %vm813_vm14, 1.0, %v7615_v0 }
 0x123   : > { %v6514_v12 = vpack.c.bf16 %v708_v10, %v705_v3  ;;  %v6554_v3 = vsel %vm805_vm8, 1.0, %v7615_v0  ;;  %7683 = vst [vmem:[#allocation17_spill] sm:$0xff] %v6559_v6 }
 0x124   : > { %7677 = vst [vmem:[#allocation11_spill] sm:$0xff] %v6511_v7  ;;  %vm781_vm11 = vcmp.ge.s32.totalorder %v762_v2, %v6540_v59  ;;  %vm798_vm12 = vcmp.lt.s32.totalorder %v762_v2, %v6543_v60 }
 0x125   : > { %7678 = vst [vmem:[#allocation12_spill] sm:$0xff] %v6514_v12  ;;  %5651 = vmatpush3.bf16.msra.mxu1 %v6514_v12  ;;  %vm6567_vm4 = vmand %vm781_vm11, %vm798_vm12 }
 0x126   : > { %5652 = vmatprep.subr.bf16.mxu1 %v7613_v22 }
 0x127   : > { %v4997_v15 = vpop.f32.mrb[12].mxu0 }
 0x128   : > { %5638 = vmatpush3.bf16.xpose.msk.msra.mxu0 %vm6449_vm3, %v6483_v58  ;;  %v721_v18 = vpop.f32.mrb[13].mxu0 }
 0x129   : > { %5639 = vmatprep.subr.bf16.mxu0 %v7613_v22  ;;  %v4998_v19 = vpop.f32.mrb[14].mxu0  ;;  %5654 = vmatpush3.bf16.msra.mxu1 %v6511_v7 }
 0x12a   : > { %v6519_v20 = vpack.c.bf16 %v4998_v19, %v4997_v15  ;;  %v724_v21 = vpop.f32.mrb[15].mxu0  ;;  %5655 = vmatprep.subr.bf16.mxu1 %v7613_v22  ;;  %v755_v15 = vadd.s32 16, %v753_v57  ;;  %v5918_v19 = vld [vmem:[%s7601_s5 + $0x8] sm:$0xff]  }
 0x12b   : > { %v6522_v23 = vpack.c.bf16 %v724_v21, %v721_v18  ;;  %v763_v18 = vadd.s32 80, %v753_v57  ;;  %v756_v21 = vadd.s32 24, %v753_v57 }
 0x12c   : > { %7679 = vst [vmem:[#allocation13_spill] sm:$0xff] %v6519_v20  ;;  %vm774_vm5 = vcmp.ge.s32.totalorder %v755_v15, %v6540_v59  ;;  %vm791_vm6 = vcmp.lt.s32.totalorder %v755_v15, %v6543_v60 }
 0x12d   : > { %7680 = vst [vmem:[#allocation14_spill] sm:$0xff] %v6522_v23  ;;  %5657 = vmatpush3.bf16.msra.mxu1 %v6522_v23  ;;  %vm782_vm7 = vcmp.ge.s32.totalorder %v763_v18, %v6540_v59  ;;  %vm6574_vm8 = vmand %vm774_vm5, %vm791_vm6  ;;  %vm799_vm9 = vcmp.lt.s32.totalorder %v763_v18, %v6543_v60  ;;  %vm775_vm10 = vcmp.ge.s32.totalorder %v756_v21, %v6540_v59 }
 0x12e   : > { %5658 = vmatprep.subr.bf16.mxu1 %v7613_v22  ;;  %vm792_vm11 = vcmp.lt.s32.totalorder %v756_v21, %v6543_v60  ;;  %vm6582_vm14 = vmand %vm782_vm7, %vm799_vm9  ;;  %v6666_v2 = vsel %vm6574_vm8, 1.0, %v7615_v0  ;;  %v5919_v21 = vld [vmem:[%s7598_s2 + $0x28] sm:$0xff]  }
 0x12f   : > { %v5001_v24 = vpop.f32.mrb[16].mxu0  ;;  %vm6587_vm5 = vmand %vm775_vm10, %vm792_vm11  ;;  %v6671_v10 = vsel %vm6582_vm14, 1.0, %v7615_v0 }
 0x130   : > { %5642 = vmatpush3.bf16.xpose.msk.msra.mxu0 %vm6449_vm3, %v6479_v56  ;;  %v737_v25 = vpop.f32.mrb[17].mxu0  ;;  %7715 = vst [vmem:[#allocation19_spill] sm:$0xff] %v6671_v10  ;;  %v6677_v15 = vsel %vm6587_vm5, 1.0, %v7615_v0 }
 0x131   : > { %v5002_v26 = vpop.f32.mrb[18].mxu0  ;;  %5660 = vmatpush3.bf16.msra.mxu1 %v6519_v20 }
 0x132   : > { %v6527_v27 = vpack.c.bf16 %v5002_v26, %v5001_v24  ;;  %v740_v28 = vpop.f32.mrb[19].mxu0  ;;  %5661 = vmatprep.subr.bf16.mxu1 %v7613_v22  ;;  %v764_v24 = vadd.s32 88, %v753_v57 }
 0x133   : > { %v6530_v30 = vpack.c.bf16 %v740_v28, %v737_v25  ;;  %v757_v28 = vadd.s32 32, %v753_v57 }
 0x134   : > { %7681 = vst [vmem:[#allocation15_spill] sm:$0xff] %v6527_v27  ;;  %vm783_vm12 = vcmp.ge.s32.totalorder %v764_v24, %v6540_v59 }
 0x135   : > { %7682 = vst [vmem:[#allocation16_spill] sm:$0xff] %v6530_v30  ;;  %5663 = vmatpush3.bf16.msra.mxu1 %v6530_v30  ;;  %vm776_vm0 = vcmp.ge.s32.totalorder %v757_v28, %v6540_v59  ;;  %vm793_vm7 = vcmp.lt.s32.totalorder %v757_v28, %v6543_v60 }
 0x136   : > { %5664 = vmatprep.subr.bf16.mxu1 %v7613_v22  ;;  %vm6598_vm1 = vmand %vm776_vm0, %vm793_vm7 }
 0x139   : > { %5666 = vmatpush3.bf16.msra.mxu1 %v6527_v27 }
 0x1df   : > { %v922_v33 = vpop.f32.mrb[16].mxu1 }
 0x1e0   : > { %v928_v34 = vmul.f32 0.17677669, %v922_v33  ;;  %v5013_v35 = vpop.f32.mrb[17].mxu1  ;;  %v765_v33 = vadd.s32 96, %v753_v57 }
 0x1e1   : > { %v925_v36 = vpop.f32.mrb[18].mxu1  ;;  %v758_v35 = vadd.s32 40, %v753_v57 }
 0x1e2   : > { %v5014_v38 = vpop.f32.mrb[19].mxu1  ;;  %5048 = vmatmul.mubr.msk.f32.vlgmr.msra.gmra.mrb[20].mxu0 %vm7606_vm2, %v928_v34  ;;  %vm800_vm2 = vcmp.lt.s32.totalorder %v764_v24, %v6543_v60  ;;  %v766_v36 = vadd.s32 104, %v753_v57  ;;  %vm784_vm9 = vcmp.ge.s32.totalorder %v765_v33, %v6540_v59  ;;  %vm801_vm10 = vcmp.lt.s32.totalorder %v765_v33, %v6543_v60  ;;  %v5920_v33 = vld [vmem:[%s7601_s5 + $0x10] sm:$0xff]  }
 0x1e3   : > { %5087 = vmatprep.mubr.msk.f32.mxu0 %vm7610_vm13, %v6554_v3  ;;  %vm6591_vm6 = vmand %vm783_vm12, %vm800_vm2  ;;  %v7694_v38 = vmov 0  ;;  %vm777_vm11 = vcmp.ge.s32.totalorder %v758_v35, %v6540_v59  ;;  %v6701_v24 = vsel %vm6598_vm1, 1.0, %v7615_v0  ;;  %v5921_v34 = vld [vmem:[%s7598_s2 + $0x30] sm:$0xff]  }
 0x1e4   : > { %v7695_v38 = vsel %vm6591_vm6, 4294967295, %v7694_v38  ;;  %vm6605_vm2 = vmand %vm784_vm9, %vm801_vm10  ;;  %vm785_vm12 = vcmp.ge.s32.totalorder %v766_v36, %v6540_v59  ;;  %vm802_vm3 = vcmp.lt.s32.totalorder %v766_v36, %v6543_v60 }
 0x1e5   : > { %vm6615_vm0 = vmand %vm785_vm12, %vm802_vm3 }
 0x2b5   : > { %v1047_v42 = vpop.f32.mrb[20].mxu0 }
 0x2b6   : > { %v1048_v43 = vadd.f32 %v1047_v42, %v6537_v41  ;;  %v5049_v45 = vpop.f32.mrb[21].mxu0  ;;  %v7698_v42 = vmov 0 }
 0x2b7   : > { %v7699_v42 = vsel %vm6605_vm2, 4294967295, %v7698_v42  ;;  %v7700_v45 = vmov 0 }
 0x2b8   : > { %1051 = vmax.xlane.f32.xlu0 %v1048_v43 }
 0x345   : > { %v1052_v47 = vpop.xlane.xlu0 %1051 }
 0x346   : > { %v1053_v48 = vsub.f32 %v1048_v43, %v1052_v47  ;;  %v759_v43 = vadd.s32 48, %v753_v57  ;;  %v767_v47 = vadd.s32 112, %v753_v57 }
 0x348   : > { %v1054_v49 = vmul.f32 1.442695, %v1053_v48  ;;  %v760_v48 = vadd.s32 56, %v753_v57  ;;  %vm778_vm7 = vcmp.ge.s32.totalorder %v759_v43, %v6540_v59  ;;  %vm795_vm9 = vcmp.lt.s32.totalorder %v759_v43, %v6543_v60  ;;  %v5923_v43 = vld [vmem:[%s7598_s2 + $0x38] sm:$0xff]  }
 0x349   : > { %vm6621_vm10 = vmand %vm778_vm7, %vm795_vm9 }
 0x34a   : > { %5954 = vpow2.f32 %v1054_v49  ;;  %v768_v49 = vadd.s32 120, %v753_v57  ;;  %vm796_vm3 = vcmp.lt.s32.totalorder %v760_v48, %v6543_v60  ;;  %v6646_v57 = vsel %vm6561_vm15, 1.0, %v7615_v0 }
 0x34b   : > { %vm7713_vm15 = vcmask 64512  }
 0x34c   : > { %vm787_vm12 = vcmp.ge.s32.totalorder %v768_v49, %v6540_v59 }
 0x354   : > { %v5955_v50 = vpop.eup %5954 }
 0x355   : > { %1056 = vadd.xlane.f32.xlu1 %v5955_v50 }
 0x3e2   : > { %v1057_v52 = vpop.xlane.xlu1 %1056 }
 0x3e3   : > { %5956 = vrcp.f32 %v1057_v52 }
 0x3ed   : > { %v5957_v53 = vpop.eup %5956 }
 0x3ee   : > { %v1059_v54 = vmul.f32 %v5957_v53, %v5955_v50  ;;  %v7702_v50 = vmov 0 }
 0x3ef   : > { %v7703_v50 = vsel %vm6615_vm0, 4294967295, %v7702_v50  ;;  %vm804_vm0 = vcmp.lt.s32.totalorder %v768_v49, %v6543_v60 }
 0x3f0   : > { %5083 = vmatmul.mubr.f32.vlgmr.msra.gmra.mrb[20].mxu1 %v1059_v54  ;;  %vm6639_vm9 = vmand %vm787_vm12, %vm804_vm0 }
 0x3f1   : > { %5099 = vmatprep.mubr.msk.f32.mxu1 %vm7610_vm13, %v6559_v6  ;;  %vm794_vm13 = vcmp.lt.s32.totalorder %v758_v35, %v6543_v60  ;;  %v6736_v35 = vsel %vm6621_vm10, 1.0, %v7615_v0  ;;  %v6752_v40 = vsel %vm6639_vm9, 1.0, %v7615_v0 }
 0x3f2   : > { %vm6611_vm6 = vmand %vm777_vm11, %vm794_vm13  ;;  %vm786_vm13 = vcmp.ge.s32.totalorder %v767_v47, %v6540_v59  ;;  %vm803_vm11 = vcmp.lt.s32.totalorder %v767_v47, %v6543_v60  ;;  %v5916_v60 = vld [vmem:[%s7601_s5] sm:$0xff]   ;;  %7731 = vst [vmem:[#allocation23_spill] sm:$0xff] %v6736_v35 }
 0x3f3   : > { %v7701_v45 = vsel %vm6611_vm6, 4294967295, %v7700_v45  ;;  %vm779_vm6 = vcmp.ge.s32.totalorder %v760_v48, %v6540_v59  ;;  %vm6628_vm2 = vmand %vm786_vm13, %vm803_vm11  ;;  %v6651_v59 = vsel %vm6567_vm4, 1.0, %v7615_v0  ;;  %vm7716_vm4 = vnez %v7695_v38  ;;  %7734 = vst [vmem:[#allocation26_spill] sm:$0xff] %v6752_v40 }
 0x3f4   : > { %vm6635_vm7 = vmand %vm779_vm6, %vm796_vm3  ;;  %7712 = vst [vmem:[#allocation18_spill] sm:$0xff] %v6651_v59  ;;  %v6682_v18 = vsel %vm7716_vm4, 1.0, %v7615_v0  ;;  %vm7722_vm13 = vnez %v7699_v42  ;;  %vm7724_vm11 = vnez %v7701_v45  ;;  %vm7725_vm3 = vnez %v7703_v50  ;;  %v5922_v42 = vld [vmem:[%s7601_s5 + $0x18] sm:$0xff]  }
 0x3f5   : > { %vm7714_vm6 = vmmov %vm7713_vm15  ;;  %7717 = vst [vmem:[#allocation20_spill] sm:$0xff] %v6682_v18  ;;  %v6706_v25 = vsel %vm7722_vm13, 1.0, %v7615_v0  ;;  %v6712_v26 = vsel %vm7724_vm11, 1.0, %v7615_v0  ;;  %v6717_v28 = vsel %vm7725_vm3, 1.0, %v7615_v0  ;;  %v6741_v36 = vsel %vm6628_vm2, 1.0, %v7615_v0 }
 0x3f6   : > { %vm7718_vm8 = vmmov %vm7714_vm6  ;;  %7723 = vst [vmem:[#allocation21_spill] sm:$0xff] %v6706_v25  ;;  %v6747_v38 = vsel %vm6635_vm7, 1.0, %v7615_v0  ;;  %vm7739_vm4 = vcmask 523264   ;;  %vm7744_vm13 = vnez %v7667_v31 }
 0x3f7   : > { %vm7719_vm14 = vmmov %vm7714_vm6  ;;  %7726 = vst [vmem:[#allocation22_spill] sm:$0xff] %v6717_v28 }
 0x3f8   : > { %vm7720_vm5 = vmmov %vm7714_vm6  ;;  %7732 = vst [vmem:[#allocation24_spill] sm:$0xff] %v6741_v36 }
 0x3f9   : > { %vm7721_vm0 = vmmov %vm7720_vm5  ;;  %7733 = vst [vmem:[#allocation25_spill] sm:$0xff] %v6747_v38 }
 0x3fa   : > { %vm7727_vm1 = vmmov %vm7721_vm0 }
 0x3fb   : > { %vm7728_vm12 = vmmov %vm7721_vm0 }
 0x3fc   : > { %vm7735_vm2 = vmmov %vm7721_vm0 }
 0x3fd   : > { %vm7736_vm10 = vmmov %vm7721_vm0 }
 0x3fe   : > { %vm7737_vm7 = vmmov %vm7721_vm0 }
 0x3ff   : > { %vm7738_vm9 = vmmov %vm7721_vm0 }
 0x4c3   : > { %v1126_v4 = vpop.f32.mrb[20].mxu1 }
 0x4c4   : > { %v5084_v61 = vpop.f32.mrb[21].mxu1  ;;  %5085 = vmatprep.subr.mxu0 %v1126_v4  ;;  %5835 = vmatprep.subr.mxu1 %v1126_v4 }
 0x4c5   : > { %5086 = vmatpush3.msra.mxu0 %v1126_v4  ;;  %5836 = vmatpush3.msra.mxu1 %v1126_v4 }
 0x4c6   : > { %5088 = vmatmul.mubr.msk.f32.vlgmr.msra.gmra.mrb[22].mxu0 %vm7713_vm15, %v6646_v57  ;;  %5100 = vmatmul.mubr.msk.f32.vlgmr.msra.gmra.mrb[22].mxu1 %vm7714_vm6, %v6651_v59  ;;  %vm7729_vm15 = vmmov %vm7721_vm0 }
 0x4c7   : > { %5111 = vmatprep.subr.bf16.mxu1 %v5916_v60  ;;  %5135 = vmatprep.subr.bf16.mxu0 %v7615_v0  ;;  %vm7730_vm6 = vmmov %vm7721_vm0 }
 0x4c8   : > { %5112 = vmatpush3.bf16.msra.mxu1 %v5916_v60  ;;  %5136 = vmatpush3.bf16.msra.mxu0 %v5917_v63 }
 0x4c9   : > { %5090 = vmatprep.mubr.msk.f32.mxu0 %vm7718_vm8, %v6666_v2  ;;  %5102 = vmatprep.mubr.msk.f32.mxu1 %vm7719_vm14, %v6671_v10  ;;  %vm7740_vm8 = vmmov 0   ;;  %vm7741_vm14 = vmmov %vm7739_vm4 }
 0x4ca   : > { %5091 = vmatmul.mubr.msk.f32.gmra.mrb[24].mxu0 %vm7720_vm5, %v6677_v15  ;;  %5103 = vmatmul.mubr.msk.f32.gmra.mrb[24].mxu1 %vm7721_vm0, %v6682_v18  ;;  %vm7742_vm5 = vmmov %vm7739_vm4 }
 0x4cb   : > { %5113 = vmatprep.subr.bf16.mxu1 %v5918_v19  ;;  %5137 = vmatprep.subr.bf16.mxu0 %v7615_v0  ;;  %vm7743_vm0 = vmmov %vm7739_vm4 }
 0x4cc   : > { %5114 = vmatpush3.bf16.msra.mxu1 %v5918_v19  ;;  %5138 = vmatpush3.bf16.msra.mxu0 %v5919_v21  ;;  %vm7745_vm11 = vmmov %vm7743_vm0 }
 0x4cd   : > { %5093 = vmatprep.mubr.msk.f32.mxu0 %vm7727_vm1, %v6701_v24  ;;  %5105 = vmatprep.mubr.msk.f32.mxu1 %vm7728_vm12, %v6706_v25  ;;  %vm7746_vm3 = vmmov %vm7743_vm0 }
 0x4ce   : > { %5094 = vmatmul.mubr.msk.f32.gmra.mrb[26].mxu0 %vm7729_vm15, %v6712_v26  ;;  %5106 = vmatmul.mubr.msk.f32.gmra.mrb[26].mxu1 %vm7730_vm6, %v6717_v28  ;;  %vm7747_vm1 = vmmov %vm7743_vm0  ;;  %vm7750_vm6 = vcmask 261120  }
 0x4cf   : > { %5115 = vmatprep.subr.bf16.mxu1 %v5920_v33  ;;  %5139 = vmatprep.subr.bf16.mxu0 %v7615_v0  ;;  %vm7748_vm12 = vmmov %vm7743_vm0 }
 0x4d0   : > { %5116 = vmatpush3.bf16.msra.mxu1 %v5920_v33  ;;  %5140 = vmatpush3.bf16.msra.mxu0 %v5921_v34  ;;  %vm7749_vm15 = vmmov %vm7743_vm0 }
 0x4d1   : > { %5096 = vmatprep.mubr.msk.f32.mxu0 %vm7735_vm2, %v6736_v35  ;;  %5108 = vmatprep.mubr.msk.f32.mxu1 %vm7736_vm10, %v6741_v36  ;;  %vm7751_vm10 = vmmov %vm7735_vm2 }
 0x4d2   : > { %5097 = vmatmul.mubr.msk.f32.gmra.mrb[28].mxu0 %vm7737_vm7, %v6747_v38  ;;  %5109 = vmatmul.mubr.msk.f32.gmra.mrb[28].mxu1 %vm7738_vm9, %v6752_v40  ;;  %vm7752_vm7 = vmmov %vm7735_vm2 }
 0x4d3   : > { %5117 = vmatprep.subr.bf16.mxu1 %v5922_v42  ;;  %5141 = vmatprep.subr.bf16.mxu0 %v7615_v0  ;;  %vm7753_vm9 = vmmov %vm7735_vm2 }
 0x4d4   : > { %5118 = vmatpush3.bf16.msra.mxu1 %v5922_v42  ;;  %5142 = vmatpush3.bf16.msra.mxu0 %v5923_v43 }
 0x4d5   : > { %5119 = vmatprep.mubr.msk.bf16.mxu1 %vm7739_vm4, %v6337_v5  ;;  %5143 = vmatprep.mubr.msk.bf16.mxu0 %vm7740_vm8, %v7615_v0  ;;  %vm7754_vm4 = vmmov %vm7735_vm2 }
 0x4d6   : > { %5699 = vmatprep.subr.bf16.mxu0 %v7613_v22  ;;  %5667 = vmatprep.subr.bf16.mxu1 %v7613_v22 }
 0x4d7   : > { %5120 = vmatmul.mubr.msk.bf16.vlgmr.msra.gmra.mrb[32].mxu1 %vm7741_vm14, %v6345_v8  ;;  %5144 = vmatmul.mubr.msk.bf16.vlgmr.msra.gmra.mrb[32].mxu0 %vm7742_vm5, %v6475_v51  ;;  %vm7755_vm14 = vmmov %vm7735_vm2 }
 0x4d8   : > { %5701 = vmatpush3.bf16.msra.mxu0 %v6506_v1  ;;  %5123 = vmatprep.mubr.msk.bf16.mxu1 %vm7743_vm0, %v6352_v9  ;;  %vm7756_vm5 = vmmov %vm7735_vm2 }
 0x4d9   : > { %5702 = vmatprep.subr.bf16.mxu0 %v7613_v22  ;;  %5214 = vmatprep.mubr.msk.f32.mxu0 %vm7740_vm8, %v7615_v0  ;;  %vm7757_vm0 = vmmov %vm7735_vm2 }
 0x4dc   : > { %5704 = vmatpush3.bf16.msra.mxu0 %v6504_v62 }
 0x4dd   : > { %5670 = vmatpush3.bf16.xpose.msk.msra.mxu1 %vm7744_vm13, %v6453_v32  ;;  %5705 = vmatprep.subr.bf16.mxu0 %v7613_v22 }
 0x4de   : > { %5671 = vmatprep.subr.bf16.mxu1 %v7613_v22 }
 0x4df   : > { %5124 = vmatmul.mubr.msk.bf16.gmra.mrb[36].mxu1 %vm7745_vm11, %v6359_v11  ;;  %vm7758_vm11 = vmmov %vm7757_vm0 }
 0x4e0   : > { %5707 = vmatpush3.bf16.msra.mxu0 %v6514_v12  ;;  %5127 = vmatprep.mubr.msk.bf16.mxu1 %vm7746_vm3, %v6368_v13  ;;  %vm7760_vm3 = vmmov %vm7757_vm0 }
 0x4e1   : > { %5708 = vmatprep.subr.bf16.mxu0 %v7613_v22 }
 0x4e4   : > { %5710 = vmatpush3.bf16.msra.mxu0 %v6511_v7 }
 0x4e5   : > { %5674 = vmatpush3.bf16.xpose.msk.msra.mxu1 %vm7744_vm13, %v6445_v29  ;;  %5711 = vmatprep.subr.bf16.mxu0 %v7613_v22 }
 0x4e6   : > { %5675 = vmatprep.subr.bf16.mxu1 %v7613_v22 }
 0x4e7   : > { %5128 = vmatmul.mubr.msk.bf16.gmra.mrb[40].mxu1 %vm7747_vm1, %v6378_v14  ;;  %vm7761_vm1 = vmmov %vm7757_vm0 }
 0x4e8   : > { %5713 = vmatpush3.bf16.msra.mxu0 %v6522_v23  ;;  %5131 = vmatprep.mubr.msk.bf16.mxu1 %vm7748_vm12, %v6387_v16  ;;  %vm7762_vm12 = vmmov %vm7757_vm0 }
 0x4e9   : > { %5714 = vmatprep.subr.bf16.mxu0 %v7613_v22 }
 0x4ec   : > { %5716 = vmatpush3.bf16.msra.mxu0 %v6519_v20 }
 0x4ed   : > { %5678 = vmatpush3.bf16.xpose.msk.msra.mxu1 %vm7744_vm13, %v6461_v39  ;;  %5717 = vmatprep.subr.bf16.mxu0 %v7613_v22 }
 0x4ee   : > { %5679 = vmatprep.subr.bf16.mxu1 %v7613_v22 }
 0x4ef   : > { %5132 = vmatmul.mubr.msk.bf16.gmra.mrb[44].mxu1 %vm7749_vm15, %v6397_v17  ;;  %vm7763_vm15 = vmmov %vm7757_vm0 }
 0x4f0   : > { %5719 = vmatpush3.bf16.msra.mxu0 %v6530_v30  ;;  %5179 = vmatprep.mubr.msk.f32.mxu1 %vm7740_vm8, %v7615_v0 }
 0x4f1   : > { %5720 = vmatprep.subr.bf16.mxu0 %v7613_v22 }
 0x4f4   : > { %5722 = vmatpush3.bf16.msra.mxu0 %v6527_v27 }
 0x4f5   : > { %5682 = vmatpush3.bf16.xpose.msk.msra.mxu1 %vm7744_vm13, %v6459_v37 }
 0x4f6   : > { %5683 = vmatprep.subr.bf16.mxu1 %v7613_v22 }
 0x4fd   : > { %5686 = vmatpush3.bf16.xpose.msk.msra.mxu1 %vm7744_vm13, %v6469_v46 }
 0x4fe   : > { %5687 = vmatprep.subr.bf16.mxu1 %v7613_v22 }
 0x505   : > { %5690 = vmatpush3.bf16.xpose.msk.msra.mxu1 %vm7744_vm13, %v6467_v44 }
 0x506   : > { %5691 = vmatprep.subr.bf16.mxu1 %v7613_v22 }
 0x50d   : > { %5694 = vmatpush3.bf16.xpose.msk.msra.mxu1 %vm7744_vm13, %v6483_v58 }
 0x50e   : > { %5695 = vmatprep.subr.bf16.mxu1 %v7613_v22 }
 0x515   : > { %5698 = vmatpush3.bf16.xpose.msk.msra.mxu1 %vm7744_vm13, %v6479_v56 }
 0x599   : > { %v6841_v5 = vpop.f32.mrb[22].mxu0  ;;  %v6843_v8 = vpop.f32.mrb[22].mxu1 }
 0x59a   : > { %v6845_v9 = vpop.f32.mrb[23].mxu0  ;;  %v6847_v11 = vpop.f32.mrb[23].mxu1 }
 0x59d   : > { %v6849_v13 = vpop.f32.mrb[24].mxu0  ;;  %v6851_v14 = vpop.f32.mrb[24].mxu1 }
 0x59e   : > { %v6853_v16 = vpop.f32.mrb[25].mxu0  ;;  %v6855_v17 = vpop.f32.mrb[25].mxu1 }
 0x5a1   : > { %v6857_v45 = vpop.f32.mrb[26].mxu0  ;;  %v6859_v47 = vpop.f32.mrb[26].mxu1 }
 0x5a2   : > { %v6861_v48 = vpop.f32.mrb[27].mxu0  ;;  %v6863_v49 = vpop.f32.mrb[27].mxu1 }
 0x5a5   : > { %v6865_v50 = vpop.f32.mrb[28].mxu0  ;;  %v6867_v52 = vpop.f32.mrb[28].mxu1 }
 0x5a6   : > { %v6869_v53 = vpop.f32.mrb[29].mxu0  ;;  %v6871_v54 = vpop.f32.mrb[29].mxu1 }
 0x5aa   : > { %v5121_v4 = vpop.f32.mrb[32].mxu1  ;;  %v1651_v60 = vpop.f32.mrb[32].mxu0 }
 0x5ab   : > { %v1406_v61 = vadd.f32 %v5121_v4, %v6876_v55  ;;  %v1657_v63 = vmul.f32 0.17677669, %v1651_v60  ;;  %v1397_v19 = vpop.f32.mrb[33].mxu1  ;;  %v5145_v21 = vpop.f32.mrb[33].mxu0 }
 0x5ac   : > { %v1398_v33 = vadd.f32 %v6876_v55, %v1397_v19  ;;  %v5122_v34 = vpop.f32.mrb[34].mxu1  ;;  %v1654_v42 = vpop.f32.mrb[34].mxu0 }
 0x5ad   : > { %v4269_v43 = vmul.f32 -1.442695, %v1406_v61  ;;  %v1409_v22 = vadd.f32 %v5122_v34, %v6876_v55  ;;  %v1400_v0 = vpop.f32.mrb[35].mxu1  ;;  %v5146_v56 = vpop.f32.mrb[35].mxu0  ;;  %5180 = vmatmul.mubr.msk.f32.vlgmr.msra.gmra.mrb[30].mxu1 %vm7750_vm6, %v1657_v63  ;;  %vm7764_vm6 = vmmov %vm7757_vm0 }
 0x5ae   : > { %v4267_v58 = vmul.f32 -1.442695, %v1398_v33  ;;  %v1401_v44 = vadd.f32 %v6876_v55, %v1400_v0 }
 0x5af   : > { %5958 = vpow2.f32 %v4269_v43  ;;  %v4270_v46 = vmul.f32 -1.442695, %v1409_v22 }
 0x5b0   : > { %5960 = vpow2.f32 %v4267_v58  ;;  %v4268_v4 = vmul.f32 -1.442695, %v1401_v44 }
 0x5b1   : > { %5962 = vpow2.f32 %v4270_v46 }
 0x5b2   : > { %5964 = vpow2.f32 %v4268_v4  ;;  %v5125_v60 = vpop.f32.mrb[36].mxu1 }
 0x5b3   : > { %v1422_v19 = vadd.f32 %v5125_v60, %v6876_v55  ;;  %v1413_v21 = vpop.f32.mrb[37].mxu1 }
 0x5b4   : > { %v1414_v61 = vadd.f32 %v6876_v55, %v1413_v21  ;;  %v5126_v34 = vpop.f32.mrb[38].mxu1 }
 0x5b5   : > { %v4273_v42 = vmul.f32 -1.442695, %v1422_v19  ;;  %v1425_v56 = vadd.f32 %v5126_v34, %v6876_v55  ;;  %v1416_v63 = vpop.f32.mrb[39].mxu1 }
 0x5b6   : > { %v4271_v33 = vmul.f32 -1.442695, %v1414_v61  ;;  %v1417_v0 = vadd.f32 %v6876_v55, %v1416_v63 }
 0x5b7   : > { %5966 = vpow2.f32 %v4273_v42  ;;  %v4274_v22 = vmul.f32 -1.442695, %v1425_v56 }
 0x5b8   : > { %5968 = vpow2.f32 %v4271_v33  ;;  %v4272_v44 = vmul.f32 -1.442695, %v1417_v0 }
 0x5b9   : > { %v5959_v46 = vpop.eup %5958  ;;  %5970 = vpow2.f32 %v4274_v22 }
 0x5ba   : > { %v5961_v58 = vpop.eup %5960  ;;  %v1510_v43 = vadd.f32 1.0, %v5959_v46  ;;  %5972 = vpow2.f32 %v4272_v44  ;;  %v5129_v4 = vpop.f32.mrb[40].mxu1 }
 0x5bb   : > { %v5963_v60 = vpop.eup %5962  ;;  %v1508_v21 = vadd.f32 1.0, %v5961_v58  ;;  %v1438_v19 = vadd.f32 %v5129_v4, %v6876_v55  ;;  %v1429_v37 = vpop.f32.mrb[41].mxu1 }
 0x5bc   : > { %v5965_v34 = vpop.eup %5964  ;;  %5974 = vrcp.f32 %v1510_v43  ;;  %v1511_v61 = vadd.f32 1.0, %v5963_v60  ;;  %v1430_v63 = vadd.f32 %v6876_v55, %v1429_v37  ;;  %v5130_v42 = vpop.f32.mrb[42].mxu1 }
 0x5bd   : > { %5976 = vrcp.f32 %v1508_v21  ;;  %v1509_v56 = vadd.f32 1.0, %v5965_v34  ;;  %v4277_v33 = vmul.f32 -1.442695, %v1438_v19  ;;  %v1441_v0 = vadd.f32 %v5130_v42, %v6876_v55  ;;  %v1432_v22 = vpop.f32.mrb[43].mxu1 }
 0x5be   : > { %5978 = vrcp.f32 %v1511_v61  ;;  %v4275_v44 = vmul.f32 -1.442695, %v1430_v63  ;;  %v1433_v46 = vadd.f32 %v6876_v55, %v1432_v22 }
 0x5bf   : > { %5980 = vrcp.f32 %v1509_v56  ;;  %v4278_v58 = vmul.f32 -1.442695, %v1441_v0 }
 0x5c0   : > { %5982 = vpow2.f32 %v4277_v33  ;;  %v4276_v4 = vmul.f32 -1.442695, %v1433_v46 }
 0x5c1   : > { %v5967_v39 = vpop.eup %5966  ;;  %5984 = vpow2.f32 %v4275_v44 }
 0x5c2   : > { %v5969_v43 = vpop.eup %5968  ;;  %v1514_v60 = vadd.f32 1.0, %v5967_v39  ;;  %5986 = vpow2.f32 %v4278_v58  ;;  %v5133_v37 = vpop.f32.mrb[44].mxu1 }
 0x5c3   : > { %v5971_v21 = vpop.eup %5970  ;;  %v1512_v34 = vadd.f32 1.0, %v5969_v43  ;;  %5988 = vpow2.f32 %v4276_v4  ;;  %v1454_v19 = vadd.f32 %v5133_v37, %v6876_v55  ;;  %v1445_v42 = vpop.f32.mrb[45].mxu1 }
 0x5c4   : > { %v5973_v61 = vpop.eup %5972  ;;  %5990 = vrcp.f32 %v1514_v60  ;;  %v1515_v63 = vadd.f32 1.0, %v5971_v21  ;;  %v1446_v56 = vadd.f32 %v6876_v55, %v1445_v42  ;;  %v5134_v0 = vpop.f32.mrb[46].mxu1 }
 0x5c5   : > { %5992 = vrcp.f32 %v1512_v34  ;;  %v1513_v33 = vadd.f32 1.0, %v5973_v61  ;;  %v4281_v22 = vmul.f32 -1.442695, %v1454_v19  ;;  %v1457_v44 = vadd.f32 %v5134_v0, %v6876_v55  ;;  %v1448_v39 = vpop.f32.mrb[47].mxu1 }
 0x5c6   : > { %v5975_v46 = vpop.eup %5974  ;;  %5994 = vrcp.f32 %v1515_v63  ;;  %v4279_v58 = vmul.f32 -1.442695, %v1446_v56  ;;  %v1449_v4 = vadd.f32 %v6876_v55, %v1448_v39 }
 0x5c7   : > { %v5977_v43 = vpop.eup %5976  ;;  %v6896_v37 = vmul.f32 %v5975_v46, %v6853_v16  ;;  %5996 = vrcp.f32 %v1513_v33  ;;  %v4282_v60 = vmul.f32 -1.442695, %v1457_v44 }
 0x5c8   : > { %v5979_v21 = vpop.eup %5978  ;;  %5998 = vpow2.f32 %v4281_v22  ;;  %v4280_v42 = vmul.f32 -1.442695, %v1449_v4  ;;  %v6899_v34 = vmul.f32 %v5977_v43, %v6845_v9 }
 0x5c9   : > { %v5981_v19 = vpop.eup %5980  ;;  %v6902_v61 = vmul.f32 %v5979_v21, %v6849_v13  ;;  %6000 = vpow2.f32 %v4279_v58 }
 0x5ca   : > { %v5983_v63 = vpop.eup %5982  ;;  %6002 = vpow2.f32 %v4282_v60  ;;  %v6905_v55 = vmul.f32 %v5981_v19, %v6841_v5 }
 0x5cb   : > { %v5985_v16 = vpop.eup %5984  ;;  %v1518_v56 = vadd.f32 1.0, %v5983_v63  ;;  %6004 = vpow2.f32 %v4280_v42 }
 0x5cc   : > { %v5987_v33 = vpop.eup %5986  ;;  %v1516_v22 = vadd.f32 1.0, %v5985_v16 }
 0x5cd   : > { %v5989_v44 = vpop.eup %5988  ;;  %6006 = vrcp.f32 %v1518_v56  ;;  %v1519_v13 = vadd.f32 1.0, %v5987_v33 }
 0x5ce   : > { %v5991_v39 = vpop.eup %5990  ;;  %6008 = vrcp.f32 %v1516_v22  ;;  %v1517_v46 = vadd.f32 1.0, %v5989_v44 }
 0x5cf   : > { %v5993_v58 = vpop.eup %5992  ;;  %6010 = vrcp.f32 %v1519_v13  ;;  %v6912_v5 = vmul.f32 %v5991_v39, %v6869_v53 }
 0x5d0   : > { %v5995_v4 = vpop.eup %5994  ;;  %6012 = vrcp.f32 %v1517_v46  ;;  %v6915_v43 = vmul.f32 %v5993_v58, %v6861_v48 }
 0x5d1   : > { %v5997_v60 = vpop.eup %5996  ;;  %v6918_v21 = vmul.f32 %v5995_v4, %v6865_v50 }
 0x5d2   : > { %v5999_v42 = vpop.eup %5998  ;;  %v6921_v19 = vmul.f32 %v5997_v60, %v6857_v45 }
 0x5d3   : > { %v6001_v63 = vpop.eup %6000  ;;  %v1522_v16 = vadd.f32 1.0, %v5999_v42 }
 0x5d4   : > { %v6003_v53 = vpop.eup %6002  ;;  %v1520_v33 = vadd.f32 1.0, %v6001_v63 }
 0x5d5   : > { %v6005_v48 = vpop.eup %6004  ;;  %6014 = vrcp.f32 %v1522_v16  ;;  %v1523_v44 = vadd.f32 1.0, %v6003_v53 }
 0x5d6   : > { %6016 = vrcp.f32 %v1520_v33  ;;  %v1521_v50 = vadd.f32 1.0, %v6005_v48 }
 0x5d7   : > { %v6007_v13 = vpop.eup %6006  ;;  %6018 = vrcp.f32 %v1523_v44 }
 0x5d8   : > { %v6009_v39 = vpop.eup %6008  ;;  %6020 = vrcp.f32 %v1521_v50  ;;  %v6928_v45 = vmul.f32 %v6007_v13, %v6855_v17  ;;  %v5933_v50 = vld [vmem:[%s7603_s7 + $0x18] sm:$0xff]   ;;  %v7091_v13 = vld [vmem:[%s7603_s7] sm:$0xff]  }
 0x5d9   : > { %v6011_v46 = vpop.eup %6010  ;;  %v6931_v58 = vmul.f32 %v6009_v39, %v6847_v11 }
 0x5da   : > { %v6013_v4 = vpop.eup %6012  ;;  %v6934_v60 = vmul.f32 %v6011_v46, %v6851_v14 }
 0x5db   : > { %v6937_v42 = vmul.f32 %v6013_v4, %v6843_v8 }
 0x5df   : > { %v6015_v53 = vpop.eup %6014 }
 0x5e0   : > { %v6017_v17 = vpop.eup %6016  ;;  %v6944_v33 = vmul.f32 %v6015_v53, %v6871_v54 }
 0x5e1   : > { %v6019_v11 = vpop.eup %6018  ;;  %v6947_v48 = vmul.f32 %v6017_v17, %v6863_v49 }
 0x5e2   : > { %v6021_v14 = vpop.eup %6020  ;;  %v6950_v44 = vmul.f32 %v6019_v11, %v6867_v52 }
 0x5e3   : > { %v6953_v8 = vmul.f32 %v6021_v14, %v6859_v47  ;;  %v5924_v14 = vld [vmem:[%s7601_s5 + $0x20] sm:$0xff]  }
 0x680   : > { %v1727_v39 = vpop.f32.mrb[30].mxu1 }
 0x681   : > { %v1728_v54 = vadd.f32 %v1727_v39, %v6537_v41  ;;  %v5181_v46 = vpop.f32.mrb[31].mxu1 }
 0x683   : > { %1731 = vmax.xlane.f32.xlu1 %v1728_v54 }
 0x710   : > { %v1732_v49 = vpop.xlane.xlu1 %1731 }
 0x711   : > { %v1733_v4 = vsub.f32 %v1728_v54, %v1732_v49  ;;  %v5925_v54 = vld [vmem:[%s7601_s5 + $0x28] sm:$0xff]   ;;  %v5926_v49 = vld [vmem:[%s7601_s5 + $0x30] sm:$0xff]  }
 0x713   : > { %v1734_v53 = vmul.f32 1.442695, %v1733_v4  ;;  %v5927_v4 = vld [vmem:[%s7601_s5 + $0x38] sm:$0xff]  }
 0x715   : > { %6022 = vpow2.f32 %v1734_v53  ;;  %v7759_v53 = vmov 0.0  }
 0x71f   : > { %v6023_v52 = vpop.eup %6022 }
 0x720   : > { %1736 = vadd.xlane.f32.xlu0 %v6023_v52 }
 0x7ad   : > { %v1737_v17 = vpop.xlane.xlu0 %1736 }
 0x7ae   : > { %6024 = vrcp.f32 %v1737_v17  ;;  %v5928_v17 = vld [vmem:[%s7598_s2 + $0x40] sm:$0xff]  }
 0x7b8   : > { %v6025_v47 = vpop.eup %6024 }
 0x7b9   : > { %v1739_v11 = vmul.f32 %v6025_v47, %v6023_v52  ;;  %v7006_v52 = vld [vmem:[%s6332_s25] sm:$0xff]   ;;  %v7014_v47 = vld [vmem:[%s6332_s25 + $0x8] sm:$0xff]  }
 0x7ba   : > { %7767 = vst [vmem:[#allocation27_spill] sm:$0xff] %v7006_v52  ;;  %7769 = vst [vmem:[#allocation28_spill] sm:$0xff] %v7014_v47 }
 0x7bb   : > { %5215 = vmatmul.mubr.f32.vlgmr.msra.gmra.mrb[30].mxu0 %v1739_v11  ;;  %v7019_v11 = vld [vmem:[%s6332_s25 + $0x10] sm:$0xff]  }
 0x7bc   : > { %5219 = vmatprep.mubr.msk.f32.mxu0 %vm7735_vm2, %v6554_v3  ;;  %vm7765_vm2 = vmmov %vm7757_vm0  ;;  %7771 = vst [vmem:[#allocation29_spill] sm:$0xff] %v7019_v11 }
 0x88e   : > { %v1806_v39 = vpop.f32.mrb[30].mxu0 }
 0x88f   : > { %v5216_v46 = vpop.f32.mrb[31].mxu0  ;;  %5217 = vmatprep.subr.mxu0 %v1806_v39 }
 0x890   : > { %5218 = vmatpush3.msra.mxu0 %v1806_v39  ;;  %v5930_v39 = vld [vmem:[%s7598_s2 + $0x50] sm:$0xff]   ;;  %v7032_v46 = vld [vmem:[%s6332_s25 + $0x18] sm:$0xff]  }
 0x891   : > { %5220 = vmatmul.mubr.msk.f32.vlgmr.msra.gmra.mrb[36].mxu0 %vm7751_vm10, %v6646_v57  ;;  %5243 = vmatprep.subr.bf16.mxu0 %v5924_v14  ;;  %vm7766_vm10 = vmmov %vm7757_vm0  ;;  %7773 = vst [vmem:[#allocation30_spill] sm:$0xff] %v7032_v46 }
 0x892   : > { %5222 = vmatprep.mubr.msk.f32.mxu0 %vm7752_vm7, %v6666_v2  ;;  %5244 = vmatpush3.bf16.msra.mxu0 %v5924_v14  ;;  %vm7768_vm7 = vcmask 523264   ;;  %v5929_v14 = vld [vmem:[%s7598_s2 + $0x48] sm:$0xff]  }
 0x893   : > { %5245 = vmatprep.subr.bf16.mxu0 %v5925_v54 }
 0x895   : > { %5223 = vmatmul.mubr.msk.f32.gmra.mrb[38].mxu0 %vm7753_vm9, %v6677_v15  ;;  %vm7770_vm9 = vmmov %vm7768_vm7 }
 0x896   : > { %5225 = vmatprep.mubr.msk.f32.mxu0 %vm7754_vm4, %v6701_v24  ;;  %5246 = vmatpush3.bf16.msra.mxu0 %v5925_v54  ;;  %vm7772_vm4 = vmmov %vm7768_vm7  ;;  %v7037_v54 = vld [vmem:[%s6332_s25 + $0x20] sm:$0xff]  }
 0x897   : > { %5247 = vmatprep.subr.bf16.mxu0 %v5926_v49  ;;  %7775 = vst [vmem:[#allocation31_spill] sm:$0xff] %v7037_v54 }
 0x899   : > { %5226 = vmatmul.mubr.msk.f32.gmra.mrb[40].mxu0 %vm7755_vm14, %v6712_v26  ;;  %vm7774_vm14 = vmmov %vm7772_vm4 }
 0x89a   : > { %5228 = vmatprep.mubr.msk.f32.mxu0 %vm7756_vm5, %v6736_v35  ;;  %5248 = vmatpush3.bf16.msra.mxu0 %v5926_v49  ;;  %vm7776_vm5 = vmmov %vm7772_vm4  ;;  %v5931_v49 = vld [vmem:[%s7598_s2 + $0x58] sm:$0xff]  }
 0x89b   : > { %5249 = vmatprep.subr.bf16.mxu0 %v5927_v4 }
 0x89d   : > { %5229 = vmatmul.mubr.msk.f32.gmra.mrb[42].mxu0 %vm7757_vm0, %v6747_v38  ;;  %vm7779_vm0 = vmmov %vm7772_vm4 }
 0x89e   : > { %5231 = vmatprep.mubr.msk.f32.mxu0 %vm7758_vm11, %v6559_v6  ;;  %5250 = vmatpush3.bf16.msra.mxu0 %v5927_v4  ;;  %v7777_v4 = vmov 0.0|0.0   ;;  %vm7781_vm11 = vmmov %vm7779_vm0 }
 0x89f   : > { %5307 = vmatprep.subr.bf16.mxu0 %v7759_v53 }
 0x8a1   : > { %5232 = vmatmul.mubr.msk.f32.gmra.mrb[44].mxu0 %vm7760_vm3, %v6651_v59  ;;  %vm7783_vm3 = vmmov %vm7779_vm0 }
 0x8a2   : > { %5234 = vmatprep.mubr.msk.f32.mxu0 %vm7761_vm1, %v6671_v10  ;;  %vm7784_vm1 = vmmov %vm7779_vm0 }
 0x8a5   : > { %5235 = vmatmul.mubr.msk.f32.gmra.mrb[46].mxu0 %vm7762_vm12, %v6682_v18  ;;  %vm7785_vm12 = vcmask 261120  }
 0x8a6   : > { %5237 = vmatprep.mubr.msk.f32.mxu0 %vm7763_vm15, %v6706_v25  ;;  %vm7786_vm15 = vmmov %vm7785_vm12 }
 0x8a9   : > { %5238 = vmatmul.mubr.msk.f32.gmra.mrb[48].mxu0 %vm7764_vm6, %v6717_v28  ;;  %vm7787_vm6 = vmmov %vm7785_vm12 }
 0x8aa   : > { %5240 = vmatprep.mubr.msk.f32.mxu0 %vm7765_vm2, %v6741_v36  ;;  %vm7788_vm2 = vmmov %vm7787_vm6 }
 0x8ad   : > { %5241 = vmatmul.mubr.msk.f32.gmra.mrb[50].mxu0 %vm7766_vm10, %v6752_v40  ;;  %vm7789_vm10 = vmmov %vm7788_vm2 }
 0x8ae   : > { %5251 = vmatprep.mubr.msk.bf16.mxu0 %vm7768_vm7, %v7006_v52  ;;  %vm7790_vm7 = vmmov %vm7788_vm2 }
 0x8b1   : > { %5252 = vmatmul.mubr.msk.bf16.vlgmr.msra.gmra.mrb[52].mxu0 %vm7770_vm9, %v7014_v47  ;;  %vm7791_vm9 = vmmov %vm7788_vm2 }
 0x8b2   : > { %5255 = vmatprep.mubr.msk.bf16.mxu0 %vm7772_vm4, %v7019_v11  ;;  %5308 = vmatpush3.bf16.msra.mxu0 %v5928_v17  ;;  %v7047_v17 = vld [vmem:[%s6332_s25 + $0x28] sm:$0xff]   ;;  %vm7792_vm4 = vmmov %vm7788_vm2 }
 0x8b3   : > { %5309 = vmatprep.subr.bf16.mxu0 %v7759_v53  ;;  %7778 = vst [vmem:[#allocation32_spill] sm:$0xff] %v7047_v17 }
 0x8b6   : > { %5310 = vmatpush3.bf16.msra.mxu0 %v5929_v14  ;;  %v7052_v14 = vld [vmem:[%s6332_s25 + $0x30] sm:$0xff]  }
 0x8b7   : > { %5311 = vmatprep.subr.bf16.mxu0 %v7759_v53  ;;  %7780 = vst [vmem:[#allocation33_spill] sm:$0xff] %v7052_v14 }
 0x8b9   : > { %5256 = vmatmul.mubr.msk.bf16.gmra.mrb[56].mxu0 %vm7774_vm14, %v7032_v46  ;;  %vm7794_vm14 = vmmov %vm7788_vm2 }
 0x8ba   : > { %5259 = vmatprep.mubr.msk.bf16.mxu0 %vm7776_vm5, %v7037_v54  ;;  %5312 = vmatpush3.bf16.msra.mxu0 %v5930_v39  ;;  %v7057_v39 = vld [vmem:[%s6332_s25 + $0x38] sm:$0xff]   ;;  %vm7796_vm5 = vmmov %vm7788_vm2 }
 0x8bb   : > { %5313 = vmatprep.subr.bf16.mxu0 %v7759_v53  ;;  %7782 = vst [vmem:[#allocation34_spill] sm:$0xff] %v7057_v39 }
 0x8be   : > { %5314 = vmatpush3.bf16.msra.mxu0 %v5931_v49  ;;  %v5932_v49 = vld [vmem:[%s7603_s7 + $0x10] sm:$0xff]  }
 0x8bf   : > { %5755 = vmatprep.subr.bf16.mxu0 %v7777_v4  ;;  %5267 = vmatprep.subr.bf16.mxu1 %v5932_v49 }
 0x8c0   : > { %5268 = vmatpush3.bf16.msra.mxu1 %v5932_v49 }
 0x8c1   : > { %5260 = vmatmul.mubr.msk.bf16.gmra.mrb[60].mxu0 %vm7779_vm0, %v7047_v17  ;;  %5269 = vmatprep.subr.bf16.mxu1 %v5933_v50  ;;  %vm7798_vm0 = vmmov %vm7788_vm2 }
 0x8c2   : > { %5263 = vmatprep.mubr.msk.bf16.mxu0 %vm7781_vm11, %v7052_v14  ;;  %vm7800_vm11 = vmmov %vm7798_vm0 }
 0x8c4   : > { %5270 = vmatpush3.bf16.msra.mxu1 %v5933_v50 }
 0x8c5   : > { %5287 = vmatprep.subr.bf16.mxu1 %v7091_v13 }
 0x8c9   : > { %5264 = vmatmul.mubr.msk.bf16.gmra.mrb[64].mxu0 %vm7783_vm3, %v7057_v39  ;;  %vm7802_vm3 = vmmov %vm7798_vm0 }
 0x8ca   : > { %5315 = vmatprep.mubr.msk.bf16.mxu0 %vm7740_vm8, %v7759_v53 }
 0x8d1   : > { %5316 = vmatmul.mubr.msk.bf16.vlgmr.msra.gmra.mrb[68].mxu0 %vm7784_vm1, %v6475_v51  ;;  %v7129_v51 = vld [vmem:[%s7602_s6 + $0x1] ss:$0 sm:$0xff]  ;;  %vm7804_vm1 = vmmov %vm7798_vm0 }
 0x8d2   : > { %5757 = vmatpush3.bf16.msra.mxu0 %v6506_v1  ;;  %5386 = vmatprep.mubr.msk.f32.mxu0 %vm7740_vm8, %v7759_v53 }
 0x8d3   : > { %5758 = vmatprep.subr.bf16.mxu0 %v7777_v4 }
 0x8d6   : > { %5760 = vmatpush3.bf16.msra.mxu0 %v6504_v62 }
 0x8d7   : > { %5761 = vmatprep.subr.bf16.mxu0 %v7777_v4 }
 0x8da   : > { %5763 = vmatpush3.bf16.msra.mxu0 %v6514_v12 }
 0x8db   : > { %5764 = vmatprep.subr.bf16.mxu0 %v7777_v4 }
 0x8de   : > { %5766 = vmatpush3.bf16.msra.mxu0 %v6511_v7 }
 0x8df   : > { %5767 = vmatprep.subr.bf16.mxu0 %v7777_v4 }
 0x8e2   : > { %5769 = vmatpush3.bf16.msra.mxu0 %v6522_v23 }
 0x8e3   : > { %5770 = vmatprep.subr.bf16.mxu0 %v7777_v4 }
 0x8e6   : > { %5772 = vmatpush3.bf16.msra.mxu0 %v6519_v20 }
 0x8e7   : > { %5773 = vmatprep.subr.bf16.mxu0 %v7777_v4 }
 0x8ea   : > { %5775 = vmatpush3.bf16.msra.mxu0 %v6530_v30 }
 0x8eb   : > { %5776 = vmatprep.subr.bf16.mxu0 %v7777_v4 }
 0x8ee   : > { %5778 = vmatpush3.bf16.msra.mxu0 %v6527_v27 }
 0x964   : > { %v7094_v63 = vpop.f32.mrb[36].mxu0 }
 0x965   : > { %v7096_v16 = vpop.f32.mrb[37].mxu0 }
 0x968   : > { %v7098_v56 = vpop.f32.mrb[38].mxu0 }
 0x969   : > { %v7100_v49 = vpop.f32.mrb[39].mxu0 }
 0x96c   : > { %v7102_v22 = vpop.f32.mrb[40].mxu0 }
 0x96d   : > { %v7104_v0 = vpop.f32.mrb[41].mxu0 }
 0x970   : > { %v7106_v50 = vpop.f32.mrb[42].mxu0 }
 0x971   : > { %v7108_v9 = vpop.f32.mrb[43].mxu0 }
 0x974   : > { %v7110_v27 = vpop.f32.mrb[44].mxu0 }
 0x975   : > { %v7112_v30 = vpop.f32.mrb[45].mxu0 }
 0x978   : > { %v7114_v20 = vpop.f32.mrb[46].mxu0 }
 0x979   : > { %v7116_v23 = vpop.f32.mrb[47].mxu0 }
 0x97c   : > { %v7118_v7 = vpop.f32.mrb[48].mxu0 }
 0x97d   : > { %v7120_v12 = vpop.f32.mrb[49].mxu0 }
 0x980   : > { %v7122_v62 = vpop.f32.mrb[50].mxu0 }
 0x981   : > { %v7124_v1 = vpop.f32.mrb[51].mxu0 }
 0x984   : > { %v5253_v39 = vpop.f32.mrb[52].mxu0 }
 0x985   : > { %v2039_v14 = vadd.f32 %v5253_v39, %v7129_v51  ;;  %v2030_v17 = vpop.f32.mrb[53].mxu0 }
 0x986   : > { %v2031_v54 = vadd.f32 %v7129_v51, %v2030_v17  ;;  %v5254_v46 = vpop.f32.mrb[54].mxu0 }
 0x987   : > { %v4353_v11 = vmul.f32 -1.442695, %v2039_v14  ;;  %v2042_v47 = vadd.f32 %v5254_v46, %v7129_v51  ;;  %v2033_v52 = vpop.f32.mrb[55].mxu0 }
 0x988   : > { %v4351_v40 = vmul.f32 -1.442695, %v2031_v54  ;;  %v2034_v36 = vadd.f32 %v7129_v51, %v2033_v52 }
 0x989   : > { %6026 = vpow2.f32 %v4353_v11  ;;  %v4354_v28 = vmul.f32 -1.442695, %v2042_v47 }
 0x98a   : > { %6028 = vpow2.f32 %v4351_v40  ;;  %v4352_v25 = vmul.f32 -1.442695, %v2034_v36 }
 0x98b   : > { %6030 = vpow2.f32 %v4354_v28 }
 0x98c   : > { %6032 = vpow2.f32 %v4352_v25  ;;  %v5257_v18 = vpop.f32.mrb[56].mxu0 }
 0x98d   : > { %v2055_v39 = vadd.f32 %v5257_v18, %v7129_v51  ;;  %v2046_v10 = vpop.f32.mrb[57].mxu0 }
 0x98e   : > { %v2047_v17 = vadd.f32 %v7129_v51, %v2046_v10  ;;  %v5258_v59 = vpop.f32.mrb[58].mxu0 }
 0x98f   : > { %v4357_v14 = vmul.f32 -1.442695, %v2055_v39  ;;  %v2058_v46 = vadd.f32 %v5258_v59, %v7129_v51  ;;  %v2049_v6 = vpop.f32.mrb[59].mxu0 }
 0x990   : > { %v4355_v54 = vmul.f32 -1.442695, %v2047_v17  ;;  %v2050_v52 = vadd.f32 %v7129_v51, %v2049_v6 }
 0x991   : > { %6034 = vpow2.f32 %v4357_v14  ;;  %v4358_v47 = vmul.f32 -1.442695, %v2058_v46 }
 0x992   : > { %6036 = vpow2.f32 %v4355_v54  ;;  %v4356_v36 = vmul.f32 -1.442695, %v2050_v52 }
 0x993   : > { %v6027_v28 = vpop.eup %6026  ;;  %6038 = vpow2.f32 %v4358_v47 }
 0x994   : > { %v6029_v25 = vpop.eup %6028  ;;  %v2143_v40 = vadd.f32 1.0, %v6027_v28  ;;  %6040 = vpow2.f32 %v4356_v36  ;;  %v5261_v18 = vpop.f32.mrb[60].mxu0 }
 0x995   : > { %v6031_v11 = vpop.eup %6030  ;;  %v2141_v10 = vadd.f32 1.0, %v6029_v25  ;;  %v2071_v39 = vadd.f32 %v5261_v18, %v7129_v51  ;;  %v2062_v38 = vpop.f32.mrb[61].mxu0 }
 0x996   : > { %v6033_v59 = vpop.eup %6032  ;;  %6042 = vrcp.f32 %v2143_v40  ;;  %v2144_v17 = vadd.f32 1.0, %v6031_v11  ;;  %v2063_v6 = vadd.f32 %v7129_v51, %v2062_v38  ;;  %v5262_v14 = vpop.f32.mrb[62].mxu0 }
 0x997   : > { %6044 = vrcp.f32 %v2141_v10  ;;  %v2142_v46 = vadd.f32 1.0, %v6033_v59  ;;  %v4361_v54 = vmul.f32 -1.442695, %v2071_v39  ;;  %v2074_v52 = vadd.f32 %v5262_v14, %v7129_v51  ;;  %v2065_v47 = vpop.f32.mrb[63].mxu0 }
 0x998   : > { %6046 = vrcp.f32 %v2144_v17  ;;  %v4359_v36 = vmul.f32 -1.442695, %v2063_v6  ;;  %v2066_v28 = vadd.f32 %v7129_v51, %v2065_v47 }
 0x999   : > { %6048 = vrcp.f32 %v2142_v46  ;;  %v4362_v25 = vmul.f32 -1.442695, %v2074_v52 }
 0x99a   : > { %6050 = vpow2.f32 %v4361_v54  ;;  %v4360_v18 = vmul.f32 -1.442695, %v2066_v28 }
 0x99b   : > { %v6035_v35 = vpop.eup %6034  ;;  %6052 = vpow2.f32 %v4359_v36 }
 0x99c   : > { %v6037_v40 = vpop.eup %6036  ;;  %v2147_v11 = vadd.f32 1.0, %v6035_v35  ;;  %6054 = vpow2.f32 %v4362_v25  ;;  %v5265_v38 = vpop.f32.mrb[64].mxu0 }
 0x99d   : > { %v6039_v10 = vpop.eup %6038  ;;  %v2145_v59 = vadd.f32 1.0, %v6037_v40  ;;  %6056 = vpow2.f32 %v4360_v18  ;;  %v2087_v39 = vadd.f32 %v5265_v38, %v7129_v51  ;;  %v2078_v14 = vpop.f32.mrb[65].mxu0 }
 0x99e   : > { %v6041_v17 = vpop.eup %6040  ;;  %6058 = vrcp.f32 %v2147_v11  ;;  %v2148_v6 = vadd.f32 1.0, %v6039_v10  ;;  %v2079_v46 = vadd.f32 %v7129_v51, %v2078_v14  ;;  %v5266_v52 = vpop.f32.mrb[66].mxu0 }
 0x99f   : > { %6060 = vrcp.f32 %v2145_v59  ;;  %v2146_v54 = vadd.f32 1.0, %v6041_v17  ;;  %v4365_v47 = vmul.f32 -1.442695, %v2087_v39  ;;  %v2090_v36 = vadd.f32 %v5266_v52, %v7129_v51  ;;  %v2081_v35 = vpop.f32.mrb[67].mxu0 }
 0x9a0   : > { %v6043_v28 = vpop.eup %6042  ;;  %6062 = vrcp.f32 %v2148_v6  ;;  %v4363_v25 = vmul.f32 -1.442695, %v2079_v46  ;;  %v2082_v18 = vadd.f32 %v7129_v51, %v2081_v35 }
 0x9a1   : > { %v6045_v40 = vpop.eup %6044  ;;  %6064 = vrcp.f32 %v2146_v54  ;;  %v4366_v38 = vmul.f32 -1.442695, %v2090_v36  ;;  %v2191_v11 = vmul.f32 %v6043_v28, %v7100_v49 }
 0x9a2   : > { %v6047_v10 = vpop.eup %6046  ;;  %6066 = vpow2.f32 %v4365_v47  ;;  %v4364_v14 = vmul.f32 -1.442695, %v2082_v18  ;;  %v2189_v59 = vmul.f32 %v6045_v40, %v7096_v16 }
 0x9a3   : > { %v6049_v17 = vpop.eup %6048  ;;  %6068 = vpow2.f32 %v4363_v25  ;;  %v2192_v39 = vmul.f32 %v6047_v10, %v7098_v56  ;;  %v5935_v56 = vld [vmem:[%s7603_s7 + $0x8] sm:$0xff]  }
 0x9a4   : > { %v6051_v52 = vpop.eup %6050  ;;  %6070 = vpow2.f32 %v4366_v38  ;;  %v7150_v6 = vpop.f32.mrb[68].mxu0  ;;  %v2190_v51 = vmul.f32 %v6049_v17, %v7094_v63 }
 0x9a5   : > { %v6053_v46 = vpop.eup %6052  ;;  %v2151_v54 = vadd.f32 1.0, %v6051_v52  ;;  %6072 = vpow2.f32 %v4364_v14  ;;  %v5317_v36 = vpop.f32.mrb[69].mxu0  ;;  %v2206_v49 = vpack.c.bf16 %v2192_v39, %v2191_v11 }
 0x9a6   : > { %v6055_v35 = vpop.eup %6054  ;;  %v2149_v47 = vadd.f32 1.0, %v6053_v46  ;;  %v2554_v28 = vpop.f32.mrb[70].mxu0  ;;  %v2205_v18 = vpack.c.bf16 %v2190_v51, %v2189_v59 }
 0x9a7   : > { %v6057_v16 = vpop.eup %6056  ;;  %6074 = vrcp.f32 %v2151_v54  ;;  %v2152_v25 = vadd.f32 1.0, %v6055_v35  ;;  %v5318_v40 = vpop.f32.mrb[71].mxu0 }
 0x9a8   : > { %v6059_v38 = vpop.eup %6058  ;;  %6076 = vrcp.f32 %v2149_v47  ;;  %v2150_v63 = vadd.f32 1.0, %v6057_v16  ;;  %5271 = vmatprep.mubr.msk.bf16.mxu1 %vm7785_vm12, %v2205_v18  ;;  %vm7807_vm12 = vmmov %vm7798_vm0 }
 0x9a9   : > { %v6061_v10 = vpop.eup %6060  ;;  %6078 = vrcp.f32 %v2152_v25  ;;  %5272 = vmatmul.mubr.msk.bf16.vlgmr.msra.gmra.mrb[48].mxu1 %vm7786_vm15, %v2206_v49  ;;  %v2195_v11 = vmul.f32 %v6059_v38, %v7108_v9  ;;  %vm7809_vm15 = vmmov %vm7798_vm0 }
 0x9aa   : > { %v6063_v14 = vpop.eup %6062  ;;  %6080 = vrcp.f32 %v2150_v63  ;;  %5288 = vmatpush3.bf16.msra.mxu1 %v7091_v13  ;;  %v2193_v59 = vmul.f32 %v6061_v10, %v7104_v0 }
 0x9ab   : > { %v6065_v17 = vpop.eup %6064  ;;  %v2196_v39 = vmul.f32 %v6063_v14, %v7106_v50  ;;  %5289 = vmatprep.subr.bf16.mxu1 %v5935_v56 }
 0x9ac   : > { %v6067_v52 = vpop.eup %6066  ;;  %v2194_v51 = vmul.f32 %v6065_v17, %v7102_v22 }
 0x9ad   : > { %v6069_v46 = vpop.eup %6068  ;;  %v2155_v54 = vadd.f32 1.0, %v6067_v52  ;;  %v2208_v36 = vpack.c.bf16 %v2196_v39, %v2195_v11  ;;  %v7793_v52 = vpack.c.bf16 %v6905_v55, %v6899_v34  ;;  %v7805_v34 = vld [vmem:[#allocation3_spill] sm:$0xff]  ;;  %v7808_v55 = vpack.c.bf16 %v6950_v44, %v6944_v33 }
 0x9ae   : > { %v6071_v35 = vpop.eup %6070  ;;  %v2153_v49 = vadd.f32 1.0, %v6069_v46  ;;  %v2207_v47 = vpack.c.bf16 %v2194_v51, %v2193_v59  ;;  %5290 = vmatpush3.bf16.msra.mxu1 %v5935_v56 }
 0x9af   : > { %v6073_v9 = vpop.eup %6072  ;;  %6082 = vrcp.f32 %v2155_v54  ;;  %v2156_v28 = vadd.f32 1.0, %v6071_v35  ;;  %5723 = vmatprep.subr.bf16.mxu1 %v7777_v4 }
 0x9b0   : > { %6084 = vrcp.f32 %v2153_v49  ;;  %v2154_v0 = vadd.f32 1.0, %v6073_v9  ;;  %5275 = vmatprep.mubr.msk.bf16.mxu1 %vm7787_vm6, %v2207_v47  ;;  %vm7815_vm6 = vmmov %vm7798_vm0  ;;  %v5937_v47 = vld [vmem:[%s7601_s5 + $0x48] sm:$0xff]   ;;  %v5938_v9 = vld [vmem:[%s7601_s5 + $0x50] sm:$0xff]  }
 0x9b1   : > { %v6075_v13 = vpop.eup %6074  ;;  %6086 = vrcp.f32 %v2156_v28  ;;  %5276 = vmatmul.mubr.msk.bf16.gmra.mrb[52].mxu1 %vm7788_vm2, %v2208_v36  ;;  %vm7816_vm2 = vcmask 64512   ;;  %v5939_v28 = vld [vmem:[%s7601_s5 + $0x58] sm:$0xff]  }
 0x9b2   : > { %v6077_v22 = vpop.eup %6076  ;;  %6088 = vrcp.f32 %v2154_v0  ;;  %v2199_v50 = vmul.f32 %v6075_v13, %v7116_v23  ;;  %v7822_v0 = vld [vmem:[#allocation23_spill] sm:$0xff]  ;;  %v7824_v13 = vld [vmem:[#allocation25_spill] sm:$0xff] }
 0x9b3   : > { %v6079_v18 = vpop.eup %6078  ;;  %v2197_v16 = vmul.f32 %v6077_v22, %v7112_v30  ;;  %v7826_v22 = vld [vmem:[#allocation17_spill] sm:$0xff] }
 0x9b4   : > { %v6081_v25 = vpop.eup %6080  ;;  %v2200_v40 = vmul.f32 %v6079_v18, %v7114_v20  ;;  %v7830_v18 = vld [vmem:[#allocation19_spill] sm:$0xff] }
 0x9b5   : > { %v2198_v56 = vmul.f32 %v6081_v25, %v7110_v27  ;;  %v7834_v25 = vld [vmem:[#allocation21_spill] sm:$0xff] }
 0x9b6   : > { %v2210_v38 = vpack.c.bf16 %v2200_v40, %v2199_v50  ;;  %v7828_v50 = vld [vmem:[#allocation18_spill] sm:$0xff] }
 0x9b7   : > { %v2209_v63 = vpack.c.bf16 %v2198_v56, %v2197_v16  ;;  %v7832_v16 = vld [vmem:[#allocation20_spill] sm:$0xff]  ;;  %v7836_v40 = vld [vmem:[#allocation22_spill] sm:$0xff] }
 0x9b8   : > { %v7838_v56 = vld [vmem:[#allocation24_spill] sm:$0xff] }
 0x9b9   : > { %v6083_v10 = vpop.eup %6082  ;;  %5279 = vmatprep.mubr.msk.bf16.mxu1 %vm7789_vm10, %v2209_v63  ;;  %vm7817_vm10 = vmmov %vm7816_vm2  ;;  %v7842_v63 = vld [vmem:[#allocation27_spill] sm:$0xff] }
 0x9ba   : > { %v6085_v11 = vpop.eup %6084  ;;  %5280 = vmatmul.mubr.msk.bf16.gmra.mrb[56].mxu1 %vm7790_vm7, %v2210_v38  ;;  %v2203_v14 = vmul.f32 %v6083_v10, %v7124_v1  ;;  %v7795_v1 = vpack.c.bf16 %v6902_v61, %v6896_v37  ;;  %v7803_v37 = vpack.c.bf16 %v6934_v60, %v6928_v45  ;;  %v7806_v61 = vpack.c.bf16 %v6953_v8, %v6947_v48  ;;  %v7814_v45 = vld [vmem:[#allocation7_spill] sm:$0xff]  ;;  %vm7818_vm7 = vmmov %vm7816_vm2  ;;  %v7840_v38 = vld [vmem:[#allocation26_spill] sm:$0xff] }
 0x9bb   : > { %v6087_v59 = vpop.eup %6086  ;;  %v2201_v23 = vmul.f32 %v6085_v11, %v7120_v12  ;;  %v7801_v12 = vpack.c.bf16 %v6937_v42, %v6931_v58  ;;  %v2557_v58 = vmul.f32 0.17677669, %v7150_v6  ;;  %v5936_v6 = vld [vmem:[%s7601_s5 + $0x40] sm:$0xff]   ;;  %v7844_v10 = vld [vmem:[#allocation28_spill] sm:$0xff]  ;;  %v7846_v11 = vld [vmem:[#allocation29_spill] sm:$0xff] }
 0x9bc   : > { %v6089_v17 = vpop.eup %6088  ;;  %v2204_v30 = vmul.f32 %v6087_v59, %v7122_v62  ;;  %v7797_v62 = vpack.c.bf16 %v6921_v19, %v6915_v43  ;;  %v7811_v43 = vld [vmem:[#allocation5_spill] sm:$0xff]  ;;  %v7813_v19 = vld [vmem:[#allocation8_spill] sm:$0xff]  ;;  %v7850_v59 = vld [vmem:[#allocation31_spill] sm:$0xff] }
 0x9bd   : > { %v2202_v20 = vmul.f32 %v6089_v17, %v7118_v7  ;;  %v7799_v7 = vpack.c.bf16 %v6918_v21, %v6912_v5  ;;  %v7810_v5 = vld [vmem:[#allocation2_spill] sm:$0xff]  ;;  %v7812_v21 = vld [vmem:[#allocation4_spill] sm:$0xff] }
 0x9be   : > { %v2212_v39 = vpack.c.bf16 %v2204_v30, %v2203_v14  ;;  %v7848_v14 = vld [vmem:[#allocation30_spill] sm:$0xff]  ;;  %v5941_v30 = vld [vmem:[%s7603_s7 + $0x28] sm:$0xff]  }
 0x9bf   : > { %v2211_v27 = vpack.c.bf16 %v2202_v20, %v2201_v23  ;;  %v7852_v23 = vld [vmem:[#allocation32_spill] sm:$0xff]  ;;  %v7856_v17 = vld [vmem:[#allocation34_spill] sm:$0xff] }
 0x9c1   : > { %5283 = vmatprep.mubr.msk.bf16.mxu1 %vm7791_vm9, %v2211_v27  ;;  %vm7819_vm9 = vmmov %vm7816_vm2 }
 0x9c2   : > { %5284 = vmatmul.mubr.msk.bf16.gmra.mrb[60].mxu1 %vm7792_vm4, %v2212_v39  ;;  %vm7820_vm4 = vmmov %vm7816_vm2 }
 0x9c3   : > { %5291 = vmatprep.mubr.msk.bf16.mxu1 %vm7794_vm14, %v7793_v52  ;;  %vm7821_vm14 = vmmov %vm7816_vm2 }
 0x9ca   : > { %5292 = vmatmul.mubr.msk.bf16.vlgmr.msra.gmra.mrb[48].mxu1 %vm7796_vm5, %v7795_v1  ;;  %vm7823_vm5 = vmmov %vm7816_vm2 }
 0x9cb   : > { %5726 = vmatpush3.bf16.xpose.msk.msra.mxu1 %vm7744_vm13, %v6453_v32  ;;  %5295 = vmatprep.mubr.msk.bf16.mxu1 %vm7798_vm0, %v7797_v62  ;;  %vm7825_vm0 = vmmov %vm7816_vm2 }
 0x9cc   : > { %5727 = vmatprep.subr.bf16.mxu1 %v7777_v4 }
 0x9d2   : > { %5296 = vmatmul.mubr.msk.bf16.gmra.mrb[52].mxu1 %vm7800_vm11, %v7799_v7  ;;  %vm7827_vm11 = vmmov %vm7825_vm0 }
 0x9d3   : > { %5730 = vmatpush3.bf16.xpose.msk.msra.mxu1 %vm7744_vm13, %v6445_v29  ;;  %5299 = vmatprep.mubr.msk.bf16.mxu1 %vm7802_vm3, %v7801_v12  ;;  %vm7829_vm3 = vmmov %vm7825_vm0 }
 0x9d4   : > { %5731 = vmatprep.subr.bf16.mxu1 %v7777_v4 }
 0x9da   : > { %5300 = vmatmul.mubr.msk.bf16.gmra.mrb[56].mxu1 %vm7804_vm1, %v7803_v37  ;;  %vm7831_vm1 = vmmov %vm7825_vm0 }
 0x9db   : > { %5734 = vmatpush3.bf16.xpose.msk.msra.mxu1 %vm7744_vm13, %v7805_v34  ;;  %5303 = vmatprep.mubr.msk.bf16.mxu1 %vm7807_vm12, %v7806_v61  ;;  %vm7833_vm12 = vmmov %vm7825_vm0 }
 0x9dc   : > { %5735 = vmatprep.subr.bf16.mxu1 %v7777_v4 }
 0x9e2   : > { %5304 = vmatmul.mubr.msk.bf16.gmra.mrb[60].mxu1 %vm7809_vm15, %v7808_v55  ;;  %vm7835_vm15 = vmmov %vm7825_vm0 }
 0x9e3   : > { %5738 = vmatpush3.bf16.xpose.msk.msra.mxu1 %vm7744_vm13, %v7810_v5  ;;  %5351 = vmatprep.mubr.msk.f32.mxu1 %vm7740_vm8, %v7759_v53 }
 0x9e4   : > { %5739 = vmatprep.subr.bf16.mxu1 %v7777_v4 }
 0x9eb   : > { %5742 = vmatpush3.bf16.xpose.msk.msra.mxu1 %vm7744_vm13, %v7811_v43 }
 0x9ec   : > { %5743 = vmatprep.subr.bf16.mxu1 %v7777_v4 }
 0x9f3   : > { %5746 = vmatpush3.bf16.xpose.msk.msra.mxu1 %vm7744_vm13, %v7812_v21 }
 0x9f4   : > { %5747 = vmatprep.subr.bf16.mxu1 %v7777_v4 }
 0x9fb   : > { %5750 = vmatpush3.bf16.xpose.msk.msra.mxu1 %vm7744_vm13, %v7813_v19 }
 0x9fc   : > { %5751 = vmatprep.subr.bf16.mxu1 %v7777_v4 }
 0xa03   : > { %5754 = vmatpush3.bf16.xpose.msk.msra.mxu1 %vm7744_vm13, %v7814_v45 }
 0xa0a   : > { %5352 = vmatmul.mubr.msk.f32.vlgmr.msra.gmra.mrb[64].mxu1 %vm7815_vm6, %v2557_v58  ;;  %vm7837_vm6 = vmmov %vm7825_vm0 }
 0xadd   : > { %v2627_v60 = vpop.f32.mrb[64].mxu1 }
 0xade   : > { %v2628_v42 = vadd.f32 %v2627_v60, %v6537_v41  ;;  %v5353_v33 = vpop.f32.mrb[65].mxu1 }
 0xae0   : > { %2631 = vmax.xlane.f32.xlu1 %v2628_v42 }
 0xb6d   : > { %v2632_v48 = vpop.xlane.xlu1 %2631 }
 0xb6e   : > { %v2633_v44 = vsub.f32 %v2628_v42, %v2632_v48 }
 0xb70   : > { %v2634_v8 = vmul.f32 1.442695, %v2633_v44 }
 0xb72   : > { %6090 = vpow2.f32 %v2634_v8 }
 0xb7c   : > { %v6091_v51 = vpop.eup %6090 }
 0xb7d   : > { %2636 = vadd.xlane.f32.xlu0 %v6091_v51 }
 0xc0a   : > { %v2637_v46 = vpop.xlane.xlu0 %2636 }
 0xc0b   : > { %6092 = vrcp.f32 %v2637_v46 }
 0xc15   : > { %v6093_v54 = vpop.eup %6092 }
 0xc16   : > { %v2639_v36 = vmul.f32 %v6093_v54, %v6091_v51 }
 0xc18   : > { %5387 = vmatmul.mubr.f32.vlgmr.msra.gmra.mrb[72].mxu0 %v2639_v36 }
 0xc19   : > { %5391 = vmatprep.mubr.msk.f32.mxu0 %vm7816_vm2, %v6554_v3  ;;  %vm7839_vm2 = vmmov %vm7825_vm0 }
 0xceb   : > { %v2706_v35 = vpop.f32.mrb[72].mxu0 }
 0xcec   : > { %v5388_v49 = vpop.f32.mrb[73].mxu0  ;;  %5389 = vmatprep.subr.mxu0 %v2706_v35 }
 0xced   : > { %5390 = vmatpush3.msra.mxu0 %v2706_v35 }
 0xcee   : > { %5392 = vmatmul.mubr.msk.f32.vlgmr.msra.gmra.mrb[74].mxu0 %vm7817_vm10, %v6646_v57  ;;  %5415 = vmatprep.subr.bf16.mxu0 %v5936_v6  ;;  %vm7841_vm10 = vmmov %vm7825_vm0 }
 0xcef   : > { %5394 = vmatprep.mubr.msk.f32.mxu0 %vm7818_vm7, %v6666_v2  ;;  %5416 = vmatpush3.bf16.msra.mxu0 %v5936_v6  ;;  %vm7843_vm7 = vcmask 523264  }
 0xcf0   : > { %5417 = vmatprep.subr.bf16.mxu0 %v5937_v47 }
 0xcf2   : > { %5395 = vmatmul.mubr.msk.f32.gmra.mrb[76].mxu0 %vm7819_vm9, %v6677_v15  ;;  %vm7845_vm9 = vmmov %vm7843_vm7 }
 0xcf3   : > { %5397 = vmatprep.mubr.msk.f32.mxu0 %vm7820_vm4, %v6701_v24  ;;  %5418 = vmatpush3.bf16.msra.mxu0 %v5937_v47  ;;  %vm7847_vm4 = vmmov %vm7843_vm7 }
 0xcf4   : > { %5419 = vmatprep.subr.bf16.mxu0 %v5938_v9 }
 0xcf6   : > { %5398 = vmatmul.mubr.msk.f32.gmra.mrb[78].mxu0 %vm7821_vm14, %v6712_v26  ;;  %vm7849_vm14 = vmmov %vm7847_vm4 }
 0xcf7   : > { %5400 = vmatprep.mubr.msk.f32.mxu0 %vm7823_vm5, %v7822_v0  ;;  %5420 = vmatpush3.bf16.msra.mxu0 %v5938_v9  ;;  %vm7851_vm5 = vmmov %vm7847_vm4 }
 0xcf8   : > { %5421 = vmatprep.subr.bf16.mxu0 %v5939_v28 }
 0xcfa   : > { %5401 = vmatmul.mubr.msk.f32.gmra.mrb[80].mxu0 %vm7825_vm0, %v7824_v13  ;;  %vm7853_vm0 = vmmov %vm7847_vm4 }
 0xcfb   : > { %5403 = vmatprep.mubr.msk.f32.mxu0 %vm7827_vm11, %v7826_v22  ;;  %5422 = vmatpush3.bf16.msra.mxu0 %v5939_v28  ;;  %vm7855_vm11 = vmmov %vm7853_vm0 }
 0xcfc   : > { %5779 = vmatprep.subr.bf16.mxu0 %v7777_v4 }
 0xcfe   : > { %5404 = vmatmul.mubr.msk.f32.gmra.mrb[82].mxu0 %vm7829_vm3, %v7828_v50  ;;  %vm7857_vm3 = vmmov %vm7853_vm0 }
 0xcff   : > { %5406 = vmatprep.mubr.msk.f32.mxu0 %vm7831_vm1, %v7830_v18 }
 0xd02   : > { %5407 = vmatmul.mubr.msk.f32.gmra.mrb[84].mxu0 %vm7833_vm12, %v7832_v16 }
 0xd03   : > { %5409 = vmatprep.mubr.msk.f32.mxu0 %vm7835_vm15, %v7834_v25 }
 0xd06   : > { %5410 = vmatmul.mubr.msk.f32.gmra.mrb[86].mxu0 %vm7837_vm6, %v7836_v40 }
 0xd07   : > { %5412 = vmatprep.mubr.msk.f32.mxu0 %vm7839_vm2, %v7838_v56 }
 0xd0a   : > { %5413 = vmatmul.mubr.msk.f32.gmra.mrb[88].mxu0 %vm7841_vm10, %v7840_v38 }
 0xd0b   : > { %5423 = vmatprep.mubr.msk.bf16.mxu0 %vm7843_vm7, %v7842_v63 }
 0xd0e   : > { %5424 = vmatmul.mubr.msk.bf16.vlgmr.msra.gmra.mrb[92].mxu0 %vm7845_vm9, %v7844_v10  ;;  %vm7867_vm9 = vmmov %vm7853_vm0 }
 0xd0f   : > { %5782 = vmatpush3.bf16.xpose.msk.msra.mxu0 %vm7744_vm13, %v6453_v32  ;;  %5427 = vmatprep.mubr.msk.bf16.mxu0 %vm7847_vm4, %v7846_v11  ;;  %v7854_v32 = vld [vmem:[#allocation33_spill] sm:$0xff]  ;;  %vm7877_vm4 = vmmov %vm7853_vm0 }
 0xd10   : > { %5783 = vmatprep.subr.bf16.mxu0 %v7777_v4 }
 0xd16   : > { %5428 = vmatmul.mubr.msk.bf16.gmra.mrb[96].mxu0 %vm7849_vm14, %v7848_v14  ;;  %vm7878_vm14 = vmmov %vm7853_vm0 }
 0xd17   : > { %5786 = vmatpush3.bf16.xpose.msk.msra.mxu0 %vm7744_vm13, %v6445_v29  ;;  %5431 = vmatprep.mubr.msk.bf16.mxu0 %vm7851_vm5, %v7850_v59  ;;  %v5940_v29 = vld [vmem:[%s7603_s7 + $0x20] sm:$0xff]   ;;  %vm7879_vm5 = vmmov %vm7853_vm0 }
 0xd18   : > { %5787 = vmatprep.subr.bf16.mxu0 %v7777_v4  ;;  %5439 = vmatprep.subr.bf16.mxu1 %v5940_v29 }
 0xd19   : > { %5440 = vmatpush3.bf16.msra.mxu1 %v5940_v29 }
 0xd1a   : > { %5441 = vmatprep.subr.bf16.mxu1 %v5941_v30 }
 0xd1d   : > { %5442 = vmatpush3.bf16.msra.mxu1 %v5941_v30 }
 0xd1e   : > { %5432 = vmatmul.mubr.msk.bf16.gmra.mrb[100].mxu0 %vm7853_vm0, %v7852_v23  ;;  %5459 = vmatprep.subr.bf16.mxu1 %v7759_v53 }
 0xd1f   : > { %5790 = vmatpush3.bf16.xpose.msk.msra.mxu0 %vm7744_vm13, %v7805_v34  ;;  %5435 = vmatprep.mubr.msk.bf16.mxu0 %vm7855_vm11, %v7854_v32  ;;  %vm7880_vm11 = vmmov %vm7853_vm0 }
 0xd20   : > { %5791 = vmatprep.subr.bf16.mxu0 %v7777_v4 }
 0xd26   : > { %5436 = vmatmul.mubr.msk.bf16.gmra.mrb[104].mxu0 %vm7857_vm3, %v7856_v17  ;;  %vm7881_vm3 = vmmov %vm7853_vm0 }
 0xd27   : > { %5794 = vmatpush3.bf16.xpose.msk.msra.mxu0 %vm7744_vm13, %v7810_v5  ;;  %5503 = vmatprep.mubr.msk.f32.mxu0 %vm7740_vm8, %v7759_v53 }
 0xd28   : > { %5795 = vmatprep.subr.bf16.mxu0 %v7777_v4 }
 0xd2f   : > { %5798 = vmatpush3.bf16.xpose.msk.msra.mxu0 %vm7744_vm13, %v7811_v43 }
 0xd30   : > { %5799 = vmatprep.subr.bf16.mxu0 %v7777_v4 }
 0xd37   : > { %5802 = vmatpush3.bf16.xpose.msk.msra.mxu0 %vm7744_vm13, %v7812_v21 }
 0xd38   : > { %5803 = vmatprep.subr.bf16.mxu0 %v7777_v4 }
 0xd3f   : > { %5806 = vmatpush3.bf16.xpose.msk.msra.mxu0 %vm7744_vm13, %v7813_v19  ;;  %v7382_v19 = vld [vmem:[%s7602_s6 + $0x2] ss:$0 sm:$0xff] }
 0xd40   : > { %5807 = vmatprep.subr.bf16.mxu0 %v7777_v4 }
 0xd47   : > { %5810 = vmatpush3.bf16.xpose.msk.msra.mxu0 %vm7744_vm13, %v7814_v45  ;;  %vm7858_vm13 = vcmask 261120  }
 0xd48   : > { %vm7859_vm1 = vmmov %vm7858_vm13 }
 0xd49   : > { %vm7860_vm12 = vmmov %vm7859_vm1 }
 0xd4a   : > { %vm7861_vm15 = vmmov %vm7859_vm1 }
 0xd4b   : > { %vm7862_vm6 = vmmov %vm7859_vm1 }
 0xd4c   : > { %vm7863_vm2 = vmmov %vm7859_vm1 }
 0xd4d   : > { %vm7864_vm10 = vmmov %vm7859_vm1 }
 0xd4e   : > { %vm7865_vm7 = vmmov %vm7859_vm1 }
 0xdc1   : > { %v7347_v20 = vpop.f32.mrb[74].mxu0 }
 0xdc2   : > { %v7349_v39 = vpop.f32.mrb[75].mxu0 }
 0xdc5   : > { %v7351_v31 = vpop.f32.mrb[76].mxu0 }
 0xdc6   : > { %v7353_v27 = vpop.f32.mrb[77].mxu0 }
 0xdc9   : > { %v7355_v52 = vpop.f32.mrb[78].mxu0 }
 0xdca   : > { %v7357_v1 = vpop.f32.mrb[79].mxu0 }
 0xdcd   : > { %v7359_v62 = vpop.f32.mrb[80].mxu0 }
 0xdce   : > { %v7361_v7 = vpop.f32.mrb[81].mxu0 }
 0xdd1   : > { %v7363_v12 = vpop.f32.mrb[82].mxu0 }
 0xdd2   : > { %v7365_v37 = vpop.f32.mrb[83].mxu0 }
 0xdd5   : > { %v7367_v34 = vpop.f32.mrb[84].mxu0 }
 0xdd6   : > { %v7369_v61 = vpop.f32.mrb[85].mxu0 }
 0xdd9   : > { %v7371_v55 = vpop.f32.mrb[86].mxu0 }
 0xdda   : > { %v7373_v5 = vpop.f32.mrb[87].mxu0 }
 0xddd   : > { %v7375_v43 = vpop.f32.mrb[88].mxu0 }
 0xdde   : > { %v7377_v21 = vpop.f32.mrb[89].mxu0 }
 0xde1   : > { %v5425_v45 = vpop.f32.mrb[92].mxu0 }
 0xde2   : > { %v2939_v58 = vadd.f32 %v5425_v45, %v7382_v19  ;;  %v2930_v60 = vpop.f32.mrb[93].mxu0 }
 0xde3   : > { %v2931_v42 = vadd.f32 %v7382_v19, %v2930_v60  ;;  %v5426_v33 = vpop.f32.mrb[94].mxu0 }
 0xde4   : > { %v4461_v48 = vmul.f32 -1.442695, %v2939_v58  ;;  %v2942_v44 = vadd.f32 %v5426_v33, %v7382_v19  ;;  %v2933_v8 = vpop.f32.mrb[95].mxu0 }
 0xde5   : > { %v4459_v51 = vmul.f32 -1.442695, %v2931_v42  ;;  %v2934_v46 = vadd.f32 %v7382_v19, %v2933_v8 }
 0xde6   : > { %6094 = vpow2.f32 %v4461_v48  ;;  %v4462_v54 = vmul.f32 -1.442695, %v2942_v44 }
 0xde7   : > { %6096 = vpow2.f32 %v4459_v51  ;;  %v4460_v36 = vmul.f32 -1.442695, %v2934_v46 }
 0xde8   : > { %6098 = vpow2.f32 %v4462_v54 }
 0xde9   : > { %6100 = vpow2.f32 %v4460_v36  ;;  %v5429_v6 = vpop.f32.mrb[96].mxu0 }
 0xdea   : > { %v2955_v35 = vadd.f32 %v5429_v6, %v7382_v19  ;;  %v2946_v49 = vpop.f32.mrb[97].mxu0 }
 0xdeb   : > { %v2947_v47 = vadd.f32 %v7382_v19, %v2946_v49  ;;  %v5430_v9 = vpop.f32.mrb[98].mxu0 }
 0xdec   : > { %v4465_v28 = vmul.f32 -1.442695, %v2955_v35  ;;  %v2958_v63 = vadd.f32 %v5430_v9, %v7382_v19  ;;  %v2949_v10 = vpop.f32.mrb[99].mxu0 }
 0xded   : > { %v4463_v11 = vmul.f32 -1.442695, %v2947_v47  ;;  %v2950_v14 = vadd.f32 %v7382_v19, %v2949_v10 }
 0xdee   : > { %6102 = vpow2.f32 %v4465_v28  ;;  %v4466_v59 = vmul.f32 -1.442695, %v2958_v63 }
 0xdef   : > { %6104 = vpow2.f32 %v4463_v11  ;;  %v4464_v23 = vmul.f32 -1.442695, %v2950_v14 }
 0xdf0   : > { %v6095_v32 = vpop.eup %6094  ;;  %6106 = vpow2.f32 %v4466_v59 }
 0xdf1   : > { %v6097_v17 = vpop.eup %6096  ;;  %v3043_v29 = vadd.f32 1.0, %v6095_v32  ;;  %6108 = vpow2.f32 %v4464_v23  ;;  %v5433_v30 = vpop.f32.mrb[100].mxu0 }
 0xdf2   : > { %v6099_v45 = vpop.eup %6098  ;;  %v3041_v58 = vadd.f32 1.0, %v6097_v17  ;;  %v2971_v60 = vadd.f32 %v5433_v30, %v7382_v19  ;;  %v2962_v42 = vpop.f32.mrb[101].mxu0 }
 0xdf3   : > { %v6101_v33 = vpop.eup %6100  ;;  %6110 = vrcp.f32 %v3043_v29  ;;  %v3044_v48 = vadd.f32 1.0, %v6099_v45  ;;  %v2963_v44 = vadd.f32 %v7382_v19, %v2962_v42  ;;  %v5434_v8 = vpop.f32.mrb[102].mxu0 }
 0xdf4   : > { %6112 = vrcp.f32 %v3041_v58  ;;  %v3042_v51 = vadd.f32 1.0, %v6101_v33  ;;  %v4469_v46 = vmul.f32 -1.442695, %v2971_v60  ;;  %v2974_v54 = vadd.f32 %v5434_v8, %v7382_v19  ;;  %v2965_v36 = vpop.f32.mrb[103].mxu0 }
 0xdf5   : > { %6114 = vrcp.f32 %v3044_v48  ;;  %v4467_v6 = vmul.f32 -1.442695, %v2963_v44  ;;  %v2966_v35 = vadd.f32 %v7382_v19, %v2965_v36 }
 0xdf6   : > { %6116 = vrcp.f32 %v3042_v51  ;;  %v4470_v49 = vmul.f32 -1.442695, %v2974_v54 }
 0xdf7   : > { %6118 = vpow2.f32 %v4469_v46  ;;  %v4468_v47 = vmul.f32 -1.442695, %v2966_v35 }
 0xdf8   : > { %v6103_v9 = vpop.eup %6102  ;;  %6120 = vpow2.f32 %v4467_v6 }
 0xdf9   : > { %v6105_v28 = vpop.eup %6104  ;;  %v3047_v63 = vadd.f32 1.0, %v6103_v9  ;;  %6122 = vpow2.f32 %v4470_v49  ;;  %v5437_v10 = vpop.f32.mrb[104].mxu0 }
 0xdfa   : > { %v6107_v11 = vpop.eup %6106  ;;  %v3045_v14 = vadd.f32 1.0, %v6105_v28  ;;  %6124 = vpow2.f32 %v4468_v47  ;;  %v2987_v59 = vadd.f32 %v5437_v10, %v7382_v19  ;;  %v2978_v23 = vpop.f32.mrb[105].mxu0 }
 0xdfb   : > { %v6109_v32 = vpop.eup %6108  ;;  %6126 = vrcp.f32 %v3047_v63  ;;  %v3048_v17 = vadd.f32 1.0, %v6107_v11  ;;  %v2979_v29 = vadd.f32 %v7382_v19, %v2978_v23  ;;  %v5438_v30 = vpop.f32.mrb[106].mxu0 }
 0xdfc   : > { %6128 = vrcp.f32 %v3045_v14  ;;  %v3046_v45 = vadd.f32 1.0, %v6109_v32  ;;  %v4473_v58 = vmul.f32 -1.442695, %v2987_v59  ;;  %v2990_v60 = vadd.f32 %v5438_v30, %v7382_v19  ;;  %v2981_v42 = vpop.f32.mrb[107].mxu0  ;;  %v5942_v14 = vld [vmem:[%s7598_s2 + $0x60] sm:$0xff]   ;;  %v5943_v30 = vld [vmem:[%s7598_s2 + $0x68] sm:$0xff]  }
 0xdfd   : > { %v6111_v33 = vpop.eup %6110  ;;  %6130 = vrcp.f32 %v3048_v17  ;;  %v4471_v48 = vmul.f32 -1.442695, %v2979_v29  ;;  %v2982_v44 = vadd.f32 %v7382_v19, %v2981_v42 }
 0xdfe   : > { %v6113_v8 = vpop.eup %6112  ;;  %6132 = vrcp.f32 %v3046_v45  ;;  %v4474_v51 = vmul.f32 -1.442695, %v2990_v60  ;;  %v3091_v46 = vmul.f32 %v6111_v33, %v7353_v27 }
 0xdff   : > { %v6115_v54 = vpop.eup %6114  ;;  %6134 = vpow2.f32 %v4473_v58  ;;  %v4472_v36 = vmul.f32 -1.442695, %v2982_v44  ;;  %v3089_v6 = vmul.f32 %v6113_v8, %v7349_v39 }
 0xe00   : > { %v6117_v35 = vpop.eup %6116  ;;  %6136 = vpow2.f32 %v4471_v48  ;;  %v3092_v49 = vmul.f32 %v6115_v54, %v7351_v31 }
 0xe01   : > { %v6119_v47 = vpop.eup %6118  ;;  %6138 = vpow2.f32 %v4474_v51  ;;  %v3090_v9 = vmul.f32 %v6117_v35, %v7347_v20  ;;  %v5945_v35 = vld [vmem:[%s7598_s2 + $0x78] sm:$0xff]  }
 0xe02   : > { %v6121_v28 = vpop.eup %6120  ;;  %v3051_v19 = vadd.f32 1.0, %v6119_v47  ;;  %6140 = vpow2.f32 %v4472_v36  ;;  %v3106_v63 = vpack.c.bf16 %v3092_v49, %v3091_v46 }
 0xe03   : > { %v6123_v10 = vpop.eup %6122  ;;  %v3049_v11 = vadd.f32 1.0, %v6121_v28  ;;  %v3105_v27 = vpack.c.bf16 %v3090_v9, %v3089_v6 }
 0xe04   : > { %v6125_v39 = vpop.eup %6124  ;;  %6142 = vrcp.f32 %v3051_v19  ;;  %v3052_v59 = vadd.f32 1.0, %v6123_v10 }
 0xe05   : > { %v6127_v23 = vpop.eup %6126  ;;  %6144 = vrcp.f32 %v3049_v11  ;;  %v3050_v31 = vadd.f32 1.0, %v6125_v39  ;;  %5443 = vmatprep.mubr.msk.bf16.mxu1 %vm7858_vm13, %v3105_v27  ;;  %vm7882_vm13 = vmmov %vm7853_vm0 }
 0xe06   : > { %v6129_v20 = vpop.eup %6128  ;;  %6146 = vrcp.f32 %v3052_v59  ;;  %5444 = vmatmul.mubr.msk.bf16.vlgmr.msra.gmra.mrb[48].mxu1 %vm7859_vm1, %v3106_v63  ;;  %v3095_v32 = vmul.f32 %v6127_v23, %v7361_v7 }
 0xe07   : > { %v6131_v17 = vpop.eup %6130  ;;  %6148 = vrcp.f32 %v3050_v31  ;;  %5460 = vmatpush3.bf16.msra.mxu1 %v5942_v14  ;;  %v3093_v29 = vmul.f32 %v6129_v20, %v7357_v1  ;;  %v5944_v1 = vld [vmem:[%s7598_s2 + $0x70] sm:$0xff]   ;;  %v7866_v31 = vld [vmem:[#allocation6_spill] sm:$0xff] }
 0xe08   : > { %v6133_v45 = vpop.eup %6132  ;;  %v3096_v58 = vmul.f32 %v6131_v17, %v7359_v62  ;;  %5461 = vmatprep.subr.bf16.mxu1 %v7759_v53  ;;  %v7872_v20 = vld [vmem:[#allocation14_spill] sm:$0xff]  ;;  %v7875_v17 = vld [vmem:[#allocation15_spill] sm:$0xff] }
 0xe09   : > { %v6135_v60 = vpop.eup %6134  ;;  %v3094_v42 = vmul.f32 %v6133_v45, %v7355_v52 }
 0xe0a   : > { %v6137_v33 = vpop.eup %6136  ;;  %v3055_v48 = vadd.f32 1.0, %v6135_v60  ;;  %v3108_v7 = vpack.c.bf16 %v3096_v58, %v3095_v32  ;;  %v7874_v32 = vld [vmem:[#allocation16_spill] sm:$0xff] }
 0xe0b   : > { %v6139_v44 = vpop.eup %6138  ;;  %v3053_v8 = vadd.f32 1.0, %v6137_v33  ;;  %v3107_v51 = vpack.c.bf16 %v3094_v42, %v3093_v29  ;;  %5462 = vmatpush3.bf16.msra.mxu1 %v5943_v30  ;;  %v6234_v42 = vld [vmem:[%s6332_s25] sm:$0xff]  }
 0xe0c   : > { %v6141_v46 = vpop.eup %6140  ;;  %6150 = vrcp.f32 %v3055_v48  ;;  %v3056_v54 = vadd.f32 1.0, %v6139_v44  ;;  %5463 = vmatprep.subr.bf16.mxu1 %v7759_v53 }
 0xe0d   : > { %6152 = vrcp.f32 %v3053_v8  ;;  %v3054_v62 = vadd.f32 1.0, %v6141_v46  ;;  %5447 = vmatprep.mubr.msk.bf16.mxu1 %vm7860_vm12, %v3107_v51  ;;  %v5947_v46 = vld [vmem:[%s7601_s5 + $0x68] sm:$0xff]   ;;  %vm7884_vm12 = vcmask 64512  }
 0xe0e   : > { %v6143_v52 = vpop.eup %6142  ;;  %6154 = vrcp.f32 %v3056_v54  ;;  %5448 = vmatmul.mubr.msk.bf16.gmra.mrb[52].mxu1 %vm7861_vm15, %v3108_v7  ;;  %v5949_v54 = vld [vmem:[%s7601_s5 + $0x78] sm:$0xff]   ;;  %vm7885_vm15 = vmmov %vm7884_vm12 }
 0xe0f   : > { %v6145_v36 = vpop.eup %6144  ;;  %6156 = vrcp.f32 %v3054_v62  ;;  %v3099_v6 = vmul.f32 %v6143_v52, %v7369_v61  ;;  %5464 = vmatpush3.bf16.msra.mxu1 %v5944_v1  ;;  %v5946_v1 = vld [vmem:[%s7601_s5 + $0x60] sm:$0xff]   ;;  %v6235_v62 = vld [vmem:[%s6332_s25 + $0x8] sm:$0xff]   ;;  %v6236_v52 = vld [vmem:[%s6332_s25 + $0x10] sm:$0xff]  }
 0xe10   : > { %v6147_v49 = vpop.eup %6146  ;;  %v3097_v47 = vmul.f32 %v6145_v36, %v7365_v37  ;;  %5465 = vmatprep.subr.bf16.mxu1 %v7759_v53  ;;  %5567 = vmatprep.subr.bf16.mxu0 %v5946_v1  ;;  %v6237_v36 = vld [vmem:[%s6332_s25 + $0x18] sm:$0xff]  }
 0xe11   : > { %v6149_v9 = vpop.eup %6148  ;;  %v3100_v28 = vmul.f32 %v6147_v49, %v7367_v34  ;;  %v6240_v49 = vld [vmem:[%s6332_s25 + $0x30] sm:$0xff]  }
 0xe12   : > { %v3098_v19 = vmul.f32 %v6149_v9, %v7363_v12 }
 0xe13   : > { %v3110_v63 = vpack.c.bf16 %v3100_v28, %v3099_v6  ;;  %5466 = vmatpush3.bf16.msra.mxu1 %v5945_v35  ;;  %v6238_v6 = vld [vmem:[%s6332_s25 + $0x20] sm:$0xff]   ;;  %v6239_v35 = vld [vmem:[%s6332_s25 + $0x28] sm:$0xff]  }
 0xe14   : > { %v3109_v10 = vpack.c.bf16 %v3098_v19, %v3097_v47  ;;  %5811 = vmatprep.subr.bf16.mxu1 %v7777_v4  ;;  %v6241_v47 = vld [vmem:[%s6332_s25 + $0x38] sm:$0xff]  }
 0xe16   : > { %v6151_v61 = vpop.eup %6150  ;;  %5451 = vmatprep.mubr.msk.bf16.mxu1 %vm7862_vm6, %v3109_v10  ;;  %vm7886_vm6 = vmmov %vm7884_vm12 }
 0xe17   : > { %v6153_v11 = vpop.eup %6152  ;;  %5452 = vmatmul.mubr.msk.bf16.gmra.mrb[56].mxu1 %vm7863_vm2, %v3110_v63  ;;  %v3103_v37 = vmul.f32 %v6151_v61, %v7377_v21  ;;  %v7868_v21 = vld [vmem:[#allocation10_spill] sm:$0xff]  ;;  %vm7887_vm2 = vmmov %vm7886_vm6 }
 0xe18   : > { %v6155_v27 = vpop.eup %6154  ;;  %v3101_v14 = vmul.f32 %v6153_v11, %v7373_v5  ;;  %v7870_v5 = vld [vmem:[#allocation12_spill] sm:$0xff] }
 0xe19   : > { %v6157_v39 = vpop.eup %6156  ;;  %v3104_v34 = vmul.f32 %v6155_v27, %v7375_v43  ;;  %v7871_v43 = vld [vmem:[#allocation11_spill] sm:$0xff] }
 0xe1a   : > { %v3102_v12 = vmul.f32 %v6157_v39, %v7371_v55  ;;  %v7869_v55 = vld [vmem:[#allocation9_spill] sm:$0xff] }
 0xe1b   : > { %v3112_v59 = vpack.c.bf16 %v3104_v34, %v3103_v37 }
 0xe1c   : > { %v3111_v23 = vpack.c.bf16 %v3102_v12, %v3101_v14 }
 0xe1e   : > { %5455 = vmatprep.mubr.msk.bf16.mxu1 %vm7864_vm10, %v3111_v23  ;;  %vm7888_vm10 = vmmov %vm7887_vm2 }
 0xe1f   : > { %5456 = vmatmul.mubr.msk.bf16.gmra.mrb[60].mxu1 %vm7865_vm7, %v3112_v59  ;;  %vm7889_vm7 = vmmov %vm7887_vm2 }
 0xe20   : > { %5467 = vmatprep.mubr.msk.bf16.mxu1 %vm7740_vm8, %v7759_v53 }
 0xe27   : > { %5468 = vmatmul.mubr.msk.bf16.vlgmr.msra.gmra.mrb[68].mxu1 %vm7867_vm9, %v7866_v31  ;;  %vm7890_vm9 = vmmov %vm7887_vm2 }
 0xe28   : > { %5813 = vmatpush3.bf16.msra.mxu1 %v7868_v21  ;;  %5538 = vmatprep.mubr.msk.f32.mxu1 %vm7740_vm8, %v7759_v53  ;;  %v7873_v53 = vld [vmem:[#allocation13_spill] sm:$0xff]  ;;  %vm7876_vm8 = vmmov %vm7859_vm1 }
 0xe29   : > { %5814 = vmatprep.subr.bf16.mxu1 %v7777_v4  ;;  %vm7883_vm1 = vmmov %vm7853_vm0 }
 0xe2c   : > { %5816 = vmatpush3.bf16.msra.mxu1 %v7869_v55 }
 0xe2d   : > { %5817 = vmatprep.subr.bf16.mxu1 %v7777_v4 }
 0xe30   : > { %5819 = vmatpush3.bf16.msra.mxu1 %v7870_v5 }
 0xe31   : > { %5820 = vmatprep.subr.bf16.mxu1 %v7777_v4 }
 0xe34   : > { %5822 = vmatpush3.bf16.msra.mxu1 %v7871_v43 }
 0xe35   : > { %5823 = vmatprep.subr.bf16.mxu1 %v7777_v4 }
 0xe38   : > { %5825 = vmatpush3.bf16.msra.mxu1 %v7872_v20 }
 0xe39   : > { %5826 = vmatprep.subr.bf16.mxu1 %v7777_v4 }
 0xe3c   : > { %5828 = vmatpush3.bf16.msra.mxu1 %v7873_v53  ;;  %v5951_v53 = vld [vmem:[%s7603_s7 + $0x38] sm:$0xff]  }
 0xe3d   : > { %5829 = vmatprep.subr.bf16.mxu1 %v7777_v4 }
 0xe40   : > { %5831 = vmatpush3.bf16.msra.mxu1 %v7874_v32 }
 0xe41   : > { %5832 = vmatprep.subr.bf16.mxu1 %v7777_v4 }
 0xe44   : > { %5834 = vmatpush3.bf16.msra.mxu1 %v7875_v17 }
 0xefa   : > { %v3334_v29 = vpop.f32.mrb[68].mxu1 }
 0xefb   : > { %v3340_v30 = vmul.f32 0.17677669, %v3334_v29  ;;  %v5469_v45 = vpop.f32.mrb[69].mxu1 }
 0xefc   : > { %v3337_v58 = vpop.f32.mrb[70].mxu1 }
 0xefd   : > { %v5470_v60 = vpop.f32.mrb[71].mxu1  ;;  %5504 = vmatmul.mubr.msk.f32.vlgmr.msra.gmra.mrb[90].mxu0 %vm7876_vm8, %v3340_v30  ;;  %vm7891_vm8 = vmmov %vm7887_vm2 }
 0xefe   : > { %5575 = vmatprep.mubr.msk.bf16.mxu0 %vm7877_vm4, %v6234_v42  ;;  %5568 = vmatpush3.bf16.msra.mxu0 %v5946_v1  ;;  %vm7892_vm4 = vmmov %vm7887_vm2 }
 0xeff   : > { %5569 = vmatprep.subr.bf16.mxu0 %v5947_v46 }
 0xf02   : > { %5570 = vmatpush3.bf16.msra.mxu0 %v5947_v46 }
 0xfd0   : > { %v3410_v33 = vpop.f32.mrb[90].mxu0 }
 0xfd1   : > { %v3411_v48 = vadd.f32 %v3410_v33, %v6537_v41  ;;  %v5505_v7 = vpop.f32.mrb[91].mxu0  ;;  %v5948_v41 = vld [vmem:[%s7601_s5 + $0x70] sm:$0xff]  }
 0xfd2   : > { %5571 = vmatprep.subr.bf16.mxu0 %v5948_v41 }
 0xfd3   : > { %3414 = vmax.xlane.f32.xlu1 %v3411_v48  ;;  %5572 = vmatpush3.bf16.msra.mxu0 %v5948_v41 }
 0xfd4   : > { %5573 = vmatprep.subr.bf16.mxu0 %v5949_v54 }
 0xfd7   : > { %5574 = vmatpush3.bf16.msra.mxu0 %v5949_v54 }
 0xfda   : > { %5576 = vmatmul.mubr.msk.bf16.vlgmr.msra.gmra.mrb[108].mxu0 %vm7878_vm14, %v6235_v62  ;;  %vm7893_vm14 = vmmov %vm7887_vm2 }
 0xfdb   : > { %5579 = vmatprep.mubr.msk.bf16.mxu0 %vm7879_vm5, %v6236_v52  ;;  %vm7894_vm5 = vmmov %vm7887_vm2 }
 0xfe2   : > { %5580 = vmatmul.mubr.msk.bf16.gmra.mrb[112].mxu0 %vm7853_vm0, %v6237_v36  ;;  %vm7895_vm0 = vmmov %vm7887_vm2 }
 0xfe3   : > { %5583 = vmatprep.mubr.msk.bf16.mxu0 %vm7880_vm11, %v6238_v6  ;;  %vm7896_vm11 = vmmov %vm7895_vm0 }
 0xfea   : > { %5584 = vmatmul.mubr.msk.bf16.gmra.mrb[116].mxu0 %vm7881_vm3, %v6239_v35  ;;  %vm7897_vm3 = vmmov %vm7895_vm0 }
 0xfeb   : > { %5587 = vmatprep.mubr.msk.bf16.mxu0 %vm7882_vm13, %v6240_v49  ;;  %vm7898_vm13 = vmmov %vm7895_vm0 }
 0xff2   : > { %5588 = vmatmul.mubr.msk.bf16.gmra.mrb[120].mxu0 %vm7883_vm1, %v6241_v47  ;;  %vm7899_vm1 = vmmov %vm7895_vm0 }
0x1060   : > { %v3415_v44 = vpop.xlane.xlu1 %3414 }
0x1061   : > { %v3416_v8 = vsub.f32 %v3411_v48, %v3415_v44 }
0x1063   : > { %v3417_v4 = vmul.f32 1.442695, %v3416_v8 }
0x1065   : > { %6158 = vpow2.f32 %v3417_v4 }
0x106f   : > { %v6159_v51 = vpop.eup %6158 }
0x1070   : > { %3419 = vadd.xlane.f32.xlu0 %v6159_v51 }
0x10ad   : > { %v5577_v63 = vpop.f32.mrb[108].mxu0 }
0x10ae   : > { %v3713_v10 = vpop.f32.mrb[109].mxu0 }
0x10af   : > { %v5578_v61 = vpop.f32.mrb[110].mxu0 }
0x10b0   : > { %v3716_v11 = vpop.f32.mrb[111].mxu0 }
0x10b5   : > { %v5581_v37 = vpop.f32.mrb[112].mxu0 }
0x10b6   : > { %v3729_v27 = vpop.f32.mrb[113].mxu0 }
0x10b7   : > { %v5582_v14 = vpop.f32.mrb[114].mxu0 }
0x10b8   : > { %v3732_v39 = vpop.f32.mrb[115].mxu0 }
0x10bd   : > { %v5585_v34 = vpop.f32.mrb[116].mxu0 }
0x10be   : > { %v3745_v12 = vpop.f32.mrb[117].mxu0 }
0x10bf   : > { %v5586_v59 = vpop.f32.mrb[118].mxu0 }
0x10c0   : > { %v3748_v23 = vpop.f32.mrb[119].mxu0 }
0x10c5   : > { %v7493_v31 = vpop.f32.mrb[120].mxu0 }
0x10c6   : > { %v7495_v21 = vpop.f32.mrb[121].mxu0 }
0x10c7   : > { %v7497_v55 = vpop.f32.mrb[122].mxu0 }
0x10c8   : > { %v7499_v5 = vpop.f32.mrb[123].mxu0 }
0x10fd   : > { %v3420_v9 = vpop.xlane.xlu0 %3419 }
0x10fe   : > { %6160 = vrcp.f32 %v3420_v9 }
0x1108   : > { %v6161_v28 = vpop.eup %6160 }
0x1109   : > { %v3422_v19 = vmul.f32 %v6161_v28, %v6159_v51 }
0x110b   : > { %5539 = vmatmul.mubr.f32.vlgmr.msra.gmra.mrb[66].mxu1 %v3422_v19 }
0x110c   : > { %5543 = vmatprep.mubr.msk.f32.mxu1 %vm7884_vm12, %v6554_v3  ;;  %v5950_v3 = vld [vmem:[%s7603_s7 + $0x30] sm:$0xff]   ;;  %vm7900_vm12 = vcmask 261120  }
0x11de   : > { %v3489_v43 = vpop.f32.mrb[66].mxu1 }
0x11df   : > { %v5540_v20 = vpop.f32.mrb[67].mxu1  ;;  %5541 = vmatprep.subr.mxu1 %v3489_v43 }
0x11e0   : > { %5542 = vmatpush3.msra.mxu1 %v3489_v43 }
0x11e1   : > { %5544 = vmatmul.mubr.msk.f32.vlgmr.msra.gmra.mrb[72].mxu1 %vm7885_vm15, %v6646_v57  ;;  %5591 = vmatprep.subr.bf16.mxu1 %v5950_v3  ;;  %v4544_v57 = vld [vmem:[%s7602_s6 + $0x3] ss:$0 sm:$0xff]  ;;  %vm7901_vm15 = vmmov %vm7900_vm12 }
0x11e2   : > { %5546 = vmatprep.mubr.msk.f32.mxu1 %vm7886_vm6, %v6666_v2  ;;  %5592 = vmatpush3.bf16.msra.mxu1 %v5950_v3  ;;  %v3717_v2 = vadd.f32 %v4544_v57, %v3716_v11  ;;  %v3746_v32 = vadd.f32 %v4544_v57, %v3745_v12  ;;  %v3749_v17 = vadd.f32 %v4544_v57, %v3748_v23  ;;  %vm7902_vm6 = vmmov %vm7900_vm12 }
0x11e3   : > { %5593 = vmatprep.subr.bf16.mxu1 %v5951_v53  ;;  %v3754_v60 = vadd.f32 %v5585_v34, %v4544_v57  ;;  %v3757_v33 = vadd.f32 %v5586_v59, %v4544_v57  ;;  %v3765_v41 = vadd.f32 %v4544_v57, %v7499_v5  ;;  %v3762_v62 = vadd.f32 %v4544_v57, %v7495_v21 }
0x11e4   : > { %v4565_v42 = vmul.f32 -1.442695, %v3746_v32  ;;  %v4566_v48 = vmul.f32 -1.442695, %v3749_v17  ;;  %v3770_v49 = vadd.f32 %v7493_v31, %v4544_v57  ;;  %v3773_v28 = vadd.f32 %v7497_v55, %v4544_v57 }
0x11e5   : > { %5547 = vmatmul.mubr.msk.f32.gmra.mrb[74].mxu1 %vm7887_vm2, %v6677_v15  ;;  %v3714_v15 = vadd.f32 %v4544_v57, %v3713_v10  ;;  %v4567_v51 = vmul.f32 -1.442695, %v3754_v60  ;;  %v4568_v46 = vmul.f32 -1.442695, %v3757_v33  ;;  %v4570_v35 = vmul.f32 -1.442695, %v3765_v41  ;;  %vm7903_vm2 = vmmov %vm7902_vm6 }
0x11e6   : > { %5549 = vmatprep.mubr.msk.f32.mxu1 %vm7888_vm10, %v6701_v24  ;;  %5594 = vmatpush3.bf16.msra.mxu1 %v5951_v53  ;;  %v3722_v24 = vadd.f32 %v5577_v63, %v4544_v57  ;;  %v4569_v47 = vmul.f32 -1.442695, %v3762_v62  ;;  %vm7904_vm10 = vmmov %vm7903_vm2 }
0x11e9   : > { %5550 = vmatmul.mubr.msk.f32.gmra.mrb[76].mxu1 %vm7889_vm7, %v6712_v26  ;;  %v4558_v26 = vmul.f32 -1.442695, %v3717_v2  ;;  %vm7905_vm7 = vmmov %vm7903_vm2 }
0x11ea   : > { %5552 = vmatprep.mubr.msk.f32.mxu1 %vm7890_vm9, %v7822_v0  ;;  %v4557_v0 = vmul.f32 -1.442695, %v3714_v15  ;;  %vm7906_vm9 = vmmov %vm7903_vm2 }
0x11eb   : > { %6162 = vpow2.f32 %v4558_v26 }
0x11ec   : > { %6164 = vpow2.f32 %v4557_v0 }
0x11ed   : > { %5553 = vmatmul.mubr.msk.f32.gmra.mrb[78].mxu1 %vm7891_vm8, %v7824_v13  ;;  %v3725_v13 = vadd.f32 %v5578_v61, %v4544_v57  ;;  %v4571_v61 = vmul.f32 -1.442695, %v3770_v49  ;;  %vm7907_vm8 = vmmov %vm7903_vm2 }
0x11ee   : > { %5555 = vmatprep.mubr.msk.f32.mxu1 %vm7892_vm4, %v7826_v22  ;;  %v3733_v22 = vadd.f32 %v4544_v57, %v3732_v39  ;;  %vm7908_vm4 = vcmask 523264  }
0x11f1   : > { %5556 = vmatmul.mubr.msk.f32.gmra.mrb[80].mxu1 %vm7893_vm14, %v7828_v50  ;;  %v4559_v50 = vmul.f32 -1.442695, %v3722_v24  ;;  %vm7909_vm14 = vmmov %vm7908_vm4 }
0x11f2   : > { %5558 = vmatprep.mubr.msk.f32.mxu1 %vm7894_vm5, %v7830_v18  ;;  %v4560_v18 = vmul.f32 -1.442695, %v3725_v13  ;;  %vm7910_vm5 = vmmov %vm7908_vm4 }
0x11f3   : > { %6166 = vpow2.f32 %v4559_v50 }
0x11f4   : > { %6168 = vpow2.f32 %v4560_v18 }
0x11f5   : > { %5559 = vmatmul.mubr.msk.f32.gmra.mrb[82].mxu1 %vm7895_vm0, %v7832_v16  ;;  %v3730_v16 = vadd.f32 %v4544_v57, %v3729_v27  ;;  %v6163_v30 = vpop.eup %6162  ;;  %vm7911_vm0 = vmmov %vm7908_vm4 }
0x11f6   : > { %5561 = vmatprep.mubr.msk.f32.mxu1 %vm7896_vm11, %v7834_v25  ;;  %v4562_v25 = vmul.f32 -1.442695, %v3733_v22  ;;  %v6165_v58 = vpop.eup %6164  ;;  %v3825_v7 = vadd.f32 1.0, %v6163_v30  ;;  %vm7912_vm11 = vmmov %vm7911_vm0 }
0x11f7   : > { %v3824_v8 = vadd.f32 1.0, %v6165_v58 }
0x11f8   : > { %6170 = vpow2.f32 %v4562_v25 }
0x11f9   : > { %5562 = vmatmul.mubr.msk.f32.gmra.mrb[84].mxu1 %vm7897_vm3, %v7836_v40  ;;  %v3738_v40 = vadd.f32 %v5581_v37, %v4544_v57  ;;  %v4572_v37 = vmul.f32 -1.442695, %v3773_v28  ;;  %vm7913_vm3 = vmmov %vm7911_vm0 }
0x11fa   : > { %5564 = vmatprep.mubr.msk.f32.mxu1 %vm7898_vm13, %v7838_v56  ;;  %v4561_v56 = vmul.f32 -1.442695, %v3730_v16  ;;  %vm7914_vm13 = vmmov %vm7911_vm0 }
0x11fb   : > { %v4563_v29 = vmul.f32 -1.442695, %v3738_v40 }
0x11fc   : > { %6172 = vpow2.f32 %v4561_v56 }
0x11fd   : > { %5565 = vmatmul.mubr.msk.f32.gmra.mrb[86].mxu1 %vm7899_vm1, %v7840_v38  ;;  %v3741_v38 = vadd.f32 %v5582_v14, %v4544_v57  ;;  %6174 = vpow2.f32 %v4563_v29  ;;  %v6167_v44 = vpop.eup %6166  ;;  %vm7915_vm1 = vmmov %vm7911_vm0 }
0x11fe   : > { %v6169_v4 = vpop.eup %6168  ;;  %v3826_v54 = vadd.f32 1.0, %v6167_v44 }
0x11ff   : > { %v4564_v45 = vmul.f32 -1.442695, %v3741_v38  ;;  %v3827_v52 = vadd.f32 1.0, %v6169_v4 }
0x1201   : > { %6176 = vpow2.f32 %v4564_v45 }
0x1202   : > { %6178 = vpow2.f32 %v4565_v42  ;;  %v6171_v1 = vpop.eup %6170 }
0x1203   : > { %6180 = vpow2.f32 %v4566_v48  ;;  %v3829_v6 = vadd.f32 1.0, %v6171_v1 }
0x1204   : > { %6182 = vrcp.f32 %v3825_v7 }
0x1205   : > { %6184 = vrcp.f32 %v3824_v8 }
0x1206   : > { %v6173_v36 = vpop.eup %6172  ;;  %6186 = vpow2.f32 %v4567_v51 }
0x1207   : > { %6188 = vpow2.f32 %v4568_v46  ;;  %v3828_v9 = vadd.f32 1.0, %v6173_v36  ;;  %v6175_v19 = vpop.eup %6174 }
0x1208   : > { %6190 = vrcp.f32 %v3826_v54  ;;  %v3830_v34 = vadd.f32 1.0, %v6175_v19 }
0x1209   : > { %6192 = vrcp.f32 %v3827_v52 }
0x120a   : > { %6194 = vrcp.f32 %v3829_v6 }
0x120b   : > { %v6177_v63 = vpop.eup %6176  ;;  %6196 = vpow2.f32 %v4570_v35 }
0x120c   : > { %v6179_v10 = vpop.eup %6178  ;;  %6198 = vpow2.f32 %v4569_v47  ;;  %v3831_v14 = vadd.f32 1.0, %v6177_v63 }
0x120d   : > { %v6181_v11 = vpop.eup %6180  ;;  %6200 = vrcp.f32 %v3828_v9  ;;  %v3832_v21 = vadd.f32 1.0, %v6179_v10 }
0x120e   : > { %v6183_v27 = vpop.eup %6182  ;;  %v3833_v59 = vadd.f32 1.0, %v6181_v11  ;;  %6202 = vpow2.f32 %v4571_v61 }
0x120f   : > { %v6185_v39 = vpop.eup %6184  ;;  %6204 = vpow2.f32 %v4572_v37 }
0x1210   : > { %v6187_v12 = vpop.eup %6186  ;;  %6206 = vrcp.f32 %v3831_v14 }
0x1211   : > { %v6189_v31 = vpop.eup %6188  ;;  %6208 = vrcp.f32 %v3830_v34  ;;  %v3834_v18 = vadd.f32 1.0, %v6187_v12 }
0x1212   : > { %v6191_v3 = vpop.eup %6190  ;;  %6210 = vrcp.f32 %v3833_v59  ;;  %v3835_v13 = vadd.f32 1.0, %v6189_v31 }
0x1213   : > { %v6193_v20 = vpop.eup %6192  ;;  %6212 = vrcp.f32 %v3832_v21  ;;  %v4587_v21 = vld [vmem:[%s7604_s8] ss:$0 sm:$0xff] }
0x1214   : > { %v6195_v53 = vpop.eup %6194  ;;  %6214 = vrcp.f32 %v3835_v13 }
0x1215   : > { %v6197_v15 = vpop.eup %6196  ;;  %6216 = vrcp.f32 %v3834_v18 }
0x1216   : > { %v6199_v0 = vpop.eup %6198  ;;  %v3837_v16 = vadd.f32 1.0, %v6197_v15 }
0x1217   : > { %v6201_v50 = vpop.eup %6200  ;;  %v3836_v56 = vadd.f32 1.0, %v6199_v0 }
0x1218   : > { %v6203_v17 = vpop.eup %6202  ;;  %6218 = vrcp.f32 %v3837_v16 }
0x1219   : > { %v6205_v30 = vpop.eup %6204  ;;  %6220 = vrcp.f32 %v3836_v56  ;;  %v3838_v51 = vadd.f32 1.0, %v6203_v17 }
0x121a   : > { %v6207_v45 = vpop.eup %6206  ;;  %v3839_v44 = vadd.f32 1.0, %v6205_v30 }
0x121b   : > { %v6209_v42 = vpop.eup %6208 }
0x121c   : > { %v6211_v7 = vpop.eup %6210  ;;  %6222 = vrcp.f32 %v3839_v44 }
0x121d   : > { %v6213_v4 = vpop.eup %6212  ;;  %6224 = vrcp.f32 %v3838_v51 }
0x121e   : > { %v6215_v52 = vpop.eup %6214 }
0x121f   : > { %v6217_v35 = vpop.eup %6216 }
0x1222   : > { %v6219_v9 = vpop.eup %6218 }
0x1223   : > { %v6221_v19 = vpop.eup %6220 }
0x12b4   : > { %v5545_v23 = vpop.f32.mrb[72].mxu1 }
0x12b5   : > { %v3873_v55 = vmul.f32 %v6183_v27, %v5545_v23  ;;  %v3559_v5 = vpop.f32.mrb[73].mxu1  ;;  %v6223_v27 = vpop.eup %6222 }
0x12b6   : > { %v3872_v43 = vmul.f32 %v6185_v39, %v3559_v5  ;;  %v6225_v34 = vpop.eup %6224 }
0x12b8   : > { %v3888_v57 = vpack.c.bf16 %v3873_v55, %v3872_v43  ;;  %v5548_v2 = vpop.f32.mrb[74].mxu1 }
0x12b9   : > { %v3875_v24 = vmul.f32 %v6193_v20, %v5548_v2  ;;  %v3569_v26 = vpop.f32.mrb[75].mxu1 }
0x12ba   : > { %v3874_v22 = vmul.f32 %v6191_v3, %v3569_v26  ;;  %5595 = vmatprep.mubr.msk.bf16.mxu1 %vm7900_vm12, %v3888_v57  ;;  %vm7916_vm12 = vmmov %vm7911_vm0 }
0x12bc   : > { %v3889_v25 = vpack.c.bf16 %v3875_v24, %v3874_v22  ;;  %v5551_v40 = vpop.f32.mrb[76].mxu1 }
0x12bd   : > { %v3877_v38 = vmul.f32 %v6195_v53, %v5551_v40  ;;  %v3579_v32 = vpop.f32.mrb[77].mxu1 }
0x12be   : > { %5596 = vmatmul.mubr.msk.bf16.vlgmr.msra.gmra.mrb[48].mxu1 %vm7901_vm15, %v3889_v25  ;;  %v3876_v29 = vmul.f32 %v6201_v50, %v3579_v32  ;;  %vm7917_vm15 = vmmov %vm7911_vm0 }
0x12c0   : > { %v3890_v58 = vpack.c.bf16 %v3877_v38, %v3876_v29  ;;  %v5554_v60 = vpop.f32.mrb[78].mxu1 }
0x12c1   : > { %v3879_v33 = vmul.f32 %v6207_v45, %v5554_v60  ;;  %v3589_v48 = vpop.f32.mrb[79].mxu1 }
0x12c2   : > { %v3878_v8 = vmul.f32 %v6209_v42, %v3589_v48  ;;  %5599 = vmatprep.mubr.msk.bf16.mxu1 %vm7902_vm6, %v3890_v58  ;;  %vm7918_vm6 = vmmov %vm7911_vm0 }
0x12c4   : > { %v3891_v1 = vpack.c.bf16 %v3879_v33, %v3878_v8  ;;  %v5557_v46 = vpop.f32.mrb[80].mxu1 }
0x12c5   : > { %v3881_v41 = vmul.f32 %v6211_v7, %v5557_v46  ;;  %v3599_v54 = vpop.f32.mrb[81].mxu1 }
0x12c6   : > { %5600 = vmatmul.mubr.msk.bf16.gmra.mrb[52].mxu1 %vm7903_vm2, %v3891_v1  ;;  %v3880_v62 = vmul.f32 %v6213_v4, %v3599_v54  ;;  %vm7919_vm2 = vmmov %vm7911_vm0 }
0x12c8   : > { %v3892_v36 = vpack.c.bf16 %v3881_v41, %v3880_v62  ;;  %v5560_v6 = vpop.f32.mrb[82].mxu1 }
0x12c9   : > { %v3883_v49 = vmul.f32 %v6215_v52, %v5560_v6  ;;  %v3609_v47 = vpop.f32.mrb[83].mxu1 }
0x12ca   : > { %v3882_v28 = vmul.f32 %v6217_v35, %v3609_v47  ;;  %5603 = vmatprep.mubr.msk.bf16.mxu1 %vm7904_vm10, %v3892_v36  ;;  %vm7920_vm10 = vmmov %vm7911_vm0 }
0x12cc   : > { %v3893_v63 = vpack.c.bf16 %v3883_v49, %v3882_v28  ;;  %v5563_v10 = vpop.f32.mrb[84].mxu1 }
0x12cd   : > { %v3885_v61 = vmul.f32 %v6219_v9, %v5563_v10  ;;  %v3619_v11 = vpop.f32.mrb[85].mxu1 }
0x12ce   : > { %5604 = vmatmul.mubr.msk.bf16.gmra.mrb[56].mxu1 %vm7905_vm7, %v3893_v63  ;;  %v3884_v37 = vmul.f32 %v6221_v19, %v3619_v11  ;;  %vm7921_vm7 = vmmov %vm7911_vm0 }
0x12d0   : > { %v3894_v14 = vpack.c.bf16 %v3885_v61, %v3884_v37  ;;  %v5566_v39 = vpop.f32.mrb[86].mxu1 }
0x12d1   : > { %v3887_v12 = vmul.f32 %v6223_v27, %v5566_v39  ;;  %v3629_v59 = vpop.f32.mrb[87].mxu1 }
0x12d2   : > { %v3886_v23 = vmul.f32 %v6225_v34, %v3629_v59  ;;  %5607 = vmatprep.mubr.msk.bf16.mxu1 %vm7906_vm9, %v3894_v14  ;;  %vm7922_vm9 = vmmov %vm7911_vm0 }
0x12d4   : > { %v3895_v31 = vpack.c.bf16 %v3887_v12, %v3886_v23 }
0x12d6   : > { %5608 = vmatmul.mubr.msk.bf16.gmra.mrb[60].mxu1 %vm7907_vm8, %v3895_v31  ;;  %vm7923_vm8 = vmmov %vm7911_vm0 }
0x1391   : > { %v5597_v55 = vpop.f32.mrb[48].mxu1 }
0x1392   : > { %v4059_v5 = vadd.f32 %v5597_v55, %v4587_v21  ;;  %v3971_v3 = vpop.f32.mrb[49].mxu1 }
0x1393   : > { %v4057_v43 = vadd.f32 %v4587_v21, %v3971_v3  ;;  %v5598_v20 = vpop.f32.mrb[50].mxu1 }
0x1394   : > { %4075 = vst.msk [vmem:[%s7559_s19 + $0x10] sm:$0xff] %vm7908_vm4, %v4059_v5  ;;  %v4060_v53 = vadd.f32 %v5598_v20, %v4587_v21  ;;  %v3974_v57 = vpop.f32.mrb[51].mxu1 }
0x1395   : > { %4073 = vst.msk [vmem:[%s7559_s19] sm:$0xff] %vm7909_vm14, %v4057_v43  ;;  %v4058_v2 = vadd.f32 %v4587_v21, %v3974_v57 }
0x1396   : > { %4076 = vst.msk [vmem:[%s7559_s19 + $0x18] sm:$0xff] %vm7910_vm5, %v4060_v53 }
0x1397   : > { %4074 = vst.msk [vmem:[%s7559_s19 + $0x8] sm:$0xff] %vm7911_vm0, %v4058_v2 }
0x1399   : > { %v5601_v15 = vpop.f32.mrb[52].mxu1 }
0x139a   : > { %v4063_v24 = vadd.f32 %v5601_v15, %v4587_v21  ;;  %v3987_v26 = vpop.f32.mrb[53].mxu1 }
0x139b   : > { %v4061_v0 = vadd.f32 %v4587_v21, %v3987_v26  ;;  %v5602_v13 = vpop.f32.mrb[54].mxu1 }
0x139c   : > { %4079 = vst.msk [vmem:[%s7559_s19 + $0x30] sm:$0xff] %vm7912_vm11, %v4063_v24  ;;  %v4064_v22 = vadd.f32 %v5602_v13, %v4587_v21  ;;  %v3990_v50 = vpop.f32.mrb[55].mxu1 }
0x139d   : > { %4077 = vst.msk [vmem:[%s7559_s19 + $0x20] sm:$0xff] %vm7913_vm3, %v4061_v0  ;;  %v4062_v18 = vadd.f32 %v4587_v21, %v3990_v50 }
0x139e   : > { %4080 = vst.msk [vmem:[%s7559_s19 + $0x38] sm:$0xff] %vm7914_vm13, %v4064_v22 }
0x139f   : > { %4078 = vst.msk [vmem:[%s7559_s19 + $0x28] sm:$0xff] %vm7915_vm1, %v4062_v18 }
0x13a1   : > { %v5605_v16 = vpop.f32.mrb[56].mxu1 }
0x13a2   : > { %v4067_v25 = vadd.f32 %v5605_v16, %v4587_v21  ;;  %v4003_v40 = vpop.f32.mrb[57].mxu1 }
0x13a3   : > { %v4065_v56 = vadd.f32 %v4587_v21, %v4003_v40  ;;  %v5606_v38 = vpop.f32.mrb[58].mxu1 }
0x13a4   : > { %4083 = vst.msk [vmem:[%s7559_s19 + $0x50] sm:$0xff] %vm7916_vm12, %v4067_v25  ;;  %v4068_v32 = vadd.f32 %v5606_v38, %v4587_v21  ;;  %v4006_v17 = vpop.f32.mrb[59].mxu1 }
0x13a5   : > { %4081 = vst.msk [vmem:[%s7559_s19 + $0x40] sm:$0xff] %vm7917_vm15, %v4065_v56  ;;  %v4066_v29 = vadd.f32 %v4587_v21, %v4006_v17 }
0x13a6   : > { %4084 = vst.msk [vmem:[%s7559_s19 + $0x58] sm:$0xff] %vm7918_vm6, %v4068_v32 }
0x13a7   : > { %4082 = vst.msk [vmem:[%s7559_s19 + $0x48] sm:$0xff] %vm7919_vm2, %v4066_v29 }
0x13a9   : > { %v5609_v30 = vpop.f32.mrb[60].mxu1 }
0x13aa   : > { %v4071_v45 = vadd.f32 %v5609_v30, %v4587_v21  ;;  %v4019_v58 = vpop.f32.mrb[61].mxu1 }
0x13ab   : > { %v4069_v60 = vadd.f32 %v4587_v21, %v4019_v58  ;;  %v5610_v42 = vpop.f32.mrb[62].mxu1 }
0x13ac   : > { %4087 = vst.msk [vmem:[%s7559_s19 + $0x70] sm:$0xff] %vm7920_vm10, %v4071_v45  ;;  %v4072_v33 = vadd.f32 %v5610_v42, %v4587_v21  ;;  %v4022_v48 = vpop.f32.mrb[63].mxu1 }
0x13ad   : > { %4085 = vst.msk [vmem:[%s7559_s19 + $0x60] sm:$0xff] %vm7921_vm7, %v4069_v60  ;;  %v4070_v7 = vadd.f32 %v4587_v21, %v4022_v48 }
0x13ae   : > { %4088 = vst.msk [vmem:[%s7559_s19 + $0x78] sm:$0xff] %vm7922_vm9, %v4072_v33 }
0x13af   : > { %4086 = vst.msk [vmem:[%s7559_s19 + $0x68] sm:$0xff] %vm7923_vm8, %v4070_v7 }
0x13b0 PF: > { %s19_s30 = sadd.s32 1, %s6248_s30  }
0x13b1   : > { %p16_p5 = scmp.ge.s32.totalorder %s19_s30, 6  }
0x13b3   :  { %18 = sbr.rel (!%p16_p5) target bundleno = 1 (0x1), region = 101 }

</bundles_post_ra>
